<compile_context>
chip_gen: v7x
topology: tpu7x:2x2x1
jax: 0.10.0
libtpu: 0.0.40
codegen_flags: <defaults>
</compile_context>

<pallas_src>
import jax
import jax.numpy as jnp
from jax.experimental import pallas as pl
from jax.experimental.pallas import tpu as pltpu

HW = 7 * 7     # spatial extent the PyTorch forward hard-codes via .reshape(-1, C, 7, 7)
LANES = 128


def _round_up(x, m):
    return -(-x // m) * m


def _head_kernel(xs_ref, xt_ref, ws_ref, wt_ref, b_ref, out_ref):
    # xs_ref: (TB, C_s*49), xt_ref: (TB, C_t*49)  -- lane-dense flat feature slabs.
    # ws_ref/wt_ref: (C*49, NC_pad) pool-expanded fused weights, resident across the grid.
    acc = jnp.dot(xs_ref[...], ws_ref[...], preferred_element_type=jnp.float32)   # (TB, NC_pad)
    acc = acc + jnp.dot(xt_ref[...], wt_ref[...], preferred_element_type=jnp.float32)
    out_ref[...] = (acc + b_ref[...]).astype(out_ref.dtype)


def two_stream_conv1x1_head(x_s_flat, x_t_flat, params, *, batch_tile=64,
                            vmem_limit_bytes=48 * 1024 * 1024):
    """x_s_flat: (N, s_in_ft*49), x_t_flat: (N, t_in_ft*49)  ->  (N, num_class) float32."""
    n = x_s_flat.shape[0]
    s_ft, t_ft = params["s_in_ft"], params["t_in_ft"]
    s_k, t_k = s_ft * HW, t_ft * HW
    assert x_s_flat.shape == (n, s_k) and x_t_flat.shape == (n, t_k)

    # ---- host-side algebraic fusion (exact: conv1x1 / avgpool / Linear are all affine) ----
    #   logits = pooled @ (W1^T @ W2^T) + (b1 @ W2^T + b2)
    w1 = params["conv1x1_w"][:, :, 0, 0].astype(jnp.float32)        # (C_mid, C_in)
    b1 = params["conv1x1_b"].astype(jnp.float32)                    # (C_mid,)
    w2 = params["fc_w"].astype(jnp.float32)                         # (NC, C_mid)
    b2 = params["fc_b"].astype(jnp.float32)                         # (NC,)
    w_fused = w1.T @ w2.T                                           # (C_in, NC)
    b_fused = b1 @ w2.T + b2                                        # (NC,)
    nc = w_fused.shape[1]

    # Lane-dense class dim: pad to a multiple of 128 so output stores are unmasked full-width vst.
    nc_pad = _round_up(nc, LANES)
    w_pad = jnp.zeros((s_ft + t_ft, nc_pad), jnp.float32).at[:, :nc].set(w_fused)

    # Fold AdaptiveAvgPool2d((1,1)) into the weights and expand them over the 49 spatial
    # positions of the flat [c*49 + p] feature layout:  W_exp[c*49 + p, :] = W_fused[c, :] / 49.
    def expand(w_rows, feat_dtype):
        wd = jnp.bfloat16 if feat_dtype == jnp.bfloat16 else jnp.float32
        return jnp.repeat(w_rows * (1.0 / HW), HW, axis=0).astype(wd)

    w_s = expand(w_pad[:s_ft], x_s_flat.dtype)                      # (C_s*49, NC_pad)
    w_t = expand(w_pad[s_ft:], x_t_flat.dtype)                      # (C_t*49, NC_pad)
    b_pad = jnp.zeros((1, nc_pad), jnp.float32).at[:, :nc].set(b_fused[None, :])

    # ---- batch tiling ----
    # TB multiple of 8 (sublane-aligned), capped by the batch; ragged tail handled by a cdiv grid
    # (no wrapper jnp.pad).  Default TB=64 + 48 MiB scoped VMEM keeps the double-buffered bf16
    # feature slabs + resident expanded weights under v7x's 64 MiB physical VMEM while staying at
    # the HBM roofline on v5e/v6e; raise batch_tile / vmem_limit_bytes on v5e/v6e for larger slabs.
    if n < 8:
        tb = n                  # block dim == full array dim (no sublane padding / pad op needed)
    else:
        tb = min(max(8, (batch_tile // 8) * 8), (n // 8) * 8)
        if n >= 16:             # keep >=2 grid steps so v7x's two TensorCores both get work
            tb = min(tb, _round_up(pl.cdiv(n, 2), 8))
    grid = (pl.cdiv(n, tb),)

    out = pl.pallas_call(
        _head_kernel,
        out_shape=jax.ShapeDtypeStruct((n, nc_pad), jnp.float32),
        grid=grid,
        in_specs=[
            pl.BlockSpec((tb, s_k), lambda i: (i, 0)),        # spatial features, lane-dense
            pl.BlockSpec((tb, t_k), lambda i: (i, 0)),        # temporal features, lane-dense
            pl.BlockSpec((s_k, nc_pad), lambda i: (0, 0)),    # expanded fused weight (resident)
            pl.BlockSpec((t_k, nc_pad), lambda i: (0, 0)),    # expanded fused weight (resident)
            pl.BlockSpec((1, nc_pad), lambda i: (0, 0)),      # fused bias
        ],
        out_specs=pl.BlockSpec((tb, nc_pad), lambda i: (i, 0)),
        compiler_params=pltpu.CompilerParams(
            dimension_semantics=("parallel",),                # megacore / v7x dual-TC over batch
            vmem_limit_bytes=vmem_limit_bytes,
        ),
    )(x_s_flat, x_t_flat, w_s, w_t, b_pad)
    # Ragged-tail output rows (if any) never materialize past n; drop the padded class lanes.
    return out[:, :nc]


def _reference(x_s_flat, x_t_flat, params):
    """Pure-JAX NCHW reference mirroring the PyTorch forward (f32 math on the same inputs)."""
    n = x_s_flat.shape[0]
    x_s = x_s_flat.astype(jnp.float32).reshape(n, params["s_in_ft"], 7, 7)
    x_t = x_t_flat.astype(jnp.float32).reshape(n, params["t_in_ft"], 7, 7)
    x = jnp.concatenate([x_s, x_t], axis=1)
    w = params["conv1x1_w"][:, :, 0, 0]                                    # (C_mid, C_in)
    y = jnp.einsum("nchw,oc->nohw", x, w) + params["conv1x1_b"][None, :, None, None]
    pooled = y.mean(axis=(2, 3))                                           # AdaptiveAvgPool2d((1,1))
    return pooled @ params["fc_w"].T + params["fc_b"]


if __name__ == "__main__":
    key = jax.random.PRNGKey(0)
    ks = jax.random.split(key, 6)

    # Small synthetic shapes (a real resnet18 stream has 512 feature channels; use 128 here).
    N = 2
    S_IN_FT = 128
    T_IN_FT = 128
    C_IN = S_IN_FT + T_IN_FT
    C_MID = C_IN // 2
    NUM_CLASS = 10

    # Deterministic synthetic parameters (shapes follow TwoStreamCNN.__init__, conv1x1 branch).
    params = {
        "s_in_ft": S_IN_FT,
        "t_in_ft": T_IN_FT,
        "conv1x1_w": 0.02 * jax.random.normal(ks[0], (C_MID, C_IN, 1, 1), jnp.float32),
        "conv1x1_b": 0.02 * jax.random.normal(ks[1], (C_MID,), jnp.float32),
        "fc_w": 0.02 * jax.random.normal(ks[2], (NUM_CLASS, C_MID), jnp.float32),
        "fc_b": 0.02 * jax.random.normal(ks[3], (NUM_CLASS,), jnp.float32),
    }

    # Stream feature maps as Identity-head (mixed-precision) trunks would emit them: (N, C*49) bf16.
    x_s_features = jax.random.normal(ks[4], (N, S_IN_FT * HW), jnp.float32).astype(jnp.bfloat16)
    x_t_features = jax.random.normal(ks[5], (N, T_IN_FT * HW), jnp.float32).astype(jnp.bfloat16)

    out = two_stream_conv1x1_head(x_s_features, x_t_features, params)
    out = jax.block_until_ready(out)

    ref = _reference(x_s_features, x_t_features, params)
    assert out.shape == (N, NUM_CLASS), out.shape
    assert bool(jnp.allclose(out, ref, atol=2e-3, rtol=2e-3)), "kernel mismatch vs reference"
    print("KERNEL_OK")
</pallas_src>

<mosaic_0001>
module attributes {stable_mosaic.version = 11 : i64} {
  func.func @_head_kernel(%arg0: i32, %arg1: memref<2x6272xbf16, #tpu.memory_space<vmem>>, %arg2: memref<2x6272xbf16, #tpu.memory_space<vmem>>, %arg3: memref<6272x128xbf16, #tpu.memory_space<vmem>>, %arg4: memref<6272x128xbf16, #tpu.memory_space<vmem>>, %arg5: memref<1x128xf32, #tpu.memory_space<vmem>>, %arg6: memref<2x128xf32, #tpu.memory_space<vmem>>) attributes {dimension_semantics = [#tpu.dimension_semantics<parallel>], iteration_bounds = array<i64: 1>, scalar_prefetch = 0 : i64, scratch_operands = 0 : i64, tpu.core_type = #tpu.core_type<tc>, window_params = [{transform_indices = @transform_0, window_bounds = array<i64: 2, 6272>}, {transform_indices = @transform_1, window_bounds = array<i64: 2, 6272>}, {pipeline_mode = #tpu.pipeline_mode<synchronous>, transform_indices = @transform_2, window_bounds = array<i64: 6272, 128>}, {pipeline_mode = #tpu.pipeline_mode<synchronous>, transform_indices = @transform_3, window_bounds = array<i64: 6272, 128>}, {pipeline_mode = #tpu.pipeline_mode<synchronous>, transform_indices = @transform_4, window_bounds = array<i64: 1, 128>}, {transform_indices = @transform_5, window_bounds = array<i64: 2, 128>}]} {
    %c0 = arith.constant 0 : index
    %c0_0 = arith.constant 0 : index
    %0 = vector.load %arg1[%c0, %c0_0] : memref<2x6272xbf16, #tpu.memory_space<vmem>>, vector<2x6272xbf16>
    %c0_1 = arith.constant 0 : index
    %c0_2 = arith.constant 0 : index
    %1 = vector.load %arg3[%c0_1, %c0_2] : memref<6272x128xbf16, #tpu.memory_space<vmem>>, vector<6272x128xbf16>
    %cst = arith.constant dense<0.000000e+00> : vector<2x128xf32>
    %2 = tpu.matmul %0, %1, %cst {dimension_numbers = #tpu.dot_dimension_numbers<[1], [0], [0], [1], [0, 0, 1, 1], [], []>} : vector<2x6272xbf16>, vector<6272x128xbf16>, vector<2x128xf32> -> vector<2x128xf32>
    %c0_3 = arith.constant 0 : index
    %c0_4 = arith.constant 0 : index
    %3 = vector.load %arg2[%c0_3, %c0_4] : memref<2x6272xbf16, #tpu.memory_space<vmem>>, vector<2x6272xbf16>
    %c0_5 = arith.constant 0 : index
    %c0_6 = arith.constant 0 : index
    %4 = vector.load %arg4[%c0_5, %c0_6] : memref<6272x128xbf16, #tpu.memory_space<vmem>>, vector<6272x128xbf16>
    %cst_7 = arith.constant dense<0.000000e+00> : vector<2x128xf32>
    %5 = tpu.matmul %3, %4, %cst_7 {dimension_numbers = #tpu.dot_dimension_numbers<[1], [0], [0], [1], [0, 0, 1, 1], [], []>} : vector<2x6272xbf16>, vector<6272x128xbf16>, vector<2x128xf32> -> vector<2x128xf32>
    %6 = arith.addf %2, %5 : vector<2x128xf32>
    %c0_8 = arith.constant 0 : index
    %c0_9 = arith.constant 0 : index
    %7 = vector.load %arg5[%c0_8, %c0_9] : memref<1x128xf32, #tpu.memory_space<vmem>>, vector<1x128xf32>
    %8 = vector.broadcast %7 : vector<1x128xf32> to vector<2x128xf32>
    %9 = arith.addf %6, %8 : vector<2x128xf32>
    %c0_10 = arith.constant 0 : index
    %c0_11 = arith.constant 0 : index
    %10 = vector.load %arg6[%c0_10, %c0_11] : memref<2x128xf32, #tpu.memory_space<vmem>>, vector<2x128xf32>
    tpu.vector_store %arg6[%c0_10, %c0_11], %9 {strides = array<i32>} : memref<2x128xf32, #tpu.memory_space<vmem>>, vector<2x128xf32>,
    return
  }
  func.func @transform_0(%arg0: i32) -> (i32, i32) {
    %c0_i32 = arith.constant 0 : i32
    %c0_i32_0 = arith.constant 0 : i32
    return %arg0, %c0_i32 : i32, i32
  }
  func.func @transform_1(%arg0: i32) -> (i32, i32) {
    %c0_i32 = arith.constant 0 : i32
    %c0_i32_0 = arith.constant 0 : i32
    return %arg0, %c0_i32 : i32, i32
  }
  func.func @transform_2(%arg0: i32) -> (i32, i32) {
    %c0_i32 = arith.constant 0 : i32
    %c0_i32_0 = arith.constant 0 : i32
    %c0_i32_1 = arith.constant 0 : i32
    return %c0_i32, %c0_i32_0 : i32, i32
  }
  func.func @transform_3(%arg0: i32) -> (i32, i32) {
    %c0_i32 = arith.constant 0 : i32
    %c0_i32_0 = arith.constant 0 : i32
    %c0_i32_1 = arith.constant 0 : i32
    return %c0_i32, %c0_i32_0 : i32, i32
  }
  func.func @transform_4(%arg0: i32) -> (i32, i32) {
    %c0_i32 = arith.constant 0 : i32
    %c0_i32_0 = arith.constant 0 : i32
    %c0_i32_1 = arith.constant 0 : i32
    return %c0_i32, %c0_i32_0 : i32, i32
  }
  func.func @transform_5(%arg0: i32) -> (i32, i32) {
    %c0_i32 = arith.constant 0 : i32
    %c0_i32_0 = arith.constant 0 : i32
    return %arg0, %c0_i32 : i32, i32
  }
}

</mosaic_0001>

<bundles_post_ra>
// kernel: tpu_custom_call.1
= control target key start
LH: loop header
LB: loop body
LE: loop exit
PB: predicated region body
PF: predicated region fallthrough
CT: control target
= control target key end

     0   :  { %10 = vsyncpa [#allocation3], 0  ;;  %s12388_s0 = inlined_call_operand.hbm [shape: bf16[2,6272], index: 0, kind: input, shape index: {}]   ;;  %s12389_s1 = inlined_call_operand.hbm [shape: bf16[2,6272], index: 1, kind: input, shape index: {}]   ;;  %s12390_s2 = inlined_call_operand.hbm [shape: bf16[6272,128], index: 2, kind: input, shape index: {}]   ;;  %s12391_s3 = inlined_call_operand.hbm [shape: bf16[6272,128], index: 3, kind: input, shape index: {}]   ;;  %s12392_s4 = inlined_call_operand.hbm [shape: f32[1,128], index: 4, kind: input, shape index: {}]   ;;  %s12393_s5 = inlined_call_operand.hbm [shape: f32[2,128], index: 5, kind: output, shape index: {}]  }
   0x1   :  { %11 = vsyncpa [#allocation6], 0 }
   0x2   :  { %12 = vsyncpa [#allocation9], 0 }
   0x3   :  { %13 = vsyncpa [#allocation4], 0  ;;  %s11972_s18 = smov [#allocation5]   ;;  %s11832_s22 = scalar_lea.hbm %s12389_s1, 784 }
   0x4   :  { %s30_s19 = sshll.u32 %s11972_s18, 4  ;;  %p11833_p0 = scmp.ne.s32.totalorder %s12389_s1, %s11832_s22  ;;  %s31_s19 = int_to_ptr.vmem [resolvable:$true] %s30_s19 }
   0x5   :  { %p11836_p1 = scmp.lt.u32.totalorder %s11832_s22, %s12389_s1 }
   0x7   :  { %p11838_p2 = pnand %p11836_p1, %p11833_p0 }
   0x9   :  { %11841 = shalt.err (!%p11838_p2)
}
   0xa   :  { %s11842_s27 = scalar_lea.vmem %s31_s19, 784  ;;  %s11846_s28 = scalar_lea.vmem %s31_s19, 800 }
   0xb   :  { %p11843_p3 = scmp.ne.s32.totalorder %s31_s19, %s11842_s27  ;;  %p11847_p4 = scmp.lt.s32.totalorder %s31_s19, %s31_s19 }
   0xc   :  { %p11848_p5 = scmp.lt.s32.totalorder %s11846_s28, %s11842_s27 }
   0xe   :  { %p11849_p6 = por %p11848_p5, %p11847_p4 }
  0x10   :  { %p11850_p7 = pnand %p11849_p6, %p11843_p3 }
  0x12   :  { %11853 = shalt.err (!%p11850_p7)
}
  0x13   :  { %33 = dma.hbm_to_vmem [thread:$0]  %s12389_s1, 784, %s31_s19, [#allocation6]  }
  0x14   :  { %s11973_s6 = smov [#allocation8]   ;;  %s11974_s8 = smov [#allocation2]  }
  0x15   :  { %s51_s7 = sshll.u32 %s11973_s6, 4  ;;  %s20_s9 = sshll.u32 %s11974_s8, 4  ;;  %s52_s7 = int_to_ptr.vmem [resolvable:$true] %s51_s7  ;;  %s21_s9 = int_to_ptr.vmem [resolvable:$true] %s20_s9 }
  0x16   :  { %s11854_s12 = scalar_lea.hbm %s12391_s3, 50176 }
  0x17   :  { %p11855_p8 = scmp.ne.s32.totalorder %s12391_s3, %s11854_s12  ;;  %p11858_p9 = scmp.lt.u32.totalorder %s11854_s12, %s12391_s3 }
  0x19   :  { %p11860_p10 = pnand %p11858_p9, %p11855_p8 }
  0x1b   :  { %11863 = shalt.err (!%p11860_p10)
}
  0x1c   :  { %s11864_s1 = scalar_lea.vmem %s52_s7, 50176  ;;  %p11869_p12 = scmp.lt.s32.totalorder %s52_s7, %s52_s7 }
  0x1d   :  { %p11865_p11 = scmp.ne.s32.totalorder %s52_s7, %s11864_s1  ;;  %p11870_p13 = scmp.lt.s32.totalorder %s11864_s1, %s11864_s1 }
  0x1f   :  { %p11871_p0 = por %p11870_p13, %p11869_p12 }
  0x21   :  { %p11872_p1 = pnand %p11871_p0, %p11865_p11 }
  0x23   :  { %11875 = shalt.err (!%p11872_p1)
}
  0x24   :  { %s11975_s17 = smov 64   ;;  %s11976_s18 = smov 4  }
  0x25   :  { %57 = dma.hbm_to_vmem [thread:$0]  %s12391_s3, 50176, %s52_s7, [#allocation9], %s11975_s17, %s11975_s17, %s11976_s18  }
  0x26   :  { %s11876_s23 = scalar_lea.hbm %s12388_s0, 784 }
  0x27   :  { %p11877_p2 = scmp.ne.s32.totalorder %s12388_s0, %s11876_s23  ;;  %p11880_p3 = scmp.lt.u32.totalorder %s11876_s23, %s12388_s0 }
  0x29   :  { %p11882_p4 = pnand %p11880_p3, %p11877_p2 }
  0x2b   :  { %11885 = shalt.err (!%p11882_p4)
}
  0x2c   :  { %s11886_s28 = scalar_lea.vmem %s21_s9, 784  ;;  %s11890_s29 = scalar_lea.vmem %s21_s9, 800 }
  0x2d   :  { %p11887_p5 = scmp.ne.s32.totalorder %s21_s9, %s11886_s28  ;;  %p11891_p6 = scmp.lt.s32.totalorder %s21_s9, %s21_s9 }
  0x2e   :  { %p11892_p7 = scmp.lt.s32.totalorder %s11890_s29, %s11886_s28 }
  0x30   :  { %p11893_p8 = por %p11892_p7, %p11891_p6 }
  0x32   :  { %p11894_p9 = pnand %p11893_p8, %p11887_p5 }
  0x34   :  { %11897 = shalt.err (!%p11894_p9)
}
  0x35   :  { %23 = dma.hbm_to_vmem [thread:$0]  %s12388_s0, 784, %s21_s9, [#allocation3]  }
  0x36   :  { %s11977_s6 = smov [#allocation7]   ;;  %s11978_s8 = smov [#allocation10]  }
  0x37   :  { %s39_s7 = sshll.u32 %s11977_s6, 4  ;;  %s64_s10 = sshll.u32 %s11978_s8, 4  ;;  %s40_s7 = int_to_ptr.vmem [resolvable:$true] %s39_s7  ;;  %s65_s10 = int_to_ptr.vmem [resolvable:$true] %s64_s10 }
  0x38   :  { %s11898_s13 = scalar_lea.hbm %s12390_s2, 50176 }
  0x39   :  { %p11899_p10 = scmp.ne.s32.totalorder %s12390_s2, %s11898_s13  ;;  %p11902_p11 = scmp.lt.u32.totalorder %s11898_s13, %s12390_s2 }
  0x3b   :  { %p11904_p12 = pnand %p11902_p11, %p11899_p10 }
  0x3d   :  { %11907 = shalt.err (!%p11904_p12)
}
  0x3e   :  { %s11908_s0 = scalar_lea.vmem %s40_s7, 50176  ;;  %p11913_p0 = scmp.lt.s32.totalorder %s40_s7, %s40_s7 }
  0x3f   :  { %p11909_p13 = scmp.ne.s32.totalorder %s40_s7, %s11908_s0  ;;  %p11914_p1 = scmp.lt.s32.totalorder %s11908_s0, %s11908_s0 }
  0x41   :  { %p11915_p2 = por %p11914_p1, %p11913_p0 }
  0x43   :  { %p11916_p3 = pnand %p11915_p2, %p11909_p13 }
  0x45   :  { %11919 = shalt.err (!%p11916_p3)
}
  0x46   :  { %45 = dma.hbm_to_vmem [thread:$0]  %s12390_s2, 50176, %s40_s7, [#allocation6], %s11975_s17, %s11975_s17, %s11976_s18  }
  0x47   :  { %s11920_s22 = scalar_lea.hbm %s12392_s4, 16 }
  0x48   :  { %p11921_p4 = scmp.ne.s32.totalorder %s12392_s4, %s11920_s22  ;;  %p11924_p5 = scmp.lt.u32.totalorder %s11920_s22, %s12392_s4 }
  0x4a   :  { %p11926_p6 = pnand %p11924_p5, %p11921_p4 }
  0x4c   :  { %11929 = shalt.err (!%p11926_p6)
}
  0x4d   :  { %s11930_s27 = scalar_lea.vmem %s65_s10, 16  ;;  %s11934_s28 = scalar_lea.vmem %s65_s10, 32 }
  0x4e   :  { %p11931_p7 = scmp.ne.s32.totalorder %s65_s10, %s11930_s27  ;;  %p11935_p8 = scmp.lt.s32.totalorder %s65_s10, %s65_s10 }
  0x4f   :  { %p11936_p9 = scmp.lt.s32.totalorder %s11934_s28, %s11930_s27 }
  0x51   :  { %p11937_p10 = por %p11936_p9, %p11935_p8 }
  0x53   :  { %p11938_p11 = pnand %p11937_p10, %p11931_p7 }
  0x55   :  { %11941 = shalt.err (!%p11938_p11)
}
  0x56   :  { %67 = dma.hbm_to_vmem [thread:$0]  %s12392_s4, 16, %s65_s10, [#allocation9]  }
  0x57   :  { %11964 = dma.done.wait [#allocation3], 784  }
  0x58   :  { %11965 = vsyncadd [#allocation3], 4294966512 }
  0x59   :  { %11966 = dma.done.wait [#allocation6], 50960  }
  0x5a   :  { %11967 = vsyncadd [#allocation6], 4294916336 }
  0x5b   :  { %11968 = dma.done.wait [#allocation9], 50192  }
  0x5c   :  { %11969 = vsyncadd [#allocation9], 4294917104  ;;  %v11036_v0 = vld [vmem:[#allocation8 + $0x40] sm:$0xff]   ;;  %v11040_v4 = vld [vmem:[#allocation8 + $0x48] sm:$0xff]   ;;  %v11979_v22 = vmov 1966171168   ;;  %v1677_v24 = vlaneseq }
  0x5d   :  { %v11037_v1 = vld [vmem:[#allocation8 + $0xc0] sm:$0xff]   ;;  %9911 = vmatprep.subr.bf16.mxu0 %v11036_v0  ;;  %v11041_v5 = vld [vmem:[#allocation8 + $0xc8] sm:$0xff]   ;;  %v11044_v8 = vld [vmem:[#allocation8 + $0x50] sm:$0xff]   ;;  %v1675_v23 = vunpack.c.l.s4 %v11979_v22  ;;  %vm11981_vm0 = vmmov 0   ;;  %s11982_s4 = smov [#allocation11]  }
  0x5e   :  { %v11038_v2 = vld [vmem:[#allocation8] sm:$0xff]   ;;  %9933 = vmatprep.subr.bf16.mxu1 %v11037_v1  ;;  %v11042_v6 = vld [vmem:[#allocation8 + $0x8] sm:$0xff]   ;;  %v11045_v9 = vld [vmem:[#allocation8 + $0xd0] sm:$0xff]   ;;  %v1678_v30 = vshrl.u32 %v1677_v24, 7  ;;  %s9113_s18 = sshll.u32 %s11982_s4, 4  ;;  %s9114_s18 = int_to_ptr.vmem [resolvable:$true] %s9113_s18 }
  0x5f   :  { %v11039_v3 = vld [vmem:[#allocation8 + $0x80] sm:$0xff]   ;;  %9912 = vmatpush3.bf16.msra.mxu0 %v11038_v2  ;;  %v11043_v7 = vld [vmem:[#allocation8 + $0x88] sm:$0xff]   ;;  %v11046_v10 = vld [vmem:[#allocation8 + $0x10] sm:$0xff]   ;;  %v1676_v29 = vunpack.c.0.s8 %v1675_v23  ;;  %s11942_s29 = scalar_lea.vmem %s9114_s18, 32  ;;  %p11947_p13 = scmp.lt.s32.totalorder %s9114_s18, %s9114_s18 }
  0x60   :  { %9934 = vmatpush3.bf16.msra.mxu1 %v11039_v3  ;;  %9913 = vmatprep.subr.bf16.mxu0 %v11040_v4  ;;  %v11047_v11 = vld [vmem:[#allocation8 + $0x90] sm:$0xff]   ;;  %v11048_v12 = vld [vmem:[#allocation8 + $0x58] sm:$0xff]   ;;  %v11052_v16 = vld [vmem:[#allocation8 + $0x60] sm:$0xff]   ;;  %p11943_p12 = scmp.ne.s32.totalorder %s9114_s18, %s11942_s29  ;;  %p11948_p0 = scmp.lt.s32.totalorder %s11942_s29, %s11942_s29 }
  0x61   :  { %9935 = vmatprep.subr.bf16.mxu1 %v11041_v5  ;;  %v11049_v13 = vld [vmem:[#allocation8 + $0xd8] sm:$0xff]   ;;  %v11053_v17 = vld [vmem:[#allocation8 + $0xe0] sm:$0xff]   ;;  %v11056_v20 = vld [vmem:[#allocation8 + $0x68] sm:$0xff]   ;;  %v12079_v35 = vsub.s32 %v1676_v29, %v1678_v30 }
  0x62   :  { %v11050_v14 = vld [vmem:[#allocation8 + $0x18] sm:$0xff]   ;;  %v11054_v18 = vld [vmem:[#allocation8 + $0x20] sm:$0xff]   ;;  %v11057_v21 = vld [vmem:[#allocation8 + $0xe8] sm:$0xff]   ;;  %p11949_p1 = por %p11948_p0, %p11947_p13 }
  0x63   :  { %9914 = vmatpush3.bf16.msra.mxu0 %v11042_v6  ;;  %v11051_v15 = vld [vmem:[#allocation8 + $0x98] sm:$0xff]   ;;  %v11055_v19 = vld [vmem:[#allocation8 + $0xa0] sm:$0xff]   ;;  %v11058_v25 = vld [vmem:[#allocation8 + $0x28] sm:$0xff]  }
  0x64   :  { %9936 = vmatpush3.bf16.msra.mxu1 %v11043_v7  ;;  %9915 = vmatprep.subr.bf16.mxu0 %v11044_v8  ;;  %v11059_v26 = vld [vmem:[#allocation8 + $0xa8] sm:$0xff]   ;;  %v11060_v27 = vld [vmem:[#allocation8 + $0x70] sm:$0xff]   ;;  %v11064_v33 = vld [vmem:[#allocation8 + $0x78] sm:$0xff]   ;;  %p11950_p2 = pnand %p11949_p1, %p11943_p12 }
  0x65   :  { %9937 = vmatprep.subr.bf16.mxu1 %v11045_v9  ;;  %v11061_v28 = vld [vmem:[#allocation8 + $0xf0] sm:$0xff]   ;;  %v11065_v34 = vld [vmem:[#allocation8 + $0xf8] sm:$0xff]   ;;  %v11069_v41 = vld [vmem:[#allocation8 + $0x140] sm:$0xff]  }
  0x66   :  { %v11062_v31 = vld [vmem:[#allocation8 + $0x30] sm:$0xff]   ;;  %v11066_v36 = vld [vmem:[#allocation8 + $0x38] sm:$0xff]   ;;  %v11070_v42 = vld [vmem:[#allocation8 + $0x1c0] sm:$0xff]  }
  0x67   :  { %9916 = vmatpush3.bf16.msra.mxu0 %v11046_v10  ;;  %v11063_v32 = vld [vmem:[#allocation8 + $0xb0] sm:$0xff]   ;;  %v11067_v37 = vld [vmem:[#allocation8 + $0xb8] sm:$0xff]   ;;  %v11071_v46 = vld [vmem:[#allocation8 + $0x100] sm:$0xff]  }
  0x68   :  { %9938 = vmatpush3.bf16.msra.mxu1 %v11047_v11  ;;  %9917 = vmatprep.subr.bf16.mxu0 %v11048_v12  ;;  %v875_v38 = vld [vmem:[#allocation5] sm:$0xff]  ;;  %v11072_v48 = vld [vmem:[#allocation8 + $0x180] sm:$0xff]   ;;  %v11081_v62 = vld [vmem:[#allocation8 + $0x158] sm:$0xff]  }
  0x69   :  { %9939 = vmatprep.subr.bf16.mxu1 %v11049_v13  ;;  %v1673_v39 = vcombine.high %v875_v38, %v875_v38  ;;  %v1680_v40 = vrot.slane %v875_v38, %v12079_v35  ;;  %v11073_v51 = vld [vmem:[#allocation8 + $0x148] sm:$0xff]   ;;  %v11077_v58 = vld [vmem:[#allocation8 + $0x150] sm:$0xff]   ;;  %v11082_v63 = vld [vmem:[#allocation8 + $0x1d8] sm:$0xff]  }
  0x6a   :  { %v11074_v53 = vld [vmem:[#allocation8 + $0x1c8] sm:$0xff]   ;;  %v11078_v59 = vld [vmem:[#allocation8 + $0x1d0] sm:$0xff]   ;;  %v11083_v0 = vld [vmem:[#allocation8 + $0x118] sm:$0xff]  }
  0x6b   :  { %9918 = vmatpush3.bf16.msra.mxu0 %v11050_v14  ;;  %v1688_v43 = vcombine.high %v1680_v40, %v1680_v40  ;;  %v1696_v44 = vrot.slane %v1680_v40, %v12079_v35  ;;  %v12084_v45 = vrot.slane %v1673_v39, %v12079_v35  ;;  %v11075_v55 = vld [vmem:[#allocation8 + $0x108] sm:$0xff]   ;;  %v11079_v60 = vld [vmem:[#allocation8 + $0x110] sm:$0xff]   ;;  %v11084_v1 = vld [vmem:[#allocation8 + $0x198] sm:$0xff]  }
  0x6c   :  { %9940 = vmatpush3.bf16.msra.mxu1 %v11051_v15  ;;  %9919 = vmatprep.subr.bf16.mxu0 %v11052_v16  ;;  %v11076_v56 = vld [vmem:[#allocation8 + $0x188] sm:$0xff]   ;;  %v11080_v61 = vld [vmem:[#allocation8 + $0x190] sm:$0xff]   ;;  %v11085_v2 = vld [vmem:[#allocation8 + $0x160] sm:$0xff]  }
  0x6d   :  { %9941 = vmatprep.subr.bf16.mxu1 %v11053_v17  ;;  %v1710_v47 = vrot.slane %v1688_v43, %v12079_v35  ;;  %v1689_v49 = vcombine.high %v12084_v45, %v12084_v45  ;;  %v1718_v50 = vcombine.high %v1696_v44, %v1696_v44  ;;  %v11086_v3 = vld [vmem:[#allocation8 + $0x1e0] sm:$0xff]   ;;  %v11089_v6 = vld [vmem:[#allocation8 + $0x168] sm:$0xff]   ;;  %v11093_v10 = vld [vmem:[#allocation8 + $0x170] sm:$0xff]  }
  0x6e   :  { %v11087_v4 = vld [vmem:[#allocation8 + $0x120] sm:$0xff]   ;;  %v11090_v7 = vld [vmem:[#allocation8 + $0x1e8] sm:$0xff]   ;;  %v11094_v11 = vld [vmem:[#allocation8 + $0x1f0] sm:$0xff]  }
  0x6f   :  { %9920 = vmatpush3.bf16.msra.mxu0 %v11054_v18  ;;  %4414 = vmatprep.mubr.bf16.mxu0 %v1710_v47  ;;  %v1720_v52 = vcombine.high %v1710_v47, %v1710_v47  ;;  %v1717_v54 = vrot.slane %v1689_v49, %v12079_v35  ;;  %v11088_v5 = vld [vmem:[#allocation8 + $0x1a0] sm:$0xff]   ;;  %v11091_v8 = vld [vmem:[#allocation8 + $0x128] sm:$0xff]   ;;  %v11095_v12 = vld [vmem:[#allocation8 + $0x130] sm:$0xff]   ;;  %v1703_v18 = vrot.slane %v12084_v45, %v12079_v35 }
  0x70   :  { %9942 = vmatpush3.bf16.msra.mxu1 %v11055_v19  ;;  %9921 = vmatprep.subr.bf16.mxu0 %v11056_v20  ;;  %v11092_v9 = vld [vmem:[#allocation8 + $0x1a8] sm:$0xff]   ;;  %v11096_v13 = vld [vmem:[#allocation8 + $0x1b0] sm:$0xff]   ;;  %v11097_v14 = vld [vmem:[#allocation8 + $0x178] sm:$0xff]  }
  0x71   :  { %9943 = vmatprep.subr.bf16.mxu1 %v11057_v21  ;;  %4454 = vmatprep.mubr.bf16.mxu1 %v1720_v52  ;;  %v1721_v57 = vcombine.high %v1717_v54, %v1717_v54  ;;  %v11098_v15 = vld [vmem:[#allocation8 + $0x1f8] sm:$0xff]   ;;  %v11101_v19 = vld [vmem:[#allocation8 + $0x240] sm:$0xff]   ;;  %v1719_v23 = vcombine.high %v1703_v18, %v1703_v18  ;;  %v11105_v24 = vld [vmem:[#allocation8 + $0x248] sm:$0xff]  }
  0x72   :  { %v11099_v16 = vld [vmem:[#allocation8 + $0x138] sm:$0xff]   ;;  %v11102_v20 = vld [vmem:[#allocation8 + $0x2c0] sm:$0xff]   ;;  %v11110_v29 = vld [vmem:[#allocation8 + $0x2d0] sm:$0xff]  }
  0x73   :  { %9922 = vmatpush3.bf16.msra.mxu0 %v11058_v25  ;;  %v11100_v17 = vld [vmem:[#allocation8 + $0x1b8] sm:$0xff]   ;;  %v11103_v21 = vld [vmem:[#allocation8 + $0x200] sm:$0xff]   ;;  %v11106_v25 = vld [vmem:[#allocation8 + $0x2c8] sm:$0xff]  }
  0x74   :  { %9944 = vmatpush3.bf16.msra.mxu1 %v11059_v26  ;;  %9923 = vmatprep.subr.bf16.mxu0 %v11060_v27  ;;  %v11104_v22 = vld [vmem:[#allocation8 + $0x280] sm:$0xff]   ;;  %v11107_v26 = vld [vmem:[#allocation8 + $0x208] sm:$0xff]   ;;  %v11111_v30 = vld [vmem:[#allocation8 + $0x210] sm:$0xff]  }
  0x75   :  { %9945 = vmatprep.subr.bf16.mxu1 %v11061_v28  ;;  %v11108_v27 = vld [vmem:[#allocation8 + $0x288] sm:$0xff]   ;;  %v11109_v28 = vld [vmem:[#allocation8 + $0x250] sm:$0xff]   ;;  %v11118_v38 = vld [vmem:[#allocation8 + $0x2e0] sm:$0xff]  }
  0x76   :  { %v11119_v39 = vld [vmem:[#allocation8 + $0x220] sm:$0xff]   ;;  %v11123_v43 = vld [vmem:[#allocation8 + $0x228] sm:$0xff]   ;;  %v11125_v45 = vld [vmem:[#allocation8 + $0x270] sm:$0xff]  }
  0x77   :  { %9924 = vmatpush3.bf16.msra.mxu0 %v11062_v31  ;;  %v11112_v31 = vld [vmem:[#allocation8 + $0x290] sm:$0xff]   ;;  %v11120_v40 = vld [vmem:[#allocation8 + $0x2a0] sm:$0xff]   ;;  %v11129_v49 = vld [vmem:[#allocation8 + $0x278] sm:$0xff]  }
  0x78   :  { %9946 = vmatpush3.bf16.msra.mxu1 %v11063_v32  ;;  %9925 = vmatprep.subr.bf16.mxu0 %v11064_v33  ;;  %v11113_v32 = vld [vmem:[#allocation8 + $0x258] sm:$0xff]   ;;  %v11127_v47 = vld [vmem:[#allocation8 + $0x230] sm:$0xff]  }
  0x79   :  { %9947 = vmatprep.subr.bf16.mxu1 %v11065_v34  ;;  %v11114_v33 = vld [vmem:[#allocation8 + $0x2d8] sm:$0xff]  }
  0x7a   :  { %v11115_v34 = vld [vmem:[#allocation8 + $0x218] sm:$0xff]  }
  0x7b   :  { %9926 = vmatpush3.bf16.msra.mxu0 %v11066_v36  ;;  %v11116_v36 = vld [vmem:[#allocation8 + $0x298] sm:$0xff]  }
  0x7c   :  { %9948 = vmatpush3.bf16.msra.mxu1 %v11067_v37  ;;  %9955 = vmatprep.subr.bf16.mxu0 %v11069_v41  ;;  %v11117_v37 = vld [vmem:[#allocation8 + $0x260] sm:$0xff]   ;;  %v11121_v41 = vld [vmem:[#allocation8 + $0x268] sm:$0xff]   ;;  %v876_v52 = vld [vmem:[#allocation5 + $0x8] sm:$0xff] }
  0x7d   :  { %9977 = vmatprep.subr.bf16.mxu1 %v11070_v42  ;;  %v11122_v42 = vld [vmem:[#allocation8 + $0x2e8] sm:$0xff]  }
  0x7e   :  { %4415 = vmatmul.mubr.bf16.vlgmr.msra.gmra.mrb[0].mxu0 %v1696_v44  ;;  %v11124_v44 = vld [vmem:[#allocation8 + $0x2a8] sm:$0xff]  }
  0x7f   :  { %9956 = vmatpush3.bf16.msra.mxu0 %v11071_v46  ;;  %4455 = vmatmul.mubr.bf16.vlgmr.msra.gmra.mrb[0].mxu1 %v1718_v50  ;;  %v11126_v46 = vld [vmem:[#allocation8 + $0x2f0] sm:$0xff]   ;;  %v11130_v50 = vld [vmem:[#allocation8 + $0x2f8] sm:$0xff]  }
  0x80   :  { %9957 = vmatprep.subr.bf16.mxu0 %v11073_v51  ;;  %9978 = vmatpush3.bf16.msra.mxu1 %v11072_v48  ;;  %v11128_v48 = vld [vmem:[#allocation8 + $0x2b0] sm:$0xff]   ;;  %v11131_v51 = vld [vmem:[#allocation8 + $0x238] sm:$0xff]  }
  0x81   :  { %4494 = vmatprep.mubr.bf16.mxu0 %v1717_v54  ;;  %9979 = vmatprep.subr.bf16.mxu1 %v11074_v53  ;;  %v11132_v53 = vld [vmem:[#allocation8 + $0x2b8] sm:$0xff]   ;;  %v1729_v54 = vrot.slane %v876_v52, %v12079_v35 }
  0x82   :  { %4534 = vmatprep.mubr.bf16.mxu1 %v1721_v57 }
  0x83   :  { %9958 = vmatpush3.bf16.msra.mxu0 %v11075_v55  ;;  %v1722_v55 = vcombine.high %v876_v52, %v876_v52  ;;  %v1737_v57 = vcombine.high %v1729_v54, %v1729_v54  ;;  %v11182_v52 = vld [vmem:[#allocation8 + $0x460] sm:$0xff]  }
  0x84   :  { %9959 = vmatprep.subr.bf16.mxu0 %v11077_v58  ;;  %9980 = vmatpush3.bf16.msra.mxu1 %v11076_v56  ;;  %v11133_v56 = vld [vmem:[#allocation8 + $0x340] sm:$0xff]   ;;  %v1745_v58 = vrot.slane %v1729_v54, %v12079_v35 }
  0x85   :  { %9981 = vmatprep.subr.bf16.mxu1 %v11078_v59  ;;  %v11134_v59 = vld [vmem:[#allocation8 + $0x3c0] sm:$0xff]  }
  0x86   :  { %v11184_v54 = vld [vmem:[#allocation8 + $0x420] sm:$0xff]  }
  0x87   :  { %9960 = vmatpush3.bf16.msra.mxu0 %v11079_v60  ;;  %v12095_v60 = vrot.slane %v1722_v55, %v12079_v35  ;;  %v11185_v55 = vld [vmem:[#allocation8 + $0x4a0] sm:$0xff]  }
  0x88   :  { %9961 = vmatprep.subr.bf16.mxu0 %v11081_v62  ;;  %9982 = vmatpush3.bf16.msra.mxu1 %v11080_v61  ;;  %v11135_v61 = vld [vmem:[#allocation8 + $0x300] sm:$0xff]   ;;  %v1759_v62 = vrot.slane %v1737_v57, %v12079_v35  ;;  %v11187_v57 = vld [vmem:[#allocation8 + $0x4e8] sm:$0xff]  }
  0x89   :  { %9983 = vmatprep.subr.bf16.mxu1 %v11082_v63  ;;  %v11136_v63 = vld [vmem:[#allocation8 + $0x380] sm:$0xff]  }
  0x8b   :  { %9962 = vmatpush3.bf16.msra.mxu0 %v11083_v0  ;;  %v1738_v0 = vcombine.high %v12095_v60, %v12095_v60 }
  0x8c   :  { %9963 = vmatprep.subr.bf16.mxu0 %v11085_v2  ;;  %9984 = vmatpush3.bf16.msra.mxu1 %v11084_v1  ;;  %v1767_v1 = vcombine.high %v1745_v58, %v1745_v58  ;;  %v11137_v2 = vld [vmem:[#allocation8 + $0x348] sm:$0xff]  }
  0x8d   :  { %9985 = vmatprep.subr.bf16.mxu1 %v11086_v3  ;;  %v1769_v3 = vcombine.high %v1759_v62, %v1759_v62 }
  0x8f   :  { %9964 = vmatpush3.bf16.msra.mxu0 %v11087_v4  ;;  %v11138_v4 = vld [vmem:[#allocation8 + $0x3c8] sm:$0xff]  }
  0x90   :  { %9965 = vmatprep.subr.bf16.mxu0 %v11089_v6  ;;  %9986 = vmatpush3.bf16.msra.mxu1 %v11088_v5  ;;  %v1766_v5 = vrot.slane %v1738_v0, %v12079_v35  ;;  %v11139_v6 = vld [vmem:[#allocation8 + $0x308] sm:$0xff]   ;;  %v11194_v0 = vld [vmem:[#allocation8 + $0x478] sm:$0xff]  }
  0x91   :  { %9987 = vmatprep.subr.bf16.mxu1 %v11090_v7  ;;  %v11140_v7 = vld [vmem:[#allocation8 + $0x388] sm:$0xff]  }
  0x93   :  { %9966 = vmatpush3.bf16.msra.mxu0 %v11091_v8  ;;  %v1770_v8 = vcombine.high %v1766_v5, %v1766_v5 }
  0x94   :  { %9967 = vmatprep.subr.bf16.mxu0 %v11093_v10  ;;  %9988 = vmatpush3.bf16.msra.mxu1 %v11092_v9  ;;  %v11141_v9 = vld [vmem:[#allocation8 + $0x350] sm:$0xff]  }
  0x95   :  { %9989 = vmatprep.subr.bf16.mxu1 %v11094_v11  ;;  %v11142_v10 = vld [vmem:[#allocation8 + $0x3d0] sm:$0xff]  }
  0x96   :  { %v11143_v11 = vld [vmem:[#allocation8 + $0x310] sm:$0xff]  }
  0x97   :  { %9968 = vmatpush3.bf16.msra.mxu0 %v11095_v12  ;;  %v11144_v12 = vld [vmem:[#allocation8 + $0x390] sm:$0xff]  }
  0x98   :  { %9969 = vmatprep.subr.bf16.mxu0 %v11097_v14  ;;  %9990 = vmatpush3.bf16.msra.mxu1 %v11096_v13  ;;  %v11145_v13 = vld [vmem:[#allocation8 + $0x358] sm:$0xff]  }
  0x99   :  { %9991 = vmatprep.subr.bf16.mxu1 %v11098_v15  ;;  %v11146_v14 = vld [vmem:[#allocation8 + $0x3d8] sm:$0xff]  }
  0x9a   :  { %v11147_v15 = vld [vmem:[#allocation8 + $0x318] sm:$0xff]  }
  0x9b   :  { %9970 = vmatpush3.bf16.msra.mxu0 %v11099_v16  ;;  %v11148_v16 = vld [vmem:[#allocation8 + $0x398] sm:$0xff]  }
  0x9c   :  { %9999 = vmatprep.subr.bf16.mxu0 %v11101_v19  ;;  %9992 = vmatpush3.bf16.msra.mxu1 %v11100_v17  ;;  %v11149_v17 = vld [vmem:[#allocation8 + $0x360] sm:$0xff]  }
  0x9d   :  { %10021 = vmatprep.subr.bf16.mxu1 %v11102_v20  ;;  %v11151_v19 = vld [vmem:[#allocation8 + $0x320] sm:$0xff]  }
  0x9e   :  { %4495 = vmatmul.mubr.bf16.vlgmr.msra.gmra.mrb[4].mxu0 %v1703_v18  ;;  %v11150_v18 = vld [vmem:[#allocation8 + $0x3e0] sm:$0xff]  }
  0x9f   :  { %10000 = vmatpush3.bf16.msra.mxu0 %v11103_v21  ;;  %4535 = vmatmul.mubr.bf16.vlgmr.msra.gmra.mrb[4].mxu1 %v1719_v23  ;;  %v11152_v20 = vld [vmem:[#allocation8 + $0x3a0] sm:$0xff]   ;;  %v11153_v21 = vld [vmem:[#allocation8 + $0x368] sm:$0xff]  }
  0xa0   :  { %10001 = vmatprep.subr.bf16.mxu0 %v11105_v24  ;;  %10022 = vmatpush3.bf16.msra.mxu1 %v11104_v22  ;;  %v11154_v22 = vld [vmem:[#allocation8 + $0x3e8] sm:$0xff]  }
  0xa1   :  { %10023 = vmatprep.subr.bf16.mxu1 %v11106_v25  ;;  %4574 = vmatprep.mubr.bf16.mxu0 %v1759_v62  ;;  %v11155_v23 = vld [vmem:[#allocation8 + $0x328] sm:$0xff]   ;;  %v11157_v25 = vld [vmem:[#allocation8 + $0x370] sm:$0xff]  }
  0xa2   :  { %4614 = vmatprep.mubr.bf16.mxu1 %v1769_v3  ;;  %v11156_v24 = vld [vmem:[#allocation8 + $0x3a8] sm:$0xff]   ;;  %v11192_v62 = vld [vmem:[#allocation8 + $0x430] sm:$0xff]   ;;  %v877_v3 = vld [vmem:[#allocation5 + $0x10] sm:$0xff] }
  0xa3   :  { %10002 = vmatpush3.bf16.msra.mxu0 %v11107_v26  ;;  %v11158_v26 = vld [vmem:[#allocation8 + $0x3f0] sm:$0xff]  }
  0xa4   :  { %10003 = vmatprep.subr.bf16.mxu0 %v11109_v28  ;;  %10024 = vmatpush3.bf16.msra.mxu1 %v11108_v27  ;;  %v11159_v27 = vld [vmem:[#allocation8 + $0x330] sm:$0xff]  }
  0xa5   :  { %10025 = vmatprep.subr.bf16.mxu1 %v11110_v29  ;;  %v11160_v28 = vld [vmem:[#allocation8 + $0x3b0] sm:$0xff]   ;;  %v11161_v29 = vld [vmem:[#allocation8 + $0x378] sm:$0xff]  }
  0xa7   :  { %10004 = vmatpush3.bf16.msra.mxu0 %v11111_v30  ;;  %v11162_v30 = vld [vmem:[#allocation8 + $0x3f8] sm:$0xff]  }
  0xa8   :  { %10005 = vmatprep.subr.bf16.mxu0 %v11113_v32  ;;  %10026 = vmatpush3.bf16.msra.mxu1 %v11112_v31  ;;  %v11163_v31 = vld [vmem:[#allocation8 + $0x338] sm:$0xff]  }
  0xa9   :  { %10027 = vmatprep.subr.bf16.mxu1 %v11114_v33  ;;  %v11164_v32 = vld [vmem:[#allocation8 + $0x3b8] sm:$0xff]   ;;  %v1752_v33 = vrot.slane %v12095_v60, %v12079_v35  ;;  %v11190_v60 = vld [vmem:[#allocation8 + $0x470] sm:$0xff]  }
  0xab   :  { %10006 = vmatpush3.bf16.msra.mxu0 %v11115_v34  ;;  %v11166_v34 = vld [vmem:[#allocation8 + $0x440] sm:$0xff]  }
  0xac   :  { %10007 = vmatprep.subr.bf16.mxu0 %v11117_v37  ;;  %10028 = vmatpush3.bf16.msra.mxu1 %v11116_v36  ;;  %v11167_v36 = vld [vmem:[#allocation8 + $0x4c0] sm:$0xff]  }
  0xad   :  { %10029 = vmatprep.subr.bf16.mxu1 %v11118_v38  ;;  %v11168_v37 = vld [vmem:[#allocation8 + $0x400] sm:$0xff]  }
  0xae   :  { %v11169_v38 = vld [vmem:[#allocation8 + $0x480] sm:$0xff]  }
  0xaf   :  { %10008 = vmatpush3.bf16.msra.mxu0 %v11119_v39  ;;  %v1768_v39 = vcombine.high %v1752_v33, %v1752_v33 }
  0xb0   :  { %10009 = vmatprep.subr.bf16.mxu0 %v11121_v41  ;;  %10030 = vmatpush3.bf16.msra.mxu1 %v11120_v40  ;;  %v11170_v40 = vld [vmem:[#allocation8 + $0x448] sm:$0xff]  }
  0xb1   :  { %10031 = vmatprep.subr.bf16.mxu1 %v11122_v42  ;;  %v11171_v41 = vld [vmem:[#allocation8 + $0x4c8] sm:$0xff]  }
  0xb2   :  { %v11172_v42 = vld [vmem:[#allocation8 + $0x408] sm:$0xff]  }
  0xb3   :  { %10010 = vmatpush3.bf16.msra.mxu0 %v11123_v43  ;;  %v11173_v43 = vld [vmem:[#allocation8 + $0x488] sm:$0xff]  }
  0xb4   :  { %10011 = vmatprep.subr.bf16.mxu0 %v11125_v45  ;;  %10032 = vmatpush3.bf16.msra.mxu1 %v11124_v44  ;;  %v11174_v44 = vld [vmem:[#allocation8 + $0x450] sm:$0xff]  }
  0xb5   :  { %10033 = vmatprep.subr.bf16.mxu1 %v11126_v46  ;;  %v11175_v45 = vld [vmem:[#allocation8 + $0x4d0] sm:$0xff]  }
  0xb6   :  { %v11176_v46 = vld [vmem:[#allocation8 + $0x410] sm:$0xff]  }
  0xb7   :  { %10012 = vmatpush3.bf16.msra.mxu0 %v11127_v47  ;;  %v11177_v47 = vld [vmem:[#allocation8 + $0x490] sm:$0xff]  }
  0xb8   :  { %10013 = vmatprep.subr.bf16.mxu0 %v11129_v49  ;;  %10034 = vmatpush3.bf16.msra.mxu1 %v11128_v48  ;;  %v11178_v48 = vld [vmem:[#allocation8 + $0x458] sm:$0xff]  }
  0xb9   :  { %10035 = vmatprep.subr.bf16.mxu1 %v11130_v50  ;;  %v11179_v49 = vld [vmem:[#allocation8 + $0x4d8] sm:$0xff]  }
  0xba   :  { %v11180_v50 = vld [vmem:[#allocation8 + $0x418] sm:$0xff]  }
  0xbb   :  { %10014 = vmatpush3.bf16.msra.mxu0 %v11131_v51  ;;  %v11181_v51 = vld [vmem:[#allocation8 + $0x498] sm:$0xff]  }
  0xbc   :  { %10043 = vmatprep.subr.bf16.mxu0 %v11133_v56  ;;  %10036 = vmatpush3.bf16.msra.mxu1 %v11132_v53  ;;  %v11183_v53 = vld [vmem:[#allocation8 + $0x4e0] sm:$0xff]   ;;  %v11186_v56 = vld [vmem:[#allocation8 + $0x468] sm:$0xff]  }
  0xbd   :  { %10065 = vmatprep.subr.bf16.mxu1 %v11134_v59  ;;  %v11189_v59 = vld [vmem:[#allocation8 + $0x4a8] sm:$0xff]  }
  0xbe   :  { %4575 = vmatmul.mubr.bf16.vlgmr.msra.gmra.mrb[8].mxu0 %v1745_v58  ;;  %v11188_v58 = vld [vmem:[#allocation8 + $0x428] sm:$0xff]  }
  0xbf   :  { %10044 = vmatpush3.bf16.msra.mxu0 %v11135_v61  ;;  %4615 = vmatmul.mubr.bf16.vlgmr.msra.gmra.mrb[8].mxu1 %v1767_v1  ;;  %v11191_v61 = vld [vmem:[#allocation8 + $0x4f0] sm:$0xff]   ;;  %v11195_v1 = vld [vmem:[#allocation8 + $0x4f8] sm:$0xff]  }
  0xc0   :  { %10045 = vmatprep.subr.bf16.mxu0 %v11137_v2  ;;  %10066 = vmatpush3.bf16.msra.mxu1 %v11136_v63  ;;  %v11193_v63 = vld [vmem:[#allocation8 + $0x4b0] sm:$0xff]   ;;  %v11196_v2 = vld [vmem:[#allocation8 + $0x438] sm:$0xff]  }
  0xc1   :  { %4654 = vmatprep.mubr.bf16.mxu0 %v1766_v5  ;;  %10067 = vmatprep.subr.bf16.mxu1 %v11138_v4  ;;  %v11197_v4 = vld [vmem:[#allocation8 + $0x4b8] sm:$0xff]   ;;  %v1778_v5 = vrot.slane %v877_v3, %v12079_v35 }
  0xc2   :  { %4694 = vmatprep.mubr.bf16.mxu1 %v1770_v8 }
  0xc3   :  { %10046 = vmatpush3.bf16.msra.mxu0 %v11139_v6  ;;  %v1771_v6 = vcombine.high %v877_v3, %v877_v3  ;;  %v1786_v8 = vcombine.high %v1778_v5, %v1778_v5  ;;  %v11247_v3 = vld [vmem:[#allocation8 + $0x660] sm:$0xff]  }
  0xc4   :  { %10047 = vmatprep.subr.bf16.mxu0 %v11141_v9  ;;  %10068 = vmatpush3.bf16.msra.mxu1 %v11140_v7  ;;  %v11198_v7 = vld [vmem:[#allocation8 + $0x540] sm:$0xff]   ;;  %v1794_v9 = vrot.slane %v1778_v5, %v12079_v35 }
  0xc5   :  { %10069 = vmatprep.subr.bf16.mxu1 %v11142_v10  ;;  %v11199_v10 = vld [vmem:[#allocation8 + $0x5c0] sm:$0xff]  }
  0xc6   :  { %v11249_v5 = vld [vmem:[#allocation8 + $0x620] sm:$0xff]  }
  0xc7   :  { %10048 = vmatpush3.bf16.msra.mxu0 %v11143_v11  ;;  %v12106_v11 = vrot.slane %v1771_v6, %v12079_v35  ;;  %v11250_v6 = vld [vmem:[#allocation8 + $0x6a0] sm:$0xff]  }
  0xc8   :  { %10049 = vmatprep.subr.bf16.mxu0 %v11145_v13  ;;  %10070 = vmatpush3.bf16.msra.mxu1 %v11144_v12  ;;  %v11200_v12 = vld [vmem:[#allocation8 + $0x500] sm:$0xff]   ;;  %v1808_v13 = vrot.slane %v1786_v8, %v12079_v35  ;;  %v11252_v8 = vld [vmem:[#allocation8 + $0x6e8] sm:$0xff]  }
  0xc9   :  { %10071 = vmatprep.subr.bf16.mxu1 %v11146_v14  ;;  %v11201_v14 = vld [vmem:[#allocation8 + $0x580] sm:$0xff]  }
  0xcb   :  { %10050 = vmatpush3.bf16.msra.mxu0 %v11147_v15  ;;  %v1787_v15 = vcombine.high %v12106_v11, %v12106_v11 }
  0xcc   :  { %10051 = vmatprep.subr.bf16.mxu0 %v11149_v17  ;;  %10072 = vmatpush3.bf16.msra.mxu1 %v11148_v16  ;;  %v1816_v16 = vcombine.high %v1794_v9, %v1794_v9  ;;  %v11202_v17 = vld [vmem:[#allocation8 + $0x548] sm:$0xff]  }
  0xcd   :  { %10073 = vmatprep.subr.bf16.mxu1 %v11150_v18  ;;  %v1818_v18 = vcombine.high %v1808_v13, %v1808_v13 }
  0xcf   :  { %10052 = vmatpush3.bf16.msra.mxu0 %v11151_v19  ;;  %v11203_v19 = vld [vmem:[#allocation8 + $0x5c8] sm:$0xff]  }
  0xd0   :  { %10053 = vmatprep.subr.bf16.mxu0 %v11153_v21  ;;  %10074 = vmatpush3.bf16.msra.mxu1 %v11152_v20  ;;  %v1815_v20 = vrot.slane %v1787_v15, %v12079_v35  ;;  %v11204_v21 = vld [vmem:[#allocation8 + $0x508] sm:$0xff]   ;;  %v11259_v15 = vld [vmem:[#allocation8 + $0x678] sm:$0xff]  }
  0xd1   :  { %10075 = vmatprep.subr.bf16.mxu1 %v11154_v22  ;;  %v11205_v22 = vld [vmem:[#allocation8 + $0x588] sm:$0xff]  }
  0xd3   :  { %10054 = vmatpush3.bf16.msra.mxu0 %v11155_v23  ;;  %v1819_v23 = vcombine.high %v1815_v20, %v1815_v20 }
  0xd4   :  { %10055 = vmatprep.subr.bf16.mxu0 %v11157_v25  ;;  %10076 = vmatpush3.bf16.msra.mxu1 %v11156_v24  ;;  %v11206_v24 = vld [vmem:[#allocation8 + $0x550] sm:$0xff]  }
  0xd5   :  { %10077 = vmatprep.subr.bf16.mxu1 %v11158_v26  ;;  %v11207_v25 = vld [vmem:[#allocation8 + $0x5d0] sm:$0xff]  }
  0xd6   :  { %v11208_v26 = vld [vmem:[#allocation8 + $0x510] sm:$0xff]  }
  0xd7   :  { %10056 = vmatpush3.bf16.msra.mxu0 %v11159_v27  ;;  %v11209_v27 = vld [vmem:[#allocation8 + $0x590] sm:$0xff]  }
  0xd8   :  { %10057 = vmatprep.subr.bf16.mxu0 %v11161_v29  ;;  %10078 = vmatpush3.bf16.msra.mxu1 %v11160_v28  ;;  %v11210_v28 = vld [vmem:[#allocation8 + $0x558] sm:$0xff]  }
  0xd9   :  { %10079 = vmatprep.subr.bf16.mxu1 %v11162_v30  ;;  %v11211_v29 = vld [vmem:[#allocation8 + $0x5d8] sm:$0xff]  }
  0xda   :  { %v11212_v30 = vld [vmem:[#allocation8 + $0x518] sm:$0xff]  }
  0xdb   :  { %10058 = vmatpush3.bf16.msra.mxu0 %v11163_v31  ;;  %v11213_v31 = vld [vmem:[#allocation8 + $0x598] sm:$0xff]  }
  0xdc   :  { %10087 = vmatprep.subr.bf16.mxu0 %v11166_v34  ;;  %10080 = vmatpush3.bf16.msra.mxu1 %v11164_v32  ;;  %v11214_v32 = vld [vmem:[#allocation8 + $0x560] sm:$0xff]  }
  0xdd   :  { %10109 = vmatprep.subr.bf16.mxu1 %v11167_v36  ;;  %v11216_v34 = vld [vmem:[#allocation8 + $0x520] sm:$0xff]  }
  0xde   :  { %4655 = vmatmul.mubr.bf16.vlgmr.msra.gmra.mrb[12].mxu0 %v1752_v33  ;;  %v11215_v33 = vld [vmem:[#allocation8 + $0x5e0] sm:$0xff]  }
  0xdf   :  { %10088 = vmatpush3.bf16.msra.mxu0 %v11168_v37  ;;  %4695 = vmatmul.mubr.bf16.vlgmr.msra.gmra.mrb[12].mxu1 %v1768_v39  ;;  %v11217_v36 = vld [vmem:[#allocation8 + $0x5a0] sm:$0xff]   ;;  %v11218_v37 = vld [vmem:[#allocation8 + $0x568] sm:$0xff]  }
  0xe0   :  { %10089 = vmatprep.subr.bf16.mxu0 %v11170_v40  ;;  %10110 = vmatpush3.bf16.msra.mxu1 %v11169_v38  ;;  %v11219_v38 = vld [vmem:[#allocation8 + $0x5e8] sm:$0xff]  }
  0xe1   :  { %10111 = vmatprep.subr.bf16.mxu1 %v11171_v41  ;;  %4734 = vmatprep.mubr.bf16.mxu0 %v1808_v13  ;;  %v11220_v39 = vld [vmem:[#allocation8 + $0x528] sm:$0xff]   ;;  %v11222_v41 = vld [vmem:[#allocation8 + $0x570] sm:$0xff]  }
  0xe2   :  { %4774 = vmatprep.mubr.bf16.mxu1 %v1818_v18  ;;  %v11221_v40 = vld [vmem:[#allocation8 + $0x5a8] sm:$0xff]   ;;  %v11257_v13 = vld [vmem:[#allocation8 + $0x630] sm:$0xff]  }
  0xe3   :  { %10090 = vmatpush3.bf16.msra.mxu0 %v11172_v42  ;;  %v11223_v42 = vld [vmem:[#allocation8 + $0x5f0] sm:$0xff]   ;;  %v878_v18 = vld [vmem:[#allocation5 + $0x18] sm:$0xff] }
  0xe4   :  { %10091 = vmatprep.subr.bf16.mxu0 %v11174_v44  ;;  %10112 = vmatpush3.bf16.msra.mxu1 %v11173_v43  ;;  %v11224_v43 = vld [vmem:[#allocation8 + $0x530] sm:$0xff]  }
  0xe5   :  { %10113 = vmatprep.subr.bf16.mxu1 %v11175_v45  ;;  %v11225_v44 = vld [vmem:[#allocation8 + $0x5b0] sm:$0xff]   ;;  %v11226_v45 = vld [vmem:[#allocation8 + $0x578] sm:$0xff]  }
  0xe7   :  { %10092 = vmatpush3.bf16.msra.mxu0 %v11176_v46  ;;  %v11227_v46 = vld [vmem:[#allocation8 + $0x5f8] sm:$0xff]  }
  0xe8   :  { %10093 = vmatprep.subr.bf16.mxu0 %v11178_v48  ;;  %10114 = vmatpush3.bf16.msra.mxu1 %v11177_v47  ;;  %v11228_v47 = vld [vmem:[#allocation8 + $0x538] sm:$0xff]  }
  0xe9   :  { %10115 = vmatprep.subr.bf16.mxu1 %v11179_v49  ;;  %v11229_v48 = vld [vmem:[#allocation8 + $0x5b8] sm:$0xff]   ;;  %v1801_v49 = vrot.slane %v12106_v11, %v12079_v35  ;;  %v11255_v11 = vld [vmem:[#allocation8 + $0x670] sm:$0xff]  }
  0xeb   :  { %10094 = vmatpush3.bf16.msra.mxu0 %v11180_v50  ;;  %v11231_v50 = vld [vmem:[#allocation8 + $0x640] sm:$0xff]  }
  0xec   :  { %10095 = vmatprep.subr.bf16.mxu0 %v11182_v52  ;;  %10116 = vmatpush3.bf16.msra.mxu1 %v11181_v51  ;;  %v11232_v51 = vld [vmem:[#allocation8 + $0x6c0] sm:$0xff]  }
  0xed   :  { %10117 = vmatprep.subr.bf16.mxu1 %v11183_v53  ;;  %v11233_v52 = vld [vmem:[#allocation8 + $0x600] sm:$0xff]  }
  0xee   :  { %v11234_v53 = vld [vmem:[#allocation8 + $0x680] sm:$0xff]  }
  0xef   :  { %10096 = vmatpush3.bf16.msra.mxu0 %v11184_v54  ;;  %v1817_v54 = vcombine.high %v1801_v49, %v1801_v49 }
  0xf0   :  { %10097 = vmatprep.subr.bf16.mxu0 %v11186_v56  ;;  %10118 = vmatpush3.bf16.msra.mxu1 %v11185_v55  ;;  %v11235_v55 = vld [vmem:[#allocation8 + $0x648] sm:$0xff]  }
  0xf1   :  { %10119 = vmatprep.subr.bf16.mxu1 %v11187_v57  ;;  %v11236_v56 = vld [vmem:[#allocation8 + $0x6c8] sm:$0xff]  }
  0xf2   :  { %v11237_v57 = vld [vmem:[#allocation8 + $0x608] sm:$0xff]  }
  0xf3   :  { %10098 = vmatpush3.bf16.msra.mxu0 %v11188_v58  ;;  %v11238_v58 = vld [vmem:[#allocation8 + $0x688] sm:$0xff]  }
  0xf4   :  { %10099 = vmatprep.subr.bf16.mxu0 %v11190_v60  ;;  %10120 = vmatpush3.bf16.msra.mxu1 %v11189_v59  ;;  %v11239_v59 = vld [vmem:[#allocation8 + $0x650] sm:$0xff]  }
  0xf5   :  { %10121 = vmatprep.subr.bf16.mxu1 %v11191_v61  ;;  %v11240_v60 = vld [vmem:[#allocation8 + $0x6d0] sm:$0xff]  }
  0xf6   :  { %v11241_v61 = vld [vmem:[#allocation8 + $0x610] sm:$0xff]  }
  0xf7   :  { %10100 = vmatpush3.bf16.msra.mxu0 %v11192_v62  ;;  %v11242_v62 = vld [vmem:[#allocation8 + $0x690] sm:$0xff]  }
  0xf8   :  { %10101 = vmatprep.subr.bf16.mxu0 %v11194_v0  ;;  %10122 = vmatpush3.bf16.msra.mxu1 %v11193_v63  ;;  %v11243_v63 = vld [vmem:[#allocation8 + $0x658] sm:$0xff]  }
  0xf9   :  { %10123 = vmatprep.subr.bf16.mxu1 %v11195_v1  ;;  %v11244_v0 = vld [vmem:[#allocation8 + $0x6d8] sm:$0xff]  }
  0xfa   :  { %v11245_v1 = vld [vmem:[#allocation8 + $0x618] sm:$0xff]  }
  0xfb   :  { %10102 = vmatpush3.bf16.msra.mxu0 %v11196_v2  ;;  %v11246_v2 = vld [vmem:[#allocation8 + $0x698] sm:$0xff]  }
  0xfc   :  { %10131 = vmatprep.subr.bf16.mxu0 %v11198_v7  ;;  %10124 = vmatpush3.bf16.msra.mxu1 %v11197_v4  ;;  %v11248_v4 = vld [vmem:[#allocation8 + $0x6e0] sm:$0xff]   ;;  %v11251_v7 = vld [vmem:[#allocation8 + $0x668] sm:$0xff]  }
  0xfd   :  { %10153 = vmatprep.subr.bf16.mxu1 %v11199_v10  ;;  %v11254_v10 = vld [vmem:[#allocation8 + $0x6a8] sm:$0xff]  }
  0xfe   :  { %4735 = vmatmul.mubr.bf16.vlgmr.msra.gmra.mrb[16].mxu0 %v1794_v9  ;;  %v11253_v9 = vld [vmem:[#allocation8 + $0x628] sm:$0xff]  }
  0xff   :  { %10132 = vmatpush3.bf16.msra.mxu0 %v11200_v12  ;;  %4775 = vmatmul.mubr.bf16.vlgmr.msra.gmra.mrb[16].mxu1 %v1816_v16  ;;  %v11256_v12 = vld [vmem:[#allocation8 + $0x6f0] sm:$0xff]   ;;  %v11260_v16 = vld [vmem:[#allocation8 + $0x6f8] sm:$0xff]  }
 0x100   :  { %10133 = vmatprep.subr.bf16.mxu0 %v11202_v17  ;;  %10154 = vmatpush3.bf16.msra.mxu1 %v11201_v14  ;;  %v11258_v14 = vld [vmem:[#allocation8 + $0x6b0] sm:$0xff]   ;;  %v11261_v17 = vld [vmem:[#allocation8 + $0x638] sm:$0xff]  }
 0x101   :  { %4814 = vmatprep.mubr.bf16.mxu0 %v1815_v20  ;;  %10155 = vmatprep.subr.bf16.mxu1 %v11203_v19  ;;  %v1827_v19 = vrot.slane %v878_v18, %v12079_v35  ;;  %v11263_v20 = vld [vmem:[#allocation8 + $0x740] sm:$0xff]  }
 0x102   :  { %4854 = vmatprep.mubr.bf16.mxu1 %v1819_v23 }
 0x103   :  { %10134 = vmatpush3.bf16.msra.mxu0 %v11204_v21  ;;  %v1820_v21 = vcombine.high %v878_v18, %v878_v18  ;;  %v1835_v23 = vcombine.high %v1827_v19, %v1827_v19  ;;  %v11301_v18 = vld [vmem:[#allocation8 + $0x8c8] sm:$0xff]  }
 0x104   :  { %10135 = vmatprep.subr.bf16.mxu0 %v11206_v24  ;;  %10156 = vmatpush3.bf16.msra.mxu1 %v11205_v22  ;;  %v11262_v22 = vld [vmem:[#allocation8 + $0x6b8] sm:$0xff]   ;;  %v1843_v24 = vrot.slane %v1827_v19, %v12079_v35  ;;  %v11302_v19 = vld [vmem:[#allocation8 + $0x808] sm:$0xff]  }
 0x105   :  { %10157 = vmatprep.subr.bf16.mxu1 %v11207_v25  ;;  %v11264_v25 = vld [vmem:[#allocation8 + $0x7c0] sm:$0xff]  }
 0x107   :  { %10136 = vmatpush3.bf16.msra.mxu0 %v11208_v26  ;;  %v12117_v26 = vrot.slane %v1820_v21, %v12079_v35  ;;  %v11303_v21 = vld [vmem:[#allocation8 + $0x888] sm:$0xff]  }
 0x108   :  { %10137 = vmatprep.subr.bf16.mxu0 %v11210_v28  ;;  %10158 = vmatpush3.bf16.msra.mxu1 %v11209_v27  ;;  %v1857_v27 = vrot.slane %v1835_v23, %v12079_v35  ;;  %v11265_v28 = vld [vmem:[#allocation8 + $0x700] sm:$0xff]   ;;  %v11306_v23 = vld [vmem:[#allocation8 + $0x810] sm:$0xff]  }
 0x109   :  { %10159 = vmatprep.subr.bf16.mxu1 %v11211_v29  ;;  %v1836_v29 = vcombine.high %v12117_v26, %v12117_v26 }
 0x10b   :  { %10138 = vmatpush3.bf16.msra.mxu0 %v11212_v30  ;;  %v1865_v30 = vcombine.high %v1843_v24, %v1843_v24 }
 0x10c   :  { %10139 = vmatprep.subr.bf16.mxu0 %v11214_v32  ;;  %10160 = vmatpush3.bf16.msra.mxu1 %v11213_v31  ;;  %v11267_v31 = vld [vmem:[#allocation8 + $0x748] sm:$0xff]   ;;  %v1867_v32 = vcombine.high %v1857_v27, %v1857_v27 }
 0x10d   :  { %10161 = vmatprep.subr.bf16.mxu1 %v11215_v33  ;;  %v11266_v33 = vld [vmem:[#allocation8 + $0x780] sm:$0xff]  }
 0x10f   :  { %10140 = vmatpush3.bf16.msra.mxu0 %v11216_v34  ;;  %v1864_v34 = vrot.slane %v1836_v29, %v12079_v35  ;;  %v11311_v29 = vld [vmem:[#allocation8 + $0x898] sm:$0xff]  }
 0x110   :  { %10141 = vmatprep.subr.bf16.mxu0 %v11218_v37  ;;  %10162 = vmatpush3.bf16.msra.mxu1 %v11217_v36  ;;  %v11268_v36 = vld [vmem:[#allocation8 + $0x7c8] sm:$0xff]  }
 0x111   :  { %10163 = vmatprep.subr.bf16.mxu1 %v11219_v38  ;;  %v11269_v37 = vld [vmem:[#allocation8 + $0x708] sm:$0xff]   ;;  %v1868_v38 = vcombine.high %v1864_v34, %v1864_v34 }
 0x113   :  { %10142 = vmatpush3.bf16.msra.mxu0 %v11220_v39  ;;  %v11271_v39 = vld [vmem:[#allocation8 + $0x750] sm:$0xff]  }
 0x114   :  { %10143 = vmatprep.subr.bf16.mxu0 %v11222_v41  ;;  %10164 = vmatpush3.bf16.msra.mxu1 %v11221_v40  ;;  %v11270_v40 = vld [vmem:[#allocation8 + $0x788] sm:$0xff]   ;;  %v11272_v41 = vld [vmem:[#allocation8 + $0x7d0] sm:$0xff]  }
 0x115   :  { %10165 = vmatprep.subr.bf16.mxu1 %v11223_v42  ;;  %v11273_v42 = vld [vmem:[#allocation8 + $0x710] sm:$0xff]  }
 0x117   :  { %10144 = vmatpush3.bf16.msra.mxu0 %v11224_v43  ;;  %v11275_v43 = vld [vmem:[#allocation8 + $0x758] sm:$0xff]  }
 0x118   :  { %10145 = vmatprep.subr.bf16.mxu0 %v11226_v45  ;;  %10166 = vmatpush3.bf16.msra.mxu1 %v11225_v44  ;;  %v11274_v44 = vld [vmem:[#allocation8 + $0x790] sm:$0xff]   ;;  %v11276_v45 = vld [vmem:[#allocation8 + $0x7d8] sm:$0xff]  }
 0x119   :  { %10167 = vmatprep.subr.bf16.mxu1 %v11227_v46  ;;  %v11277_v46 = vld [vmem:[#allocation8 + $0x718] sm:$0xff]  }
 0x11b   :  { %10146 = vmatpush3.bf16.msra.mxu0 %v11228_v47  ;;  %v11279_v47 = vld [vmem:[#allocation8 + $0x760] sm:$0xff]  }
 0x11c   :  { %10175 = vmatprep.subr.bf16.mxu0 %v11231_v50  ;;  %10168 = vmatpush3.bf16.msra.mxu1 %v11229_v48  ;;  %v11278_v48 = vld [vmem:[#allocation8 + $0x798] sm:$0xff]   ;;  %v11281_v50 = vld [vmem:[#allocation8 + $0x720] sm:$0xff]  }
 0x11d   :  { %10197 = vmatprep.subr.bf16.mxu1 %v11232_v51  ;;  %v11283_v51 = vld [vmem:[#allocation8 + $0x768] sm:$0xff]  }
 0x11e   :  { %4815 = vmatmul.mubr.bf16.vlgmr.msra.gmra.mrb[20].mxu0 %v1801_v49  ;;  %v11280_v49 = vld [vmem:[#allocation8 + $0x7e0] sm:$0xff]  }
 0x11f   :  { %10176 = vmatpush3.bf16.msra.mxu0 %v11233_v52  ;;  %4855 = vmatmul.mubr.bf16.vlgmr.msra.gmra.mrb[20].mxu1 %v1817_v54  ;;  %v11282_v52 = vld [vmem:[#allocation8 + $0x7a0] sm:$0xff]   ;;  %v11285_v54 = vld [vmem:[#allocation8 + $0x728] sm:$0xff]  }
 0x120   :  { %10177 = vmatprep.subr.bf16.mxu0 %v11235_v55  ;;  %10198 = vmatpush3.bf16.msra.mxu1 %v11234_v53  ;;  %v11284_v53 = vld [vmem:[#allocation8 + $0x7e8] sm:$0xff]  }
 0x121   :  { %10199 = vmatprep.subr.bf16.mxu1 %v11236_v56  ;;  %4894 = vmatprep.mubr.bf16.mxu0 %v1857_v27  ;;  %v11287_v56 = vld [vmem:[#allocation8 + $0x770] sm:$0xff]   ;;  %v11310_v27 = vld [vmem:[#allocation8 + $0x818] sm:$0xff]  }
 0x122   :  { %4934 = vmatprep.mubr.bf16.mxu1 %v1867_v32  ;;  %v11316_v32 = vld [vmem:[#allocation8 + $0x868] sm:$0xff]  }
 0x123   :  { %10178 = vmatpush3.bf16.msra.mxu0 %v11237_v57 }
 0x124   :  { %10179 = vmatprep.subr.bf16.mxu0 %v11239_v59  ;;  %10200 = vmatpush3.bf16.msra.mxu1 %v11238_v58  ;;  %v11286_v58 = vld [vmem:[#allocation8 + $0x7a8] sm:$0xff]  }
 0x125   :  { %10201 = vmatprep.subr.bf16.mxu1 %v11240_v60 }
 0x127   :  { %10180 = vmatpush3.bf16.msra.mxu0 %v11241_v61 }
 0x128   :  { %10181 = vmatprep.subr.bf16.mxu0 %v11243_v63  ;;  %10202 = vmatpush3.bf16.msra.mxu1 %v11242_v62  ;;  %v11288_v62 = vld [vmem:[#allocation8 + $0x7f0] sm:$0xff]  }
 0x129   :  { %10203 = vmatprep.subr.bf16.mxu1 %v11244_v0  ;;  %v11289_v63 = vld [vmem:[#allocation8 + $0x730] sm:$0xff]  }
 0x12b   :  { %10182 = vmatpush3.bf16.msra.mxu0 %v11245_v1 }
 0x12c   :  { %10183 = vmatprep.subr.bf16.mxu0 %v11247_v3  ;;  %10204 = vmatpush3.bf16.msra.mxu1 %v11246_v2 }
 0x12d   :  { %10205 = vmatprep.subr.bf16.mxu1 %v11248_v4  ;;  %v11291_v4 = vld [vmem:[#allocation8 + $0x778] sm:$0xff]  }
 0x12f   :  { %10184 = vmatpush3.bf16.msra.mxu0 %v11249_v5 }
 0x130   :  { %10185 = vmatprep.subr.bf16.mxu0 %v11251_v7  ;;  %10206 = vmatpush3.bf16.msra.mxu1 %v11250_v6  ;;  %v11290_v6 = vld [vmem:[#allocation8 + $0x7b0] sm:$0xff]  }
 0x131   :  { %10207 = vmatprep.subr.bf16.mxu1 %v11252_v8  ;;  %v11292_v8 = vld [vmem:[#allocation8 + $0x7f8] sm:$0xff]  }
 0x133   :  { %10186 = vmatpush3.bf16.msra.mxu0 %v11253_v9  ;;  %v11293_v9 = vld [vmem:[#allocation8 + $0x738] sm:$0xff]  }
 0x134   :  { %10187 = vmatprep.subr.bf16.mxu0 %v11255_v11  ;;  %10208 = vmatpush3.bf16.msra.mxu1 %v11254_v10  ;;  %v1850_v10 = vrot.slane %v12117_v26, %v12079_v35  ;;  %v11296_v11 = vld [vmem:[#allocation8 + $0x840] sm:$0xff]   ;;  %v11309_v26 = vld [vmem:[#allocation8 + $0x8d8] sm:$0xff]  }
 0x135   :  { %10209 = vmatprep.subr.bf16.mxu1 %v11256_v12  ;;  %v11294_v12 = vld [vmem:[#allocation8 + $0x7b8] sm:$0xff]  }
 0x137   :  { %10188 = vmatpush3.bf16.msra.mxu0 %v11257_v13  ;;  %v11297_v13 = vld [vmem:[#allocation8 + $0x8c0] sm:$0xff]  }
 0x138   :  { %10189 = vmatprep.subr.bf16.mxu0 %v11259_v15  ;;  %10210 = vmatpush3.bf16.msra.mxu1 %v11258_v14  ;;  %v11298_v14 = vld [vmem:[#allocation8 + $0x800] sm:$0xff]   ;;  %v1866_v15 = vcombine.high %v1850_v10, %v1850_v10 }
 0x139   :  { %10211 = vmatprep.subr.bf16.mxu1 %v11260_v16  ;;  %v11300_v16 = vld [vmem:[#allocation8 + $0x848] sm:$0xff]  }
 0x13b   :  { %10190 = vmatpush3.bf16.msra.mxu0 %v11261_v17  ;;  %v11299_v17 = vld [vmem:[#allocation8 + $0x880] sm:$0xff]  }
 0x13c   :  { %10219 = vmatprep.subr.bf16.mxu0 %v11263_v20  ;;  %10212 = vmatpush3.bf16.msra.mxu1 %v11262_v22  ;;  %v11304_v20 = vld [vmem:[#allocation8 + $0x850] sm:$0xff]  }
 0x13d   :  { %10241 = vmatprep.subr.bf16.mxu1 %v11264_v25  ;;  %v11305_v22 = vld [vmem:[#allocation8 + $0x8d0] sm:$0xff]  }
 0x13e   :  { %4895 = vmatmul.mubr.bf16.vlgmr.msra.gmra.mrb[24].mxu0 %v1843_v24  ;;  %v11308_v24 = vld [vmem:[#allocation8 + $0x858] sm:$0xff]   ;;  %v11307_v25 = vld [vmem:[#allocation8 + $0x890] sm:$0xff]  }
 0x13f   :  { %10220 = vmatpush3.bf16.msra.mxu0 %v11265_v28  ;;  %4935 = vmatmul.mubr.bf16.vlgmr.msra.gmra.mrb[24].mxu1 %v1865_v30  ;;  %v11312_v28 = vld [vmem:[#allocation8 + $0x860] sm:$0xff]  }
 0x140   :  { %10221 = vmatprep.subr.bf16.mxu0 %v11267_v31  ;;  %10242 = vmatpush3.bf16.msra.mxu1 %v11266_v33  ;;  %v11313_v30 = vld [vmem:[#allocation8 + $0x8e0] sm:$0xff]  }
 0x141   :  { %4974 = vmatprep.mubr.bf16.mxu0 %v1864_v34  ;;  %10243 = vmatprep.subr.bf16.mxu1 %v11268_v36  ;;  %v11314_v31 = vld [vmem:[#allocation8 + $0x820] sm:$0xff]   ;;  %v11317_v34 = vld [vmem:[#allocation8 + $0x8e8] sm:$0xff]  }
 0x142   :  { %5014 = vmatprep.mubr.bf16.mxu1 %v1868_v38  ;;  %v11315_v33 = vld [vmem:[#allocation8 + $0x8a0] sm:$0xff]   ;;  %v11318_v36 = vld [vmem:[#allocation8 + $0x828] sm:$0xff]   ;;  %v11320_v38 = vld [vmem:[#allocation8 + $0x870] sm:$0xff]  }
 0x143   :  { %10222 = vmatpush3.bf16.msra.mxu0 %v11269_v37 }
 0x144   :  { %10223 = vmatprep.subr.bf16.mxu0 %v11271_v39  ;;  %10244 = vmatpush3.bf16.msra.mxu1 %v11270_v40  ;;  %v11319_v40 = vld [vmem:[#allocation8 + $0x8a8] sm:$0xff]  }
 0x145   :  { %10245 = vmatprep.subr.bf16.mxu1 %v11272_v41 }
 0x147   :  { %10224 = vmatpush3.bf16.msra.mxu0 %v11273_v42 }
 0x148   :  { %10225 = vmatprep.subr.bf16.mxu0 %v11275_v43  ;;  %10246 = vmatpush3.bf16.msra.mxu1 %v11274_v44  ;;  %v11321_v44 = vld [vmem:[#allocation8 + $0x8f0] sm:$0xff]  }
 0x149   :  { %10247 = vmatprep.subr.bf16.mxu1 %v11276_v45  ;;  %v11322_v45 = vld [vmem:[#allocation8 + $0x830] sm:$0xff]  }
 0x14b   :  { %10226 = vmatpush3.bf16.msra.mxu0 %v11277_v46 }
 0x14c   :  { %10227 = vmatprep.subr.bf16.mxu0 %v11279_v47  ;;  %10248 = vmatpush3.bf16.msra.mxu1 %v11278_v48  ;;  %v11323_v48 = vld [vmem:[#allocation8 + $0x8b0] sm:$0xff]  }
 0x14d   :  { %10249 = vmatprep.subr.bf16.mxu1 %v11280_v49 }
 0x14f   :  { %10228 = vmatpush3.bf16.msra.mxu0 %v11281_v50 }
 0x150   :  { %10229 = vmatprep.subr.bf16.mxu0 %v11283_v51  ;;  %10250 = vmatpush3.bf16.msra.mxu1 %v11282_v52  ;;  %v11324_v52 = vld [vmem:[#allocation8 + $0x878] sm:$0xff]  }
 0x151   :  { %v9927_v55 = vpop.f32.mrb[0].mxu0  ;;  %10251 = vmatprep.subr.bf16.mxu1 %v11284_v53 }
 0x152   :  { %v9928_v57 = vpop.f32.mrb[1].mxu0  ;;  %v9949_v59 = vpop.f32.mrb[0].mxu1 }
 0x153   :  { %v9929_v60 = vadd.f32 %v9928_v57, %v9927_v55  ;;  %v9930_v61 = vpop.f32.mrb[2].mxu0  ;;  %v9950_v0 = vpop.f32.mrb[1].mxu1  ;;  %10230 = vmatpush3.bf16.msra.mxu0 %v11285_v54  ;;  %v11325_v54 = vld [vmem:[#allocation8 + $0x8f8] sm:$0xff]   ;;  %v879_v57 = vld [vmem:[#allocation5 + $0x20] sm:$0xff] }
 0x154   :  { %v9931_v1 = vpop.f32.mrb[3].mxu0  ;;  %v9951_v2 = vadd.f32 %v9950_v0, %v9949_v59  ;;  %v9952_v3 = vpop.f32.mrb[2].mxu1  ;;  %10231 = vmatprep.subr.bf16.mxu0 %v11287_v56  ;;  %10252 = vmatpush3.bf16.msra.mxu1 %v11286_v58  ;;  %v11326_v56 = vld [vmem:[#allocation8 + $0x838] sm:$0xff]   ;;  %v1876_v58 = vrot.slane %v879_v57, %v12079_v35  ;;  %v11328_v59 = vld [vmem:[#allocation8 + $0x940] sm:$0xff]  }
 0x155   :  { %v9953_v5 = vpop.f32.mrb[3].mxu1  ;;  %10253 = vmatprep.subr.bf16.mxu1 %v11288_v62  ;;  %v11327_v61 = vld [vmem:[#allocation8 + $0x8b8] sm:$0xff]   ;;  %v11329_v0 = vld [vmem:[#allocation8 + $0x9c0] sm:$0xff]  }
 0x156   :  { %v12123_v7 = vadd.f32 %v9951_v2, %v9929_v60  ;;  %v1869_v60 = vcombine.high %v879_v57, %v879_v57  ;;  %v1884_v62 = vcombine.high %v1876_v58, %v1876_v58  ;;  %v11330_v2 = vld [vmem:[#allocation8 + $0x900] sm:$0xff]   ;;  %v11365_v57 = vld [vmem:[#allocation8 + $0xa48] sm:$0xff]  }
 0x157   :  { %10232 = vmatpush3.bf16.msra.mxu0 %v11289_v63  ;;  %v1892_v63 = vrot.slane %v1876_v58, %v12079_v35  ;;  %v11366_v58 = vld [vmem:[#allocation8 + $0xac8] sm:$0xff]  }
 0x158   :  { %10233 = vmatprep.subr.bf16.mxu0 %v11291_v4  ;;  %10254 = vmatpush3.bf16.msra.mxu1 %v11290_v6  ;;  %v12133_v1 = vrot.slane %v1869_v60, %v12079_v35  ;;  %v1906_v3 = vrot.slane %v1884_v62, %v12079_v35  ;;  %v11331_v4 = vld [vmem:[#allocation8 + $0x980] sm:$0xff]   ;;  %v11368_v60 = vld [vmem:[#allocation8 + $0xa88] sm:$0xff]   ;;  %v11370_v62 = vld [vmem:[#allocation8 + $0xad0] sm:$0xff]  }
 0x159   :  { %10255 = vmatprep.subr.bf16.mxu1 %v11292_v8  ;;  %v1914_v6 = vcombine.high %v1892_v63, %v1892_v63 }
 0x15a   :  { %v1885_v5 = vcombine.high %v12133_v1, %v12133_v1  ;;  %v1916_v8 = vcombine.high %v1906_v3, %v1906_v3 }
 0x15b   :  { %10234 = vmatpush3.bf16.msra.mxu0 %v11293_v9  ;;  %v11333_v9 = vld [vmem:[#allocation8 + $0x9c8] sm:$0xff]  }
 0x15c   :  { %10263 = vmatprep.subr.bf16.mxu0 %v11296_v11  ;;  %10256 = vmatpush3.bf16.msra.mxu1 %v11294_v12  ;;  %v11334_v11 = vld [vmem:[#allocation8 + $0x908] sm:$0xff]  }
 0x15d   :  { %10285 = vmatprep.subr.bf16.mxu1 %v11297_v13  ;;  %v11335_v12 = vld [vmem:[#allocation8 + $0x988] sm:$0xff]  }
 0x15e   :  { %4975 = vmatmul.mubr.bf16.vlgmr.msra.gmra.mrb[28].mxu0 %v1850_v10  ;;  %v1913_v10 = vrot.slane %v1885_v5, %v12079_v35  ;;  %v11377_v5 = vld [vmem:[#allocation8 + $0xa60] sm:$0xff]  }
 0x15f   :  { %10264 = vmatpush3.bf16.msra.mxu0 %v11298_v14  ;;  %5015 = vmatmul.mubr.bf16.vlgmr.msra.gmra.mrb[28].mxu1 %v1866_v15  ;;  %v11336_v14 = vld [vmem:[#allocation8 + $0x950] sm:$0xff]  }
 0x160   :  { %10265 = vmatprep.subr.bf16.mxu0 %v11300_v16  ;;  %10286 = vmatpush3.bf16.msra.mxu1 %v11299_v17  ;;  %v1917_v13 = vcombine.high %v1913_v10, %v1913_v10  ;;  %v11337_v15 = vld [vmem:[#allocation8 + $0x9d0] sm:$0xff]  }
 0x161   :  { %10287 = vmatprep.subr.bf16.mxu1 %v11301_v18  ;;  %5054 = vmatprep.mubr.bf16.mxu0 %v1906_v3  ;;  %v11338_v16 = vld [vmem:[#allocation8 + $0x910] sm:$0xff]   ;;  %v11340_v18 = vld [vmem:[#allocation8 + $0x958] sm:$0xff]  }
 0x162   :  { %5094 = vmatprep.mubr.bf16.mxu1 %v1916_v8  ;;  %v11339_v17 = vld [vmem:[#allocation8 + $0x990] sm:$0xff]   ;;  %v11375_v3 = vld [vmem:[#allocation8 + $0xa18] sm:$0xff]   ;;  %v11380_v8 = vld [vmem:[#allocation8 + $0xaa0] sm:$0xff]  }
 0x163   :  { %10266 = vmatpush3.bf16.msra.mxu0 %v11302_v19  ;;  %v11341_v19 = vld [vmem:[#allocation8 + $0x9d8] sm:$0xff]  }
 0x164   :  { %10267 = vmatprep.subr.bf16.mxu0 %v11304_v20  ;;  %10288 = vmatpush3.bf16.msra.mxu1 %v11303_v21  ;;  %v11342_v20 = vld [vmem:[#allocation8 + $0x918] sm:$0xff]  }
 0x165   :  { %10289 = vmatprep.subr.bf16.mxu1 %v11305_v22  ;;  %v11343_v21 = vld [vmem:[#allocation8 + $0x998] sm:$0xff]   ;;  %v11344_v22 = vld [vmem:[#allocation8 + $0x960] sm:$0xff]  }
 0x167   :  { %10268 = vmatpush3.bf16.msra.mxu0 %v11306_v23  ;;  %v11345_v23 = vld [vmem:[#allocation8 + $0x9e0] sm:$0xff]  }
 0x168   :  { %10269 = vmatprep.subr.bf16.mxu0 %v11308_v24  ;;  %10290 = vmatpush3.bf16.msra.mxu1 %v11307_v25  ;;  %v11346_v24 = vld [vmem:[#allocation8 + $0x920] sm:$0xff]  }
 0x169   :  { %10291 = vmatprep.subr.bf16.mxu1 %v11309_v26  ;;  %v11347_v25 = vld [vmem:[#allocation8 + $0x9a0] sm:$0xff]   ;;  %v11348_v26 = vld [vmem:[#allocation8 + $0x968] sm:$0xff]  }
 0x16b   :  { %10270 = vmatpush3.bf16.msra.mxu0 %v11310_v27  ;;  %v11349_v27 = vld [vmem:[#allocation8 + $0x9e8] sm:$0xff]  }
 0x16c   :  { %10271 = vmatprep.subr.bf16.mxu0 %v11312_v28  ;;  %10292 = vmatpush3.bf16.msra.mxu1 %v11311_v29  ;;  %v11350_v28 = vld [vmem:[#allocation8 + $0x928] sm:$0xff]  }
 0x16d   :  { %10293 = vmatprep.subr.bf16.mxu1 %v11313_v30  ;;  %v11351_v30 = vld [vmem:[#allocation8 + $0x9a8] sm:$0xff]  }
 0x16f   :  { %10272 = vmatpush3.bf16.msra.mxu0 %v11314_v31 }
 0x170   :  { %10273 = vmatprep.subr.bf16.mxu0 %v11316_v32  ;;  %10294 = vmatpush3.bf16.msra.mxu1 %v11315_v33  ;;  %v11352_v32 = vld [vmem:[#allocation8 + $0x970] sm:$0xff]  }
 0x171   :  { %v9971_v37 = vpop.f32.mrb[4].mxu0  ;;  %10295 = vmatprep.subr.bf16.mxu1 %v11317_v34 }
 0x172   :  { %v9972_v39 = vpop.f32.mrb[5].mxu0  ;;  %v9993_v43 = vpop.f32.mrb[4].mxu1 }
 0x173   :  { %v9973_v41 = vadd.f32 %v9972_v39, %v9971_v37  ;;  %v9974_v42 = vpop.f32.mrb[6].mxu0  ;;  %10274 = vmatpush3.bf16.msra.mxu0 %v11318_v36  ;;  %v9994_v47 = vpop.f32.mrb[5].mxu1  ;;  %v11353_v37 = vld [vmem:[#allocation8 + $0x9f0] sm:$0xff]  }
 0x174   :  { %v9975_v46 = vpop.f32.mrb[7].mxu0  ;;  %v9995_v50 = vadd.f32 %v9994_v47, %v9993_v43  ;;  %v9996_v51 = vpop.f32.mrb[6].mxu1  ;;  %10275 = vmatprep.subr.bf16.mxu0 %v11320_v38  ;;  %10296 = vmatpush3.bf16.msra.mxu1 %v11319_v40  ;;  %v11354_v38 = vld [vmem:[#allocation8 + $0x930] sm:$0xff]  }
 0x175   :  { %v4497_v49 = vadd.f32 %v9973_v41, %v12123_v7  ;;  %v9997_v53 = vpop.f32.mrb[7].mxu1  ;;  %10297 = vmatprep.subr.bf16.mxu1 %v11321_v44  ;;  %v11332_v7 = vld [vmem:[#allocation8 + $0x948] sm:$0xff]   ;;  %v11355_v44 = vld [vmem:[#allocation8 + $0x9b0] sm:$0xff]   ;;  %v11356_v46 = vld [vmem:[#allocation8 + $0x978] sm:$0xff]   ;;  %v1899_v51 = vrot.slane %v12133_v1, %v12079_v35 }
 0x176   :  { %v11362_v53 = vld [vmem:[#allocation8 + $0xac0] sm:$0xff]   ;;  %v11373_v1 = vld [vmem:[#allocation8 + $0xa58] sm:$0xff]  }
 0x177   :  { %v12128_v55 = vadd.f32 %v9995_v50, %v4497_v49  ;;  %10276 = vmatpush3.bf16.msra.mxu0 %v11322_v45  ;;  %v11358_v49 = vld [vmem:[#allocation8 + $0x938] sm:$0xff]  }
 0x178   :  { %10277 = vmatprep.subr.bf16.mxu0 %v11324_v52  ;;  %10298 = vmatpush3.bf16.msra.mxu1 %v11323_v48  ;;  %v11357_v48 = vld [vmem:[#allocation8 + $0x9f8] sm:$0xff]   ;;  %v11361_v52 = vld [vmem:[#allocation8 + $0xa40] sm:$0xff]  }
 0x179   :  { %10299 = vmatprep.subr.bf16.mxu1 %v11325_v54  ;;  %v11359_v50 = vld [vmem:[#allocation8 + $0x9b8] sm:$0xff]   ;;  %v11363_v54 = vld [vmem:[#allocation8 + $0xa00] sm:$0xff]  }
 0x17b   :  { %10278 = vmatpush3.bf16.msra.mxu0 %v11326_v56  ;;  %v1915_v56 = vcombine.high %v1899_v51, %v1899_v51 }
 0x17c   :  { %10307 = vmatprep.subr.bf16.mxu0 %v11328_v59  ;;  %10300 = vmatpush3.bf16.msra.mxu1 %v11327_v61  ;;  %v11367_v59 = vld [vmem:[#allocation8 + $0xa08] sm:$0xff]   ;;  %v11369_v61 = vld [vmem:[#allocation8 + $0xa50] sm:$0xff]  }
 0x17d   :  { %10329 = vmatprep.subr.bf16.mxu1 %v11329_v0  ;;  %v11372_v0 = vld [vmem:[#allocation8 + $0xa90] sm:$0xff]  }
 0x17e   :  { %5055 = vmatmul.mubr.bf16.vlgmr.msra.gmra.mrb[32].mxu0 %v1892_v63  ;;  %v11371_v63 = vld [vmem:[#allocation8 + $0xa10] sm:$0xff]  }
 0x17f   :  { %10308 = vmatpush3.bf16.msra.mxu0 %v11330_v2  ;;  %5095 = vmatmul.mubr.bf16.vlgmr.msra.gmra.mrb[32].mxu1 %v1914_v6  ;;  %v11374_v2 = vld [vmem:[#allocation8 + $0xad8] sm:$0xff]   ;;  %v11378_v6 = vld [vmem:[#allocation8 + $0xae0] sm:$0xff]  }
 0x180   :  { %10309 = vmatprep.subr.bf16.mxu0 %v11332_v7  ;;  %10330 = vmatpush3.bf16.msra.mxu1 %v11331_v4  ;;  %v11376_v4 = vld [vmem:[#allocation8 + $0xa98] sm:$0xff]   ;;  %v11379_v7 = vld [vmem:[#allocation8 + $0xa20] sm:$0xff]  }
 0x181   :  { %5134 = vmatprep.mubr.bf16.mxu0 %v1913_v10  ;;  %10331 = vmatprep.subr.bf16.mxu1 %v11333_v9  ;;  %v11381_v9 = vld [vmem:[#allocation8 + $0xa68] sm:$0xff]  }
 0x182   :  { %5174 = vmatprep.mubr.bf16.mxu1 %v1917_v13  ;;  %v11382_v10 = vld [vmem:[#allocation8 + $0xae8] sm:$0xff]  }
 0x183   :  { %10310 = vmatpush3.bf16.msra.mxu0 %v11334_v11  ;;  %v11383_v11 = vld [vmem:[#allocation8 + $0xa28] sm:$0xff]  }
 0x184   :  { %10311 = vmatprep.subr.bf16.mxu0 %v11336_v14  ;;  %10332 = vmatpush3.bf16.msra.mxu1 %v11335_v12  ;;  %v11384_v13 = vld [vmem:[#allocation8 + $0xaa8] sm:$0xff]  }
 0x185   :  { %10333 = vmatprep.subr.bf16.mxu1 %v11337_v15  ;;  %v11385_v15 = vld [vmem:[#allocation8 + $0xa70] sm:$0xff]  }
 0x187   :  { %10312 = vmatpush3.bf16.msra.mxu0 %v11338_v16 }
 0x188   :  { %10313 = vmatprep.subr.bf16.mxu0 %v11340_v18  ;;  %10334 = vmatpush3.bf16.msra.mxu1 %v11339_v17 }
 0x189   :  { %10335 = vmatprep.subr.bf16.mxu1 %v11341_v19  ;;  %v11386_v19 = vld [vmem:[#allocation8 + $0xaf0] sm:$0xff]  }
 0x18b   :  { %10314 = vmatpush3.bf16.msra.mxu0 %v11342_v20  ;;  %v11387_v20 = vld [vmem:[#allocation8 + $0xa30] sm:$0xff]  }
 0x18c   :  { %10315 = vmatprep.subr.bf16.mxu0 %v11344_v22  ;;  %10336 = vmatpush3.bf16.msra.mxu1 %v11343_v21 }
 0x18d   :  { %10337 = vmatprep.subr.bf16.mxu1 %v11345_v23 }
 0x18f   :  { %10316 = vmatpush3.bf16.msra.mxu0 %v11346_v24 }
 0x190   :  { %10317 = vmatprep.subr.bf16.mxu0 %v11348_v26  ;;  %10338 = vmatpush3.bf16.msra.mxu1 %v11347_v25  ;;  %v11388_v26 = vld [vmem:[#allocation8 + $0xab0] sm:$0xff]  }
 0x191   :  { %v10015_v29 = vpop.f32.mrb[8].mxu0  ;;  %10339 = vmatprep.subr.bf16.mxu1 %v11349_v27 }
 0x192   :  { %v10016_v31 = vpop.f32.mrb[9].mxu0  ;;  %v10037_v36 = vpop.f32.mrb[8].mxu1 }
 0x193   :  { %v10017_v33 = vadd.f32 %v10016_v31, %v10015_v29  ;;  %v10018_v34 = vpop.f32.mrb[10].mxu0  ;;  %v10038_v40 = vpop.f32.mrb[9].mxu1  ;;  %10318 = vmatpush3.bf16.msra.mxu0 %v11350_v28  ;;  %v11389_v28 = vld [vmem:[#allocation8 + $0xa78] sm:$0xff]  }
 0x194   :  { %v10019_v39 = vpop.f32.mrb[11].mxu0  ;;  %v10039_v42 = vadd.f32 %v10038_v40, %v10037_v36  ;;  %v10040_v43 = vpop.f32.mrb[10].mxu1  ;;  %10319 = vmatprep.subr.bf16.mxu0 %v11352_v32  ;;  %10340 = vmatpush3.bf16.msra.mxu1 %v11351_v30  ;;  %v11390_v30 = vld [vmem:[#allocation8 + $0xaf8] sm:$0xff]   ;;  %v11393_v34 = vld [vmem:[#allocation8 + $0xb40] sm:$0xff]  }
 0x195   :  { %v4577_v41 = vadd.f32 %v10017_v33, %v12128_v55  ;;  %v10041_v45 = vpop.f32.mrb[11].mxu1  ;;  %10341 = vmatprep.subr.bf16.mxu1 %v11353_v37  ;;  %v11364_v55 = vld [vmem:[#allocation8 + $0xa80] sm:$0xff]   ;;  %v11391_v31 = vld [vmem:[#allocation8 + $0xa38] sm:$0xff]  }
 0x196   :  { %v880_v32 = vld [vmem:[#allocation5 + $0x28] sm:$0xff]  ;;  %v11394_v40 = vld [vmem:[#allocation8 + $0xbc0] sm:$0xff]  }
 0x197   :  { %v12140_v47 = vadd.f32 %v10039_v42, %v4577_v41  ;;  %10320 = vmatpush3.bf16.msra.mxu0 %v11354_v38  ;;  %v1925_v33 = vrot.slane %v880_v32, %v12079_v35  ;;  %v1918_v36 = vcombine.high %v880_v32, %v880_v32  ;;  %v11392_v37 = vld [vmem:[#allocation8 + $0xab8] sm:$0xff]   ;;  %v11395_v43 = vld [vmem:[#allocation8 + $0xb00] sm:$0xff]   ;;  %v11429_v32 = vld [vmem:[#allocation7 + $0x48] sm:$0xff]  }
 0x198   :  { %10321 = vmatprep.subr.bf16.mxu0 %v11356_v46  ;;  %10342 = vmatpush3.bf16.msra.mxu1 %v11355_v44  ;;  %v11397_v46 = vld [vmem:[#allocation8 + $0xb48] sm:$0xff]  }
 0x199   :  { %10343 = vmatprep.subr.bf16.mxu1 %v11357_v48  ;;  %v1933_v38 = vcombine.high %v1925_v33, %v1925_v33  ;;  %v1941_v39 = vrot.slane %v1925_v33, %v12079_v35  ;;  %v12150_v41 = vrot.slane %v1918_v36, %v12079_v35  ;;  %v11396_v48 = vld [vmem:[#allocation8 + $0xb80] sm:$0xff]   ;;  %v11430_v33 = vld [vmem:[#allocation8 + $0xc08] sm:$0xff]   ;;  %v11432_v36 = vld [vmem:[#allocation7 + $0x50] sm:$0xff]  }
 0x19b   :  { %10322 = vmatpush3.bf16.msra.mxu0 %v11358_v49  ;;  %v1955_v42 = vrot.slane %v1933_v38, %v12079_v35  ;;  %v1934_v44 = vcombine.high %v12150_v41, %v12150_v41  ;;  %v1963_v45 = vcombine.high %v1941_v39, %v1941_v39  ;;  %v11434_v38 = vld [vmem:[#allocation7 + $0x10] sm:$0xff]  }
 0x19c   :  { %10351 = vmatprep.subr.bf16.mxu0 %v11361_v52  ;;  %10344 = vmatpush3.bf16.msra.mxu1 %v11359_v50  ;;  %v11398_v50 = vld [vmem:[#allocation8 + $0xbc8] sm:$0xff]  }
 0x19d   :  { %10373 = vmatprep.subr.bf16.mxu1 %v11362_v53  ;;  %v1962_v49 = vrot.slane %v1934_v44, %v12079_v35  ;;  %v11401_v53 = vld [vmem:[#allocation8 + $0xb50] sm:$0xff]   ;;  %v11440_v44 = vld [vmem:[#allocation7 + $0x20] sm:$0xff]  }
 0x19e   :  { %5135 = vmatmul.mubr.bf16.vlgmr.msra.gmra.mrb[36].mxu0 %v1899_v51  ;;  %v11399_v51 = vld [vmem:[#allocation8 + $0xb08] sm:$0xff]  }
 0x19f   :  { %10352 = vmatpush3.bf16.msra.mxu0 %v11363_v54  ;;  %5175 = vmatmul.mubr.bf16.vlgmr.msra.gmra.mrb[36].mxu1 %v1915_v56  ;;  %v1966_v52 = vcombine.high %v1962_v49, %v1962_v49  ;;  %v11400_v54 = vld [vmem:[#allocation8 + $0xb88] sm:$0xff]   ;;  %v11403_v56 = vld [vmem:[#allocation8 + $0xb10] sm:$0xff]  }
 0x1a0   :  { %10353 = vmatprep.subr.bf16.mxu0 %v11365_v57  ;;  %10374 = vmatpush3.bf16.msra.mxu1 %v11364_v55  ;;  %v11402_v55 = vld [vmem:[#allocation8 + $0xbd0] sm:$0xff]   ;;  %v11405_v57 = vld [vmem:[#allocation8 + $0xb58] sm:$0xff]  }
 0x1a1   :  { %10375 = vmatprep.subr.bf16.mxu1 %v11366_v58  ;;  %5214 = vmatprep.mubr.bf16.mxu0 %v1955_v42  ;;  %v11404_v58 = vld [vmem:[#allocation8 + $0xb90] sm:$0xff]  }
 0x1a3   :  { %10354 = vmatpush3.bf16.msra.mxu0 %v11367_v59  ;;  %v11406_v59 = vld [vmem:[#allocation8 + $0xbd8] sm:$0xff]  }
 0x1a4   :  { %10355 = vmatprep.subr.bf16.mxu0 %v11369_v61  ;;  %10376 = vmatpush3.bf16.msra.mxu1 %v11368_v60  ;;  %v11407_v60 = vld [vmem:[#allocation8 + $0xb18] sm:$0xff]   ;;  %v11409_v61 = vld [vmem:[#allocation8 + $0xb60] sm:$0xff]  }
 0x1a5   :  { %10377 = vmatprep.subr.bf16.mxu1 %v11370_v62  ;;  %v11408_v62 = vld [vmem:[#allocation8 + $0xb98] sm:$0xff]  }
 0x1a7   :  { %10356 = vmatpush3.bf16.msra.mxu0 %v11371_v63  ;;  %v11410_v63 = vld [vmem:[#allocation8 + $0xbe0] sm:$0xff]  }
 0x1a8   :  { %10357 = vmatprep.subr.bf16.mxu0 %v11373_v1  ;;  %10378 = vmatpush3.bf16.msra.mxu1 %v11372_v0  ;;  %v11411_v0 = vld [vmem:[#allocation8 + $0xb20] sm:$0xff]   ;;  %v11413_v1 = vld [vmem:[#allocation8 + $0xb68] sm:$0xff]  }
 0x1a9   :  { %10379 = vmatprep.subr.bf16.mxu1 %v11374_v2  ;;  %v11412_v2 = vld [vmem:[#allocation8 + $0xba0] sm:$0xff]  }
 0x1ab   :  { %10358 = vmatpush3.bf16.msra.mxu0 %v11375_v3 }
 0x1ac   :  { %10359 = vmatprep.subr.bf16.mxu0 %v11377_v5  ;;  %10380 = vmatpush3.bf16.msra.mxu1 %v11376_v4  ;;  %v11414_v4 = vld [vmem:[#allocation8 + $0xbe8] sm:$0xff]  }
 0x1ad   :  { %10381 = vmatprep.subr.bf16.mxu1 %v11378_v6  ;;  %v11415_v6 = vld [vmem:[#allocation8 + $0xb28] sm:$0xff]  }
 0x1af   :  { %10360 = vmatpush3.bf16.msra.mxu0 %v11379_v7 }
 0x1b0   :  { %10361 = vmatprep.subr.bf16.mxu0 %v11381_v9  ;;  %10382 = vmatpush3.bf16.msra.mxu1 %v11380_v8 }
 0x1b1   :  { %v10059_v12 = vpop.f32.mrb[12].mxu0  ;;  %10383 = vmatprep.subr.bf16.mxu1 %v11382_v10  ;;  %v11416_v10 = vld [vmem:[#allocation8 + $0xba8] sm:$0xff]  }
 0x1b2   :  { %v10060_v14 = vpop.f32.mrb[13].mxu0  ;;  %v10081_v18 = vpop.f32.mrb[12].mxu1 }
 0x1b3   :  { %v10061_v16 = vadd.f32 %v10060_v14, %v10059_v12  ;;  %v10062_v17 = vpop.f32.mrb[14].mxu0  ;;  %v10082_v22 = vpop.f32.mrb[13].mxu1  ;;  %10362 = vmatpush3.bf16.msra.mxu0 %v11383_v11  ;;  %v11417_v11 = vld [vmem:[#allocation8 + $0xb70] sm:$0xff]  }
 0x1b4   :  { %v10063_v21 = vpop.f32.mrb[15].mxu0  ;;  %v10083_v24 = vadd.f32 %v10082_v22, %v10081_v18  ;;  %v10084_v25 = vpop.f32.mrb[14].mxu1  ;;  %10363 = vmatprep.subr.bf16.mxu0 %v11385_v15  ;;  %10384 = vmatpush3.bf16.msra.mxu1 %v11384_v13  ;;  %v11418_v17 = vld [vmem:[#allocation8 + $0xbf0] sm:$0xff]  }
 0x1b5   :  { %v4657_v23 = vadd.f32 %v10061_v16, %v12140_v47  ;;  %v10085_v27 = vpop.f32.mrb[15].mxu1  ;;  %10385 = vmatprep.subr.bf16.mxu1 %v11386_v19  ;;  %v1965_v47 = vcombine.high %v1955_v42, %v1955_v42  ;;  %v11419_v19 = vld [vmem:[#allocation8 + $0xb30] sm:$0xff]   ;;  %v11421_v21 = vld [vmem:[#allocation8 + $0xb78] sm:$0xff]   ;;  %v1948_v25 = vrot.slane %v12150_v41, %v12079_v35  ;;  %v11438_v42 = vld [vmem:[#allocation7 + $0x60] sm:$0xff]  }
 0x1b6   :  { %v11420_v22 = vld [vmem:[#allocation8 + $0xbb0] sm:$0xff]   ;;  %v11426_v27 = vld [vmem:[#allocation7 + $0x40] sm:$0xff]   ;;  %v11437_v41 = vld [vmem:[#allocation7 + $0x18] sm:$0xff]  }
 0x1b7   :  { %v12145_v29 = vadd.f32 %v10083_v24, %v4657_v23  ;;  %10364 = vmatpush3.bf16.msra.mxu0 %v11387_v20  ;;  %5254 = vmatprep.mubr.bf16.mxu1 %v1965_v47  ;;  %v11422_v23 = vld [vmem:[#allocation8 + $0xbf8] sm:$0xff]  }
 0x1b8   :  { %10365 = vmatprep.subr.bf16.mxu0 %v11389_v28  ;;  %10386 = vmatpush3.bf16.msra.mxu1 %v11388_v26  ;;  %v11423_v24 = vld [vmem:[#allocation8 + $0xb38] sm:$0xff]   ;;  %v11427_v28 = vld [vmem:[#allocation8 + $0xc00] sm:$0xff]  }
 0x1b9   :  { %10387 = vmatprep.subr.bf16.mxu1 %v11390_v30  ;;  %v11424_v26 = vld [vmem:[#allocation8 + $0xbb8] sm:$0xff]   ;;  %v1964_v30 = vcombine.high %v1948_v25, %v1948_v25 }
 0x1ba   :  { %v84_v47 = vld [vmem:[#allocation2] sm:$0xff] }
 0x1bb   :  { %10366 = vmatpush3.bf16.msra.mxu0 %v11391_v31  ;;  %v11428_v31 = vld [vmem:[#allocation7] sm:$0xff]  }
 0x1bc   :  { %10395 = vmatprep.subr.bf16.mxu0 %v11393_v34  ;;  %10388 = vmatpush3.bf16.msra.mxu1 %v11392_v37  ;;  %v11431_v34 = vld [vmem:[#allocation7 + $0x8] sm:$0xff]   ;;  %v11433_v37 = vld [vmem:[#allocation8 + $0xc10] sm:$0xff]  }
 0x1bd   :  { %10417 = vmatprep.subr.bf16.mxu1 %v11394_v40  ;;  %v11436_v40 = vld [vmem:[#allocation8 + $0xc18] sm:$0xff]  }
 0x1be   :  { %5215 = vmatmul.mubr.bf16.vlgmr.msra.gmra.mrb[40].mxu0 %v1941_v39  ;;  %v11435_v39 = vld [vmem:[#allocation7 + $0x58] sm:$0xff]  }
 0x1bf   :  { %10396 = vmatpush3.bf16.msra.mxu0 %v11395_v43  ;;  %5255 = vmatmul.mubr.bf16.vlgmr.msra.gmra.mrb[40].mxu1 %v1963_v45  ;;  %v11439_v43 = vld [vmem:[#allocation8 + $0xc20] sm:$0xff]  }
 0x1c0   :  { %10397 = vmatprep.subr.bf16.mxu0 %v11397_v46  ;;  %10418 = vmatpush3.bf16.msra.mxu1 %v11396_v48  ;;  %v11441_v46 = vld [vmem:[#allocation7 + $0x68] sm:$0xff]  }
 0x1c1   :  { %5294 = vmatprep.mubr.bf16.mxu0 %v1962_v49  ;;  %10419 = vmatprep.subr.bf16.mxu1 %v11398_v50  ;;  %v11442_v49 = vld [vmem:[#allocation8 + $0xc28] sm:$0xff]  }
 0x1c2   :  { %5334 = vmatprep.mubr.bf16.mxu1 %v1966_v52  ;;  %v11443_v50 = vld [vmem:[#allocation7 + $0x28] sm:$0xff]  }
 0x1c3   :  { %10398 = vmatpush3.bf16.msra.mxu0 %v11399_v51  ;;  %v5396_v51 = vrot.slane %v84_v47, %v12079_v35 }
 0x1c4   :  { %10399 = vmatprep.subr.bf16.mxu0 %v11401_v53  ;;  %10420 = vmatpush3.bf16.msra.mxu1 %v11400_v54 }
 0x1c5   :  { %10421 = vmatprep.subr.bf16.mxu1 %v11402_v55 }
 0x1c7   :  { %10400 = vmatpush3.bf16.msra.mxu0 %v11403_v56 }
 0x1c8   :  { %10401 = vmatprep.subr.bf16.mxu0 %v11405_v57  ;;  %10422 = vmatpush3.bf16.msra.mxu1 %v11404_v58  ;;  %v5404_v57 = vcombine.high %v5396_v51, %v5396_v51  ;;  %v5389_v58 = vcombine.high %v84_v47, %v84_v47  ;;  %v11476_v47 = vld [vmem:[#allocation7 + $0x170] sm:$0xff]  }
 0x1c9   :  { %10423 = vmatprep.subr.bf16.mxu1 %v11406_v59 }
 0x1cb   :  { %10402 = vmatpush3.bf16.msra.mxu0 %v11407_v60 }
 0x1cc   :  { %10403 = vmatprep.subr.bf16.mxu0 %v11409_v61  ;;  %10424 = vmatpush3.bf16.msra.mxu1 %v11408_v62  ;;  %v11444_v62 = vld [vmem:[#allocation7 + $0x70] sm:$0xff]  }
 0x1cd   :  { %10425 = vmatprep.subr.bf16.mxu1 %v11410_v63 }
 0x1cf   :  { %10404 = vmatpush3.bf16.msra.mxu0 %v11411_v0  ;;  %v11445_v0 = vld [vmem:[#allocation8 + $0xc30] sm:$0xff]  }
 0x1d0   :  { %10405 = vmatprep.subr.bf16.mxu0 %v11413_v1  ;;  %10426 = vmatpush3.bf16.msra.mxu1 %v11412_v2  ;;  %v5426_v1 = vrot.slane %v5404_v57, %v12079_v35  ;;  %v11479_v57 = vld [vmem:[#allocation7 + $0xb8] sm:$0xff]  }
 0x1d1   :  { %v10103_v3 = vpop.f32.mrb[16].mxu0  ;;  %10427 = vmatprep.subr.bf16.mxu1 %v11414_v4  ;;  %v11447_v4 = vld [vmem:[#allocation7 + $0x78] sm:$0xff]  }
 0x1d2   :  { %v10104_v5 = vpop.f32.mrb[17].mxu0  ;;  %v10125_v9 = vpop.f32.mrb[16].mxu1 }
 0x1d3   :  { %v10105_v7 = vadd.f32 %v10104_v5, %v10103_v3  ;;  %v10106_v8 = vpop.f32.mrb[18].mxu0  ;;  %v10126_v13 = vpop.f32.mrb[17].mxu1  ;;  %10406 = vmatpush3.bf16.msra.mxu0 %v11415_v6  ;;  %v11446_v3 = vld [vmem:[#allocation7 + $0x30] sm:$0xff]   ;;  %v12176_v6 = vrot.slane %v5389_v58, %v12079_v35  ;;  %v11480_v58 = vld [vmem:[#allocation7 + $0x178] sm:$0xff]  }
 0x1d4   :  { %v10107_v12 = vpop.f32.mrb[19].mxu0  ;;  %v10127_v15 = vadd.f32 %v10126_v13, %v10125_v9  ;;  %v10128_v16 = vpop.f32.mrb[18].mxu1  ;;  %10407 = vmatprep.subr.bf16.mxu0 %v11417_v11  ;;  %10428 = vmatpush3.bf16.msra.mxu1 %v11416_v10  ;;  %v9124_v5 = vld.sshfl [vmem:[#allocation5 + $0x30] sm:$0x1 pattern:$0x75316420] }
 0x1d5   :  { %v4737_v14 = vadd.f32 %v10105_v7, %v12145_v29  ;;  %v10129_v18 = vpop.f32.mrb[19].mxu1  ;;  %10429 = vmatprep.subr.bf16.mxu1 %v11418_v17  ;;  %v11980_v29 = vmov 0.0   ;;  %v11448_v7 = vld [vmem:[#allocation8 + $0xc38] sm:$0xff]   ;;  %v11450_v9 = vld [vmem:[#allocation7 + $0xc0] sm:$0xff]   ;;  %v5405_v11 = vcombine.high %v12176_v6, %v12176_v6  ;;  %v1980_v12 = vrot.slane %v9124_v5, %v12079_v35  ;;  %v11454_v17 = vld [vmem:[#allocation7 + $0xc8] sm:$0xff]  }
 0x1d6   :  { %v11449_v8 = vld [vmem:[#allocation7 + $0x38] sm:$0xff]   ;;  %v11451_v10 = vld [vmem:[#allocation7 + $0x80] sm:$0xff]   ;;  %v12183_v16 = vrot.slane %v5396_v51, %v12079_v35  ;;  %v11455_v18 = vld [vmem:[#allocation7 + $0x88] sm:$0xff]  }
 0x1d7   :  { %v12157_v20 = vadd.f32 %v10127_v15, %v4737_v14  ;;  %10408 = vmatpush3.bf16.msra.mxu0 %v11419_v19  ;;  %v11452_v13 = vld [vmem:[#allocation7 + $0x140] sm:$0xff]   ;;  %v5436_v15 = vcombine.high %v5426_v1, %v5426_v1  ;;  %v12186_v19 = vrot.slane %v5405_v11, %v12079_v35  ;;  %v11489_v5 = vld [vmem:[#allocation7 + $0x248] sm:$0xff]   ;;  %v11495_v11 = vld [vmem:[#allocation7 + $0x1d8] sm:$0xff]  }
 0x1d8   :  { %10409 = vmatprep.subr.bf16.mxu0 %v11421_v21  ;;  %10430 = vmatpush3.bf16.msra.mxu1 %v11420_v22  ;;  %v11453_v14 = vld [vmem:[#allocation7 + $0x100] sm:$0xff]   ;;  %v11457_v21 = vld [vmem:[#allocation7 + $0x108] sm:$0xff]   ;;  %v11458_v22 = vld [vmem:[#allocation7 + $0xd0] sm:$0xff]  }
 0x1d9   :  { %10431 = vmatprep.subr.bf16.mxu1 %v11422_v23  ;;  %v11459_v23 = vld [vmem:[#allocation7 + $0x90] sm:$0xff]  }
 0x1db   :  { %10410 = vmatpush3.bf16.msra.mxu0 %v11423_v24  ;;  %v11460_v24 = vld [vmem:[#allocation7 + $0x150] sm:$0xff]  }
 0x1dc   :  { %10985 = vmatprep.subr.bf16.mxu0 %v11980_v29  ;;  %10432 = vmatpush3.bf16.msra.mxu1 %v11424_v26  ;;  %v11462_v26 = vld [vmem:[#allocation7 + $0xd8] sm:$0xff]  }
 0x1dd   :  { %10448 = vmatprep.subr.bf16.mxu1 %v11426_v27  ;;  %v11463_v27 = vld [vmem:[#allocation7 + $0x98] sm:$0xff]  }
 0x1de   :  { %5295 = vmatmul.mubr.bf16.vlgmr.msra.gmra.mrb[44].mxu0 %v1948_v25  ;;  %v11461_v25 = vld [vmem:[#allocation7 + $0x110] sm:$0xff]  }
 0x1df   :  { %10986 = vmatpush3.bf16.msra.mxu0 %v11427_v28  ;;  %11001 = vmatprep.mubr.msk.bf16.mxu0 %vm11981_vm0, %v11980_v29  ;;  %v11464_v28 = vld [vmem:[#allocation7 + $0x158] sm:$0xff]  }
 0x1e0   :  { %5335 = vmatmul.mubr.bf16.vlgmr.msra.gmra.mrb[44].mxu1 %v1964_v30  ;;  %10987 = vmatprep.subr.bf16.mxu0 %v11980_v29  ;;  %v11465_v30 = vld [vmem:[#allocation7 + $0x118] sm:$0xff]  }
 0x1e1   :  { %10449 = vmatpush3.bf16.msra.mxu1 %v11428_v31  ;;  %8130 = vmatprep.mubr.bf16.mxu1 %v5426_v1  ;;  %v11466_v31 = vld [vmem:[#allocation7 + $0xe0] sm:$0xff]   ;;  %v5437_v1 = vcombine.high %v12186_v19, %v12186_v19 }
 0x1e2   :  { %10450 = vmatprep.subr.bf16.mxu1 %v11429_v32  ;;  %v11467_v32 = vld [vmem:[#allocation7 + $0xa0] sm:$0xff]  }
 0x1e3   :  { %10988 = vmatpush3.bf16.msra.mxu0 %v11430_v33  ;;  %v11468_v33 = vld [vmem:[#allocation7 + $0x160] sm:$0xff]  }
 0x1e4   :  { %10989 = vmatprep.subr.bf16.mxu0 %v11980_v29 }
 0x1e5   :  { %10451 = vmatpush3.bf16.msra.mxu1 %v11431_v34  ;;  %v11469_v34 = vld [vmem:[#allocation7 + $0x120] sm:$0xff]  }
 0x1e6   :  { %10452 = vmatprep.subr.bf16.mxu1 %v11432_v36  ;;  %v11470_v36 = vld [vmem:[#allocation7 + $0xe8] sm:$0xff]  }
 0x1e7   :  { %10990 = vmatpush3.bf16.msra.mxu0 %v11433_v37  ;;  %v11471_v37 = vld [vmem:[#allocation7 + $0xa8] sm:$0xff]  }
 0x1e8   :  { %10991 = vmatprep.subr.bf16.mxu0 %v11980_v29 }
 0x1e9   :  { %10453 = vmatpush3.bf16.msra.mxu1 %v11434_v38  ;;  %v11472_v38 = vld [vmem:[#allocation7 + $0x168] sm:$0xff]  }
 0x1ea   :  { %10454 = vmatprep.subr.bf16.mxu1 %v11435_v39 }
 0x1eb   :  { %10992 = vmatpush3.bf16.msra.mxu0 %v11436_v40  ;;  %v11473_v40 = vld [vmem:[#allocation7 + $0x128] sm:$0xff]  }
 0x1ec   :  { %10993 = vmatprep.subr.bf16.mxu0 %v11980_v29 }
 0x1ed   :  { %10455 = vmatpush3.bf16.msra.mxu1 %v11437_v41 }
 0x1ee   :  { %10456 = vmatprep.subr.bf16.mxu1 %v11438_v42  ;;  %v11474_v42 = vld [vmem:[#allocation7 + $0xf0] sm:$0xff]  }
 0x1ef   :  { %10994 = vmatpush3.bf16.msra.mxu0 %v11439_v43 }
 0x1f0   :  { %10995 = vmatprep.subr.bf16.mxu0 %v11980_v29 }
 0x1f1   :  { %v10147_v45 = vpop.f32.mrb[20].mxu0  ;;  %10457 = vmatpush3.bf16.msra.mxu1 %v11440_v44 }
 0x1f2   :  { %v10148_v48 = vpop.f32.mrb[21].mxu0  ;;  %v10169_v54 = vpop.f32.mrb[20].mxu1  ;;  %10458 = vmatprep.subr.bf16.mxu1 %v11441_v46  ;;  %v11475_v46 = vld [vmem:[#allocation7 + $0xb0] sm:$0xff]  }
 0x1f3   :  { %v10149_v52 = vadd.f32 %v10148_v48, %v10147_v45  ;;  %v10150_v53 = vpop.f32.mrb[22].mxu0  ;;  %v10170_v56 = vpop.f32.mrb[21].mxu1  ;;  %10996 = vmatpush3.bf16.msra.mxu0 %v11442_v49 }
 0x1f4   :  { %v10151_v55 = vpop.f32.mrb[23].mxu0  ;;  %v10171_v60 = vadd.f32 %v10170_v56, %v10169_v54  ;;  %v10172_v61 = vpop.f32.mrb[22].mxu1  ;;  %10997 = vmatprep.subr.bf16.mxu0 %v11980_v29  ;;  %v11477_v53 = vld [vmem:[#allocation7 + $0x130] sm:$0xff]  }
 0x1f5   :  { %v4817_v59 = vadd.f32 %v10149_v52, %v12157_v20  ;;  %v10173_v63 = vpop.f32.mrb[23].mxu1  ;;  %10459 = vmatpush3.bf16.msra.mxu1 %v11443_v50  ;;  %v11456_v20 = vld [vmem:[#allocation7 + $0x148] sm:$0xff]   ;;  %v11478_v55 = vld [vmem:[#allocation7 + $0xf8] sm:$0xff]   ;;  %v11484_v61 = vld [vmem:[#allocation7 + $0x180] sm:$0xff]  }
 0x1f6   :  { %10460 = vmatprep.subr.bf16.mxu1 %v11444_v62  ;;  %v5434_v62 = vcombine.high %v12183_v16, %v12183_v16  ;;  %v11485_v63 = vld [vmem:[#allocation7 + $0x240] sm:$0xff]  }
 0x1f7   :  { %v12172_v2 = vadd.f32 %v10171_v60, %v4817_v59  ;;  %10998 = vmatpush3.bf16.msra.mxu0 %v11445_v0  ;;  %v11481_v59 = vld [vmem:[#allocation7 + $0x138] sm:$0xff]   ;;  %v11482_v60 = vld [vmem:[#allocation7 + $0x1c0] sm:$0xff]  }
 0x1f8   :  { %10999 = vmatprep.subr.bf16.mxu0 %v11980_v29  ;;  %v11486_v0 = vld [vmem:[#allocation7 + $0x200] sm:$0xff]  }
 0x1f9   :  { %10461 = vmatpush3.bf16.msra.mxu1 %v11446_v3  ;;  %v11487_v3 = vld [vmem:[#allocation7 + $0x1c8] sm:$0xff]  }
 0x1fa   :  { %10462 = vmatprep.subr.bf16.mxu1 %v11447_v4  ;;  %v11488_v4 = vld [vmem:[#allocation7 + $0x188] sm:$0xff]  }
 0x1fb   :  { %11000 = vmatpush3.bf16.msra.mxu0 %v11448_v7  ;;  %v11490_v7 = vld [vmem:[#allocation7 + $0x208] sm:$0xff]  }
 0x1fc   :  { %10470 = vmatprep.subr.bf16.mxu0 %v11450_v9  ;;  %v11492_v9 = vld [vmem:[#allocation7 + $0x190] sm:$0xff]  }
 0x1fd   :  { %10463 = vmatpush3.bf16.msra.mxu1 %v11449_v8  ;;  %v11491_v8 = vld [vmem:[#allocation7 + $0x1d0] sm:$0xff]  }
 0x1fe   :  { %11002 = vmatmul.mubr.bf16.vlgmr.msra.gmra.mrb[48].mxu0 %v1980_v12  ;;  %10492 = vmatprep.subr.bf16.mxu1 %v11452_v13  ;;  %v11496_v12 = vld [vmem:[#allocation7 + $0x198] sm:$0xff]  }
 0x1ff   :  { %10471 = vmatpush3.bf16.msra.mxu0 %v11451_v10  ;;  %8170 = vmatprep.mubr.bf16.mxu0 %v5436_v15  ;;  %v11493_v10 = vld [vmem:[#allocation7 + $0x250] sm:$0xff]   ;;  %v11497_v13 = vld [vmem:[#allocation7 + $0x258] sm:$0xff]   ;;  %v11499_v15 = vld [vmem:[#allocation7 + $0x1e0] sm:$0xff]  }
 0x200   :  { %8131 = vmatmul.mubr.bf16.vlgmr.msra.gmra.mrb[48].mxu1 %v12183_v16  ;;  %10472 = vmatprep.subr.bf16.mxu0 %v11454_v17  ;;  %v11500_v16 = vld [vmem:[#allocation7 + $0x1a0] sm:$0xff]  }
 0x201   :  { %10493 = vmatpush3.bf16.msra.mxu1 %v11453_v14  ;;  %8210 = vmatprep.mubr.bf16.mxu1 %v12186_v19  ;;  %v11498_v14 = vld [vmem:[#allocation7 + $0x218] sm:$0xff]   ;;  %v11501_v17 = vld [vmem:[#allocation7 + $0x260] sm:$0xff]   ;;  %v11503_v19 = vld [vmem:[#allocation7 + $0x1e8] sm:$0xff]  }
 0x202   :  { %10494 = vmatprep.subr.bf16.mxu1 %v11456_v20  ;;  %v11504_v20 = vld [vmem:[#allocation7 + $0x1a8] sm:$0xff]  }
 0x203   :  { %10473 = vmatpush3.bf16.msra.mxu0 %v11455_v18  ;;  %v11502_v18 = vld [vmem:[#allocation7 + $0x220] sm:$0xff]  }
 0x204   :  { %10474 = vmatprep.subr.bf16.mxu0 %v11458_v22 }
 0x205   :  { %10495 = vmatpush3.bf16.msra.mxu1 %v11457_v21  ;;  %v11505_v21 = vld [vmem:[#allocation7 + $0x268] sm:$0xff]  }
 0x206   :  { %10496 = vmatprep.subr.bf16.mxu1 %v11460_v24 }
 0x207   :  { %10475 = vmatpush3.bf16.msra.mxu0 %v11459_v23  ;;  %v11506_v23 = vld [vmem:[#allocation7 + $0x228] sm:$0xff]  }
 0x208   :  { %10476 = vmatprep.subr.bf16.mxu0 %v11462_v26 }
 0x209   :  { %10497 = vmatpush3.bf16.msra.mxu1 %v11461_v25  ;;  %v11507_v25 = vld [vmem:[#allocation7 + $0x1f0] sm:$0xff]  }
 0x20a   :  { %10498 = vmatprep.subr.bf16.mxu1 %v11464_v28 }
 0x20b   :  { %10477 = vmatpush3.bf16.msra.mxu0 %v11463_v27 }
 0x20c   :  { %10478 = vmatprep.subr.bf16.mxu0 %v11466_v31  ;;  %v85_v31 = vld [vmem:[#allocation2 + $0x8] sm:$0xff] }
 0x20d   :  { %10499 = vmatpush3.bf16.msra.mxu1 %v11465_v30  ;;  %v11509_v30 = vld [vmem:[#allocation7 + $0x270] sm:$0xff]  }
 0x20e   :  { %10500 = vmatprep.subr.bf16.mxu1 %v11468_v33 }
 0x20f   :  { %10479 = vmatpush3.bf16.msra.mxu0 %v11467_v32 }
 0x210   :  { %10480 = vmatprep.subr.bf16.mxu0 %v11470_v36  ;;  %v5438_v36 = vcombine.high %v85_v31, %v85_v31 }
 0x211   :  { %v10191_v39 = vpop.f32.mrb[24].mxu0  ;;  %10501 = vmatpush3.bf16.msra.mxu1 %v11469_v34  ;;  %v5445_v34 = vrot.slane %v85_v31, %v12079_v35  ;;  %v11543_v31 = vld [vmem:[#allocation7 + $0x2f8] sm:$0xff]  }
 0x212   :  { %v10192_v41 = vpop.f32.mrb[25].mxu0  ;;  %v10213_v45 = vpop.f32.mrb[24].mxu1  ;;  %10502 = vmatprep.subr.bf16.mxu1 %v11472_v38 }
 0x213   :  { %v10193_v43 = vadd.f32 %v10192_v41, %v10191_v39  ;;  %v10194_v44 = vpop.f32.mrb[26].mxu0  ;;  %v10214_v49 = vpop.f32.mrb[25].mxu1  ;;  %10481 = vmatpush3.bf16.msra.mxu0 %v11471_v37 }
 0x214   :  { %v10195_v48 = vpop.f32.mrb[27].mxu0  ;;  %v10215_v51 = vadd.f32 %v10214_v49, %v10213_v45  ;;  %v10216_v52 = vpop.f32.mrb[26].mxu1  ;;  %10482 = vmatprep.subr.bf16.mxu0 %v11474_v42  ;;  %v11511_v42 = vld [vmem:[#allocation7 + $0x1f8] sm:$0xff]   ;;  %v11510_v45 = vld [vmem:[#allocation7 + $0x230] sm:$0xff]  }
 0x215   :  { %v4897_v50 = vadd.f32 %v10193_v43, %v12172_v2  ;;  %v10217_v54 = vpop.f32.mrb[27].mxu1  ;;  %10503 = vmatpush3.bf16.msra.mxu1 %v11473_v40  ;;  %v12199_v2 = vrot.slane %v12176_v6, %v12079_v35  ;;  %v11494_v6 = vld [vmem:[#allocation7 + $0x210] sm:$0xff]   ;;  %v5453_v43 = vcombine.high %v5445_v34, %v5445_v34  ;;  %v11512_v49 = vld [vmem:[#allocation7 + $0x1b8] sm:$0xff]  }
 0x216   :  { %10504 = vmatprep.subr.bf16.mxu1 %v11476_v47  ;;  %v11508_v40 = vld [vmem:[#allocation7 + $0x1b0] sm:$0xff]   ;;  %v11513_v47 = vld [vmem:[#allocation7 + $0x278] sm:$0xff]   ;;  %v11517_v54 = vld [vmem:[#allocation7 + $0x340] sm:$0xff]  }
 0x217   :  { %v12191_v56 = vadd.f32 %v10215_v51, %v4897_v50  ;;  %10483 = vmatpush3.bf16.msra.mxu0 %v11475_v46  ;;  %v12207_v46 = vrot.slane %v5438_v36, %v12079_v35  ;;  %v5475_v48 = vrot.slane %v5453_v43, %v12079_v35  ;;  %v11515_v50 = vld [vmem:[#allocation7 + $0x2c0] sm:$0xff]   ;;  %v11514_v51 = vld [vmem:[#allocation7 + $0x238] sm:$0xff]  }
 0x218   :  { %10484 = vmatprep.subr.bf16.mxu0 %v11478_v55  ;;  %v11516_v55 = vld [vmem:[#allocation7 + $0x280] sm:$0xff]   ;;  %v11545_v36 = vld [vmem:[#allocation7 + $0x378] sm:$0xff]  }
 0x219   :  { %10505 = vmatpush3.bf16.msra.mxu1 %v11477_v53  ;;  %v5454_v52 = vcombine.high %v12207_v46, %v12207_v46  ;;  %v5435_v53 = vcombine.high %v12199_v2, %v12199_v2 }
 0x21a   :  { %10506 = vmatprep.subr.bf16.mxu1 %v11480_v58  ;;  %v11519_v58 = vld [vmem:[#allocation7 + $0x2c8] sm:$0xff]  }
 0x21b   :  { %10485 = vmatpush3.bf16.msra.mxu0 %v11479_v57  ;;  %v12215_v57 = vrot.slane %v5445_v34, %v12079_v35 }
 0x21c   :  { %10514 = vmatprep.subr.bf16.mxu0 %v11482_v60  ;;  %v12218_v60 = vrot.slane %v5454_v52, %v12079_v35  ;;  %v11558_v52 = vld [vmem:[#allocation7 + $0x450] sm:$0xff]  }
 0x21d   :  { %10507 = vmatpush3.bf16.msra.mxu1 %v11481_v59  ;;  %v11518_v59 = vld [vmem:[#allocation7 + $0x300] sm:$0xff]  }
 0x21e   :  { %8171 = vmatmul.mubr.bf16.vlgmr.msra.gmra.mrb[52].mxu0 %v5434_v62  ;;  %10536 = vmatprep.subr.bf16.mxu1 %v11485_v63  ;;  %v11520_v62 = vld [vmem:[#allocation7 + $0x288] sm:$0xff]   ;;  %v11523_v63 = vld [vmem:[#allocation7 + $0x2d0] sm:$0xff]   ;;  %v5486_v43 = vcombine.high %v12218_v60, %v12218_v60 }
 0x21f   :  { %10515 = vmatpush3.bf16.msra.mxu0 %v11484_v61  ;;  %8250 = vmatprep.mubr.bf16.mxu0 %v5437_v1  ;;  %v11521_v61 = vld [vmem:[#allocation7 + $0x348] sm:$0xff]   ;;  %v11525_v1 = vld [vmem:[#allocation7 + $0x350] sm:$0xff]  }
 0x220   :  { %8211 = vmatmul.mubr.bf16.vlgmr.msra.gmra.mrb[52].mxu1 %v12199_v2  ;;  %10516 = vmatprep.subr.bf16.mxu0 %v11487_v3  ;;  %v11524_v2 = vld [vmem:[#allocation7 + $0x290] sm:$0xff]   ;;  %v11527_v3 = vld [vmem:[#allocation7 + $0x2d8] sm:$0xff]  }
 0x221   :  { %10537 = vmatpush3.bf16.msra.mxu1 %v11486_v0  ;;  %8290 = vmatprep.mubr.bf16.mxu1 %v5475_v48  ;;  %v11522_v0 = vld [vmem:[#allocation7 + $0x308] sm:$0xff]  }
 0x222   :  { %10538 = vmatprep.subr.bf16.mxu1 %v11489_v5  ;;  %v11529_v5 = vld [vmem:[#allocation7 + $0x358] sm:$0xff]  }
 0x223   :  { %10517 = vmatpush3.bf16.msra.mxu0 %v11488_v4  ;;  %v11526_v4 = vld [vmem:[#allocation7 + $0x310] sm:$0xff]  }
 0x224   :  { %10518 = vmatprep.subr.bf16.mxu0 %v11491_v8  ;;  %v11531_v8 = vld [vmem:[#allocation7 + $0x2e0] sm:$0xff]  }
 0x225   :  { %10539 = vmatpush3.bf16.msra.mxu1 %v11490_v7  ;;  %v11528_v7 = vld [vmem:[#allocation7 + $0x298] sm:$0xff]  }
 0x226   :  { %10540 = vmatprep.subr.bf16.mxu1 %v11493_v10  ;;  %v11533_v10 = vld [vmem:[#allocation7 + $0x360] sm:$0xff]  }
 0x227   :  { %10519 = vmatpush3.bf16.msra.mxu0 %v11492_v9  ;;  %v11530_v9 = vld [vmem:[#allocation7 + $0x318] sm:$0xff]  }
 0x228   :  { %10520 = vmatprep.subr.bf16.mxu0 %v11495_v11  ;;  %v11535_v11 = vld [vmem:[#allocation7 + $0x2e8] sm:$0xff]  }
 0x229   :  { %10541 = vmatpush3.bf16.msra.mxu1 %v11494_v6  ;;  %v11532_v6 = vld [vmem:[#allocation7 + $0x2a0] sm:$0xff]  }
 0x22a   :  { %10542 = vmatprep.subr.bf16.mxu1 %v11497_v13  ;;  %v11537_v13 = vld [vmem:[#allocation7 + $0x368] sm:$0xff]  }
 0x22b   :  { %10521 = vmatpush3.bf16.msra.mxu0 %v11496_v12  ;;  %v11534_v12 = vld [vmem:[#allocation7 + $0x320] sm:$0xff]  }
 0x22c   :  { %10522 = vmatprep.subr.bf16.mxu0 %v11499_v15 }
 0x22d   :  { %10543 = vmatpush3.bf16.msra.mxu1 %v11498_v14  ;;  %v11536_v14 = vld [vmem:[#allocation7 + $0x2a8] sm:$0xff]  }
 0x22e   :  { %10544 = vmatprep.subr.bf16.mxu1 %v11501_v17 }
 0x22f   :  { %10523 = vmatpush3.bf16.msra.mxu0 %v11500_v16  ;;  %v11539_v16 = vld [vmem:[#allocation7 + $0x2f0] sm:$0xff]  }
 0x230   :  { %10524 = vmatprep.subr.bf16.mxu0 %v11503_v19 }
 0x231   :  { %v10235_v22 = vpop.f32.mrb[28].mxu0  ;;  %10545 = vmatpush3.bf16.msra.mxu1 %v11502_v18  ;;  %v11538_v18 = vld [vmem:[#allocation7 + $0x328] sm:$0xff]  }
 0x232   :  { %v10236_v24 = vpop.f32.mrb[29].mxu0  ;;  %v10257_v28 = vpop.f32.mrb[28].mxu1  ;;  %10546 = vmatprep.subr.bf16.mxu1 %v11505_v21 }
 0x233   :  { %v10237_v26 = vadd.f32 %v10236_v24, %v10235_v22  ;;  %v10238_v27 = vpop.f32.mrb[30].mxu0  ;;  %v10258_v33 = vpop.f32.mrb[29].mxu1  ;;  %10525 = vmatpush3.bf16.msra.mxu0 %v11504_v20  ;;  %v11540_v22 = vld [vmem:[#allocation7 + $0x2b0] sm:$0xff]  }
 0x234   :  { %v10239_v32 = vpop.f32.mrb[31].mxu0  ;;  %v10259_v38 = vadd.f32 %v10258_v33, %v10257_v28  ;;  %v10260_v39 = vpop.f32.mrb[30].mxu1  ;;  %10526 = vmatprep.subr.bf16.mxu0 %v11507_v25  ;;  %v11544_v33 = vld [vmem:[#allocation7 + $0x2b8] sm:$0xff]  }
 0x235   :  { %v4977_v37 = vadd.f32 %v10237_v26, %v12191_v56  ;;  %v10261_v41 = vpop.f32.mrb[31].mxu1  ;;  %10547 = vmatpush3.bf16.msra.mxu1 %v11506_v23  ;;  %v5485_v56 = vcombine.high %v5475_v48, %v5475_v48  ;;  %v11541_v23 = vld [vmem:[#allocation7 + $0x370] sm:$0xff]   ;;  %v11549_v39 = vld [vmem:[#allocation7 + $0x380] sm:$0xff]   ;;  %v11554_v48 = vld [vmem:[#allocation7 + $0x448] sm:$0xff]  }
 0x236   :  { %10548 = vmatprep.subr.bf16.mxu1 %v11509_v30  ;;  %v11542_v26 = vld [vmem:[#allocation7 + $0x330] sm:$0xff]   ;;  %v11550_v41 = vld [vmem:[#allocation7 + $0x440] sm:$0xff]  }
 0x237   :  { %v12204_v44 = vadd.f32 %v10259_v38, %v4977_v37  ;;  %10527 = vmatpush3.bf16.msra.mxu0 %v11508_v40  ;;  %v11546_v37 = vld [vmem:[#allocation7 + $0x338] sm:$0xff]   ;;  %v11547_v38 = vld [vmem:[#allocation7 + $0x3c0] sm:$0xff]   ;;  %v5483_v40 = vcombine.high %v12215_v57, %v12215_v57 }
 0x238   :  { %10528 = vmatprep.subr.bf16.mxu0 %v11511_v42  ;;  %v11551_v42 = vld [vmem:[#allocation7 + $0x400] sm:$0xff]  }
 0x239   :  { %10549 = vmatpush3.bf16.msra.mxu1 %v11510_v45  ;;  %v11552_v45 = vld [vmem:[#allocation7 + $0x3c8] sm:$0xff]  }
 0x23a   :  { %10550 = vmatprep.subr.bf16.mxu1 %v11513_v47  ;;  %v11553_v47 = vld [vmem:[#allocation7 + $0x388] sm:$0xff]  }
 0x23b   :  { %10529 = vmatpush3.bf16.msra.mxu0 %v11512_v49  ;;  %v11555_v49 = vld [vmem:[#allocation7 + $0x408] sm:$0xff]  }
 0x23c   :  { %10558 = vmatprep.subr.bf16.mxu0 %v11515_v50  ;;  %v11556_v50 = vld [vmem:[#allocation7 + $0x3d0] sm:$0xff]  }
 0x23d   :  { %10551 = vmatpush3.bf16.msra.mxu1 %v11514_v51  ;;  %v11557_v51 = vld [vmem:[#allocation7 + $0x390] sm:$0xff]  }
 0x23e   :  { %8251 = vmatmul.mubr.bf16.vlgmr.msra.gmra.mrb[56].mxu0 %v5435_v53  ;;  %10580 = vmatprep.subr.bf16.mxu1 %v11517_v54  ;;  %v11560_v53 = vld [vmem:[#allocation7 + $0x3d8] sm:$0xff]  }
 0x23f   :  { %10559 = vmatpush3.bf16.msra.mxu0 %v11516_v55  ;;  %8330 = vmatprep.mubr.bf16.mxu0 %v5485_v56  ;;  %v11561_v54 = vld [vmem:[#allocation7 + $0x398] sm:$0xff]  }
 0x240   :  { %8291 = vmatmul.mubr.bf16.vlgmr.msra.gmra.mrb[56].mxu1 %v12215_v57  ;;  %10560 = vmatprep.subr.bf16.mxu0 %v11519_v58  ;;  %v11562_v55 = vld [vmem:[#allocation7 + $0x458] sm:$0xff]   ;;  %v11564_v57 = vld [vmem:[#allocation7 + $0x3e0] sm:$0xff]  }
 0x241   :  { %10581 = vmatpush3.bf16.msra.mxu1 %v11518_v59  ;;  %8370 = vmatprep.mubr.bf16.mxu1 %v12218_v60  ;;  %v11563_v56 = vld [vmem:[#allocation7 + $0x418] sm:$0xff]   ;;  %v11565_v58 = vld [vmem:[#allocation7 + $0x3a0] sm:$0xff]  }
 0x242   :  { %10582 = vmatprep.subr.bf16.mxu1 %v11521_v61  ;;  %v11566_v59 = vld [vmem:[#allocation7 + $0x460] sm:$0xff]   ;;  %v11568_v61 = vld [vmem:[#allocation7 + $0x3e8] sm:$0xff]  }
 0x243   :  { %10561 = vmatpush3.bf16.msra.mxu0 %v11520_v62  ;;  %v11567_v60 = vld [vmem:[#allocation7 + $0x420] sm:$0xff]   ;;  %v11569_v62 = vld [vmem:[#allocation7 + $0x3a8] sm:$0xff]  }
 0x244   :  { %10562 = vmatprep.subr.bf16.mxu0 %v11523_v63  ;;  %v11570_v63 = vld [vmem:[#allocation7 + $0x468] sm:$0xff]  }
 0x245   :  { %10583 = vmatpush3.bf16.msra.mxu1 %v11522_v0  ;;  %v11571_v0 = vld [vmem:[#allocation7 + $0x428] sm:$0xff]  }
 0x246   :  { %10584 = vmatprep.subr.bf16.mxu1 %v11525_v1 }
 0x247   :  { %10563 = vmatpush3.bf16.msra.mxu0 %v11524_v2  ;;  %v11572_v2 = vld [vmem:[#allocation7 + $0x3f0] sm:$0xff]  }
 0x248   :  { %10564 = vmatprep.subr.bf16.mxu0 %v11527_v3 }
 0x249   :  { %10585 = vmatpush3.bf16.msra.mxu1 %v11526_v4  ;;  %v11573_v4 = vld [vmem:[#allocation7 + $0x3b0] sm:$0xff]  }
 0x24a   :  { %10586 = vmatprep.subr.bf16.mxu1 %v11529_v5 }
 0x24b   :  { %10565 = vmatpush3.bf16.msra.mxu0 %v11528_v7 }
 0x24c   :  { %10566 = vmatprep.subr.bf16.mxu0 %v11531_v8 }
 0x24d   :  { %10587 = vmatpush3.bf16.msra.mxu1 %v11530_v9  ;;  %v11574_v9 = vld [vmem:[#allocation7 + $0x470] sm:$0xff]  }
 0x24e   :  { %10588 = vmatprep.subr.bf16.mxu1 %v11533_v10  ;;  %v86_v10 = vld [vmem:[#allocation2 + $0x10] sm:$0xff] }
 0x24f   :  { %10567 = vmatpush3.bf16.msra.mxu0 %v11532_v6 }
 0x250   :  { %10568 = vmatprep.subr.bf16.mxu0 %v11535_v11 }
 0x251   :  { %v10279_v15 = vpop.f32.mrb[32].mxu0  ;;  %10589 = vmatpush3.bf16.msra.mxu1 %v11534_v12  ;;  %v11575_v12 = vld [vmem:[#allocation7 + $0x430] sm:$0xff]  }
 0x252   :  { %v10280_v17 = vpop.f32.mrb[33].mxu0  ;;  %v10301_v21 = vpop.f32.mrb[32].mxu1  ;;  %10590 = vmatprep.subr.bf16.mxu1 %v11537_v13  ;;  %v5494_v13 = vrot.slane %v86_v10, %v12079_v35 }
 0x253   :  { %v10281_v19 = vadd.f32 %v10280_v17, %v10279_v15  ;;  %v10282_v20 = vpop.f32.mrb[34].mxu0  ;;  %10569 = vmatpush3.bf16.msra.mxu0 %v11536_v14  ;;  %v10302_v25 = vpop.f32.mrb[33].mxu1  ;;  %v5487_v14 = vcombine.high %v86_v10, %v86_v10  ;;  %v11609_v10 = vld [vmem:[#allocation7 + $0x4b8] sm:$0xff]  }
 0x254   :  { %v10283_v24 = vpop.f32.mrb[35].mxu0  ;;  %v10303_v28 = vadd.f32 %v10302_v25, %v10301_v21  ;;  %v10304_v30 = vpop.f32.mrb[34].mxu1  ;;  %10570 = vmatprep.subr.bf16.mxu0 %v11539_v16  ;;  %v11577_v20 = vld [vmem:[#allocation7 + $0x3b8] sm:$0xff]   ;;  %v5502_v21 = vcombine.high %v5494_v13, %v5494_v13 }
 0x255   :  { %v5057_v27 = vadd.f32 %v10281_v19, %v12204_v44  ;;  %10591 = vmatpush3.bf16.msra.mxu1 %v11538_v18  ;;  %v10305_v32 = vpop.f32.mrb[35].mxu1  ;;  %v12231_v44 = vrot.slane %v12207_v46, %v12079_v35  ;;  %v11559_v46 = vld [vmem:[#allocation7 + $0x410] sm:$0xff]   ;;  %v11576_v18 = vld [vmem:[#allocation7 + $0x3f8] sm:$0xff]  }
 0x256   :  { %10592 = vmatprep.subr.bf16.mxu1 %v11541_v23  ;;  %v11578_v24 = vld [vmem:[#allocation7 + $0x478] sm:$0xff]   ;;  %v11582_v32 = vld [vmem:[#allocation7 + $0x540] sm:$0xff]  }
 0x257   :  { %v12223_v34 = vadd.f32 %v10303_v28, %v5057_v27  ;;  %10571 = vmatpush3.bf16.msra.mxu0 %v11540_v22  ;;  %v12237_v22 = vrot.slane %v5487_v14, %v12079_v35  ;;  %v11579_v25 = vld [vmem:[#allocation7 + $0x438] sm:$0xff]   ;;  %v11580_v27 = vld [vmem:[#allocation7 + $0x4c0] sm:$0xff]  }
 0x258   :  { %10572 = vmatprep.subr.bf16.mxu0 %v11543_v31  ;;  %v11581_v28 = vld [vmem:[#allocation7 + $0x480] sm:$0xff]   ;;  %v5484_v31 = vcombine.high %v12231_v44, %v12231_v44 }
 0x259   :  { %10593 = vmatpush3.bf16.msra.mxu1 %v11542_v26  ;;  %v5524_v26 = vrot.slane %v5502_v21, %v12079_v35  ;;  %v5503_v30 = vcombine.high %v12237_v22, %v12237_v22  ;;  %v11612_v14 = vld [vmem:[#allocation7 + $0x5c0] sm:$0xff]   ;;  %v11617_v21 = vld [vmem:[#allocation7 + $0x5c8] sm:$0xff]  }
 0x25a   :  { %10594 = vmatprep.subr.bf16.mxu1 %v11545_v36  ;;  %v12247_v36 = vrot.slane %v5494_v13, %v12079_v35  ;;  %v11611_v13 = vld [vmem:[#allocation7 + $0x538] sm:$0xff]  }
 0x25b   :  { %10573 = vmatpush3.bf16.msra.mxu0 %v11544_v33  ;;  %v11583_v33 = vld [vmem:[#allocation7 + $0x500] sm:$0xff]  }
 0x25c   :  { %10602 = vmatprep.subr.bf16.mxu0 %v11547_v38  ;;  %v11585_v38 = vld [vmem:[#allocation7 + $0x488] sm:$0xff]  }
 0x25d   :  { %10595 = vmatpush3.bf16.msra.mxu1 %v11546_v37  ;;  %v11584_v37 = vld [vmem:[#allocation7 + $0x4c8] sm:$0xff]  }
 0x25e   :  { %8331 = vmatmul.mubr.bf16.vlgmr.msra.gmra.mrb[60].mxu0 %v5483_v40  ;;  %10624 = vmatprep.subr.bf16.mxu1 %v11550_v41  ;;  %v11586_v40 = vld [vmem:[#allocation7 + $0x548] sm:$0xff]  }
 0x25f   :  { %10603 = vmatpush3.bf16.msra.mxu0 %v11549_v39  ;;  %8410 = vmatprep.mubr.bf16.mxu0 %v5486_v43  ;;  %v12250_v39 = vrot.slane %v5503_v30, %v12079_v35  ;;  %v11587_v41 = vld [vmem:[#allocation7 + $0x508] sm:$0xff]   ;;  %v11589_v43 = vld [vmem:[#allocation7 + $0x490] sm:$0xff]   ;;  %v11625_v30 = vld [vmem:[#allocation7 + $0x5d8] sm:$0xff]  }
 0x260   :  { %8371 = vmatmul.mubr.bf16.vlgmr.msra.gmra.mrb[60].mxu1 %v12231_v44  ;;  %10604 = vmatprep.subr.bf16.mxu0 %v11552_v45  ;;  %v11590_v44 = vld [vmem:[#allocation7 + $0x550] sm:$0xff]  }
 0x261   :  { %10625 = vmatpush3.bf16.msra.mxu1 %v11551_v42  ;;  %8450 = vmatprep.mubr.bf16.mxu1 %v5524_v26  ;;  %v11588_v42 = vld [vmem:[#allocation7 + $0x4d0] sm:$0xff]  }
 0x262   :  { %10626 = vmatprep.subr.bf16.mxu1 %v11554_v48  ;;  %v11591_v45 = vld [vmem:[#allocation7 + $0x510] sm:$0xff]   ;;  %v11593_v48 = vld [vmem:[#allocation7 + $0x498] sm:$0xff]  }
 0x263   :  { %10605 = vmatpush3.bf16.msra.mxu0 %v11553_v47  ;;  %v11592_v47 = vld [vmem:[#allocation7 + $0x4d8] sm:$0xff]  }
 0x264   :  { %10606 = vmatprep.subr.bf16.mxu0 %v11556_v50  ;;  %v11595_v50 = vld [vmem:[#allocation7 + $0x518] sm:$0xff]  }
 0x265   :  { %10627 = vmatpush3.bf16.msra.mxu1 %v11555_v49  ;;  %v11594_v49 = vld [vmem:[#allocation7 + $0x558] sm:$0xff]  }
 0x266   :  { %10628 = vmatprep.subr.bf16.mxu1 %v11558_v52  ;;  %v11597_v52 = vld [vmem:[#allocation7 + $0x4a0] sm:$0xff]  }
 0x267   :  { %10607 = vmatpush3.bf16.msra.mxu0 %v11557_v51  ;;  %v11596_v51 = vld [vmem:[#allocation7 + $0x4e0] sm:$0xff]  }
 0x268   :  { %10608 = vmatprep.subr.bf16.mxu0 %v11560_v53  ;;  %v11599_v53 = vld [vmem:[#allocation7 + $0x520] sm:$0xff]  }
 0x269   :  { %10629 = vmatpush3.bf16.msra.mxu1 %v11559_v46  ;;  %v11598_v46 = vld [vmem:[#allocation7 + $0x560] sm:$0xff]  }
 0x26a   :  { %10630 = vmatprep.subr.bf16.mxu1 %v11562_v55  ;;  %v11601_v55 = vld [vmem:[#allocation7 + $0x4a8] sm:$0xff]  }
 0x26b   :  { %10609 = vmatpush3.bf16.msra.mxu0 %v11561_v54  ;;  %v11600_v54 = vld [vmem:[#allocation7 + $0x4e8] sm:$0xff]  }
 0x26c   :  { %10610 = vmatprep.subr.bf16.mxu0 %v11564_v57  ;;  %v11603_v57 = vld [vmem:[#allocation7 + $0x528] sm:$0xff]  }
 0x26d   :  { %10631 = vmatpush3.bf16.msra.mxu1 %v11563_v56  ;;  %v11602_v56 = vld [vmem:[#allocation7 + $0x568] sm:$0xff]  }
 0x26e   :  { %10632 = vmatprep.subr.bf16.mxu1 %v11566_v59 }
 0x26f   :  { %10611 = vmatpush3.bf16.msra.mxu0 %v11565_v58  ;;  %v11604_v58 = vld [vmem:[#allocation7 + $0x4f0] sm:$0xff]  }
 0x270   :  { %10612 = vmatprep.subr.bf16.mxu0 %v11568_v61 }
 0x271   :  { %v10323_v1 = vpop.f32.mrb[36].mxu0  ;;  %10633 = vmatpush3.bf16.msra.mxu1 %v11567_v60  ;;  %v11605_v60 = vld [vmem:[#allocation7 + $0x4b0] sm:$0xff]  }
 0x272   :  { %v10324_v3 = vpop.f32.mrb[37].mxu0  ;;  %v10345_v8 = vpop.f32.mrb[36].mxu1  ;;  %10634 = vmatprep.subr.bf16.mxu1 %v11570_v63 }
 0x273   :  { %v10325_v5 = vadd.f32 %v10324_v3, %v10323_v1  ;;  %v10326_v7 = vpop.f32.mrb[38].mxu0  ;;  %10613 = vmatpush3.bf16.msra.mxu0 %v11569_v62  ;;  %v10346_v11 = vpop.f32.mrb[37].mxu1  ;;  %v11606_v62 = vld [vmem:[#allocation7 + $0x570] sm:$0xff]   ;;  %v11608_v3 = vld [vmem:[#allocation7 + $0x4f8] sm:$0xff]  }
 0x274   :  { %v10327_v6 = vpop.f32.mrb[39].mxu0  ;;  %v10347_v16 = vadd.f32 %v10346_v11, %v10345_v8  ;;  %v10348_v17 = vpop.f32.mrb[38].mxu1  ;;  %10614 = vmatprep.subr.bf16.mxu0 %v11572_v2  ;;  %v11607_v2 = vld [vmem:[#allocation7 + $0x530] sm:$0xff]   ;;  %v11610_v11 = vld [vmem:[#allocation7 + $0x578] sm:$0xff]  }
 0x275   :  { %v5137_v15 = vadd.f32 %v10325_v5, %v12223_v34  ;;  %10635 = vmatpush3.bf16.msra.mxu1 %v11571_v0  ;;  %v10349_v19 = vpop.f32.mrb[39].mxu1  ;;  %v5534_v34 = vcombine.high %v5524_v26, %v5524_v26  ;;  %v11615_v17 = vld [vmem:[#allocation7 + $0x640] sm:$0xff]   ;;  %v11621_v26 = vld [vmem:[#allocation7 + $0x5d0] sm:$0xff]  }
 0x276   :  { %10636 = vmatprep.subr.bf16.mxu1 %v11574_v9  ;;  %v5535_v19 = vcombine.high %v12250_v39, %v12250_v39 }
 0x277   :  { %v12239_v23 = vadd.f32 %v10347_v16, %v5137_v15  ;;  %10615 = vmatpush3.bf16.msra.mxu0 %v11573_v4  ;;  %v11614_v15 = vld [vmem:[#allocation7 + $0x580] sm:$0xff]   ;;  %v5532_v16 = vcombine.high %v12247_v36, %v12247_v36 }
 0x278   :  { %10616 = vmatprep.subr.bf16.mxu0 %v11576_v18  ;;  %v11616_v18 = vld [vmem:[#allocation7 + $0x600] sm:$0xff]  }
 0x279   :  { %10637 = vmatpush3.bf16.msra.mxu1 %v11575_v12 }
 0x27a   :  { %10638 = vmatprep.subr.bf16.mxu1 %v11578_v24  ;;  %v11619_v24 = vld [vmem:[#allocation7 + $0x648] sm:$0xff]  }
 0x27b   :  { %10617 = vmatpush3.bf16.msra.mxu0 %v11577_v20  ;;  %v12263_v20 = vrot.slane %v12237_v22, %v12079_v35  ;;  %v11624_v22 = vld [vmem:[#allocation7 + $0x610] sm:$0xff]  }
 0x27c   :  { %10646 = vmatprep.subr.bf16.mxu0 %v11580_v27  ;;  %v11622_v27 = vld [vmem:[#allocation7 + $0x590] sm:$0xff]  }
 0x27d   :  { %10639 = vmatpush3.bf16.msra.mxu1 %v11579_v25  ;;  %v11620_v25 = vld [vmem:[#allocation7 + $0x608] sm:$0xff]  }
 0x27e   :  { %8411 = vmatmul.mubr.bf16.vlgmr.msra.gmra.mrb[64].mxu0 %v5484_v31  ;;  %10668 = vmatprep.subr.bf16.mxu1 %v11582_v32  ;;  %v11626_v31 = vld [vmem:[#allocation7 + $0x598] sm:$0xff]  }
 0x27f   :  { %10647 = vmatpush3.bf16.msra.mxu0 %v11581_v28  ;;  %8490 = vmatprep.mubr.bf16.mxu0 %v5534_v34  ;;  %v11623_v28 = vld [vmem:[#allocation7 + $0x650] sm:$0xff]   ;;  %v11627_v32 = vld [vmem:[#allocation7 + $0x658] sm:$0xff]   ;;  %v11629_v34 = vld [vmem:[#allocation7 + $0x5e0] sm:$0xff]  }
 0x280   :  { %8451 = vmatmul.mubr.bf16.vlgmr.msra.gmra.mrb[64].mxu1 %v12247_v36  ;;  %10648 = vmatprep.subr.bf16.mxu0 %v11584_v37  ;;  %v11630_v36 = vld [vmem:[#allocation7 + $0x5a0] sm:$0xff]  }
 0x281   :  { %10669 = vmatpush3.bf16.msra.mxu1 %v11583_v33  ;;  %8530 = vmatprep.mubr.bf16.mxu1 %v12250_v39  ;;  %v11628_v33 = vld [vmem:[#allocation7 + $0x618] sm:$0xff]   ;;  %v11631_v37 = vld [vmem:[#allocation7 + $0x660] sm:$0xff]   ;;  %v11633_v39 = vld [vmem:[#allocation7 + $0x5e8] sm:$0xff]  }
 0x282   :  { %10670 = vmatprep.subr.bf16.mxu1 %v11586_v40  ;;  %v11634_v40 = vld [vmem:[#allocation7 + $0x5a8] sm:$0xff]  }
 0x283   :  { %10649 = vmatpush3.bf16.msra.mxu0 %v11585_v38  ;;  %v11632_v38 = vld [vmem:[#allocation7 + $0x620] sm:$0xff]  }
 0x284   :  { %10650 = vmatprep.subr.bf16.mxu0 %v11588_v42  ;;  %v11636_v42 = vld [vmem:[#allocation7 + $0x628] sm:$0xff]  }
 0x285   :  { %10671 = vmatpush3.bf16.msra.mxu1 %v11587_v41  ;;  %v11635_v41 = vld [vmem:[#allocation7 + $0x668] sm:$0xff]  }
 0x286   :  { %10672 = vmatprep.subr.bf16.mxu1 %v11590_v44 }
 0x287   :  { %10651 = vmatpush3.bf16.msra.mxu0 %v11589_v43  ;;  %v11637_v43 = vld [vmem:[#allocation7 + $0x5f0] sm:$0xff]  }
 0x288   :  { %10652 = vmatprep.subr.bf16.mxu0 %v11592_v47 }
 0x289   :  { %10673 = vmatpush3.bf16.msra.mxu1 %v11591_v45  ;;  %v11638_v45 = vld [vmem:[#allocation7 + $0x5b0] sm:$0xff]  }
 0x28a   :  { %10674 = vmatprep.subr.bf16.mxu1 %v11594_v49 }
 0x28b   :  { %10653 = vmatpush3.bf16.msra.mxu0 %v11593_v48  ;;  %v11639_v48 = vld [vmem:[#allocation7 + $0x670] sm:$0xff]  }
 0x28c   :  { %10654 = vmatprep.subr.bf16.mxu0 %v11596_v51 }
 0x28d   :  { %10675 = vmatpush3.bf16.msra.mxu1 %v11595_v50 }
 0x28e   :  { %10676 = vmatprep.subr.bf16.mxu1 %v11598_v46  ;;  %v11641_v46 = vld [vmem:[#allocation7 + $0x5f8] sm:$0xff]  }
 0x28f   :  { %10655 = vmatpush3.bf16.msra.mxu0 %v11597_v52  ;;  %v11640_v52 = vld [vmem:[#allocation7 + $0x630] sm:$0xff]  }
 0x290   :  { %10656 = vmatprep.subr.bf16.mxu0 %v11600_v54 }
 0x291   :  { %v10367_v59 = vpop.f32.mrb[40].mxu0  ;;  %10677 = vmatpush3.bf16.msra.mxu1 %v11599_v53  ;;  %v87_v53 = vld [vmem:[#allocation2 + $0x18] sm:$0xff] }
 0x292   :  { %v10368_v61 = vpop.f32.mrb[41].mxu0  ;;  %10678 = vmatprep.subr.bf16.mxu1 %v11602_v56  ;;  %v10389_v1 = vpop.f32.mrb[40].mxu1  ;;  %v5543_v56 = vrot.slane %v87_v53, %v12079_v35 }
 0x293   :  { %v10369_v63 = vadd.f32 %v10368_v61, %v10367_v59  ;;  %v10370_v0 = vpop.f32.mrb[42].mxu0  ;;  %10657 = vmatpush3.bf16.msra.mxu0 %v11601_v55  ;;  %v10390_v5 = vpop.f32.mrb[41].mxu1  ;;  %v11642_v61 = vld [vmem:[#allocation7 + $0x5b8] sm:$0xff]  }
 0x294   :  { %v10371_v4 = vpop.f32.mrb[43].mxu0  ;;  %10658 = vmatprep.subr.bf16.mxu0 %v11604_v58  ;;  %v10391_v8 = vadd.f32 %v10390_v5, %v10389_v1  ;;  %v10392_v9 = vpop.f32.mrb[42].mxu1  ;;  %v5551_v0 = vcombine.high %v5543_v56, %v5543_v56 }
 0x295   :  { %v5217_v7 = vadd.f32 %v10369_v63, %v12239_v23  ;;  %10679 = vmatpush3.bf16.msra.mxu1 %v11603_v57  ;;  %v10393_v6 = vpop.f32.mrb[43].mxu1  ;;  %v11618_v23 = vld [vmem:[#allocation7 + $0x588] sm:$0xff]   ;;  %v5536_v57 = vcombine.high %v87_v53, %v87_v53  ;;  %v11643_v63 = vld [vmem:[#allocation7 + $0x678] sm:$0xff]   ;;  %v11645_v4 = vld [vmem:[#allocation7 + $0x6c0] sm:$0xff]   ;;  %v5533_v9 = vcombine.high %v12263_v20, %v12263_v20 }
 0x296   :  { %10680 = vmatprep.subr.bf16.mxu1 %v11606_v62  ;;  %v5573_v5 = vrot.slane %v5551_v0, %v12079_v35  ;;  %v11648_v6 = vld [vmem:[#allocation7 + $0x700] sm:$0xff]   ;;  %v11684_v0 = vld [vmem:[#allocation7 + $0x848] sm:$0xff]  }
 0x297   :  { %v12255_v12 = vadd.f32 %v10391_v8, %v5217_v7  ;;  %10659 = vmatpush3.bf16.msra.mxu0 %v11605_v60  ;;  %v12269_v1 = vrot.slane %v5536_v57, %v12079_v35  ;;  %v11646_v7 = vld [vmem:[#allocation7 + $0x680] sm:$0xff]  }
 0x298   :  { %10660 = vmatprep.subr.bf16.mxu0 %v11608_v3 }
 0x299   :  { %10681 = vmatpush3.bf16.msra.mxu1 %v11607_v2  ;;  %v11644_v2 = vld [vmem:[#allocation7 + $0x638] sm:$0xff]   ;;  %v5552_v8 = vcombine.high %v12269_v1, %v12269_v1 }
 0x29a   :  { %10682 = vmatprep.subr.bf16.mxu1 %v11610_v11  ;;  %v5583_v11 = vcombine.high %v5573_v5, %v5573_v5 }
 0x29b   :  { %10661 = vmatpush3.bf16.msra.mxu0 %v11609_v10  ;;  %v11647_v10 = vld [vmem:[#allocation7 + $0x740] sm:$0xff]  }
 0x29c   :  { %10690 = vmatprep.subr.bf16.mxu0 %v11612_v14  ;;  %v11650_v14 = vld [vmem:[#allocation7 + $0x688] sm:$0xff]  }
 0x29d   :  { %10683 = vmatpush3.bf16.msra.mxu1 %v11611_v13  ;;  %v11649_v13 = vld [vmem:[#allocation7 + $0x6c8] sm:$0xff]  }
 0x29e   :  { %8491 = vmatmul.mubr.bf16.vlgmr.msra.gmra.mrb[68].mxu0 %v5532_v16  ;;  %10712 = vmatprep.subr.bf16.mxu1 %v11615_v17  ;;  %v11651_v16 = vld [vmem:[#allocation7 + $0x748] sm:$0xff]  }
 0x29f   :  { %10691 = vmatpush3.bf16.msra.mxu0 %v11614_v15  ;;  %8570 = vmatprep.mubr.bf16.mxu0 %v5535_v19  ;;  %v12282_v15 = vrot.slane %v5552_v8, %v12079_v35  ;;  %v11652_v17 = vld [vmem:[#allocation7 + $0x708] sm:$0xff]   ;;  %v11654_v19 = vld [vmem:[#allocation7 + $0x690] sm:$0xff]   ;;  %v11691_v8 = vld [vmem:[#allocation7 + $0x798] sm:$0xff]  }
 0x2a0   :  { %8531 = vmatmul.mubr.bf16.vlgmr.msra.gmra.mrb[68].mxu1 %v12263_v20  ;;  %10692 = vmatprep.subr.bf16.mxu0 %v11617_v21  ;;  %v11655_v20 = vld [vmem:[#allocation7 + $0x750] sm:$0xff]  }
 0x2a1   :  { %10713 = vmatpush3.bf16.msra.mxu1 %v11616_v18  ;;  %8610 = vmatprep.mubr.bf16.mxu1 %v5573_v5  ;;  %v11653_v18 = vld [vmem:[#allocation7 + $0x6d0] sm:$0xff]  }
 0x2a2   :  { %10714 = vmatprep.subr.bf16.mxu1 %v11619_v24  ;;  %v11656_v21 = vld [vmem:[#allocation7 + $0x710] sm:$0xff]   ;;  %v11658_v24 = vld [vmem:[#allocation7 + $0x698] sm:$0xff]  }
 0x2a3   :  { %10693 = vmatpush3.bf16.msra.mxu0 %v11618_v23  ;;  %v11657_v23 = vld [vmem:[#allocation7 + $0x6d8] sm:$0xff]   ;;  %v11688_v5 = vld [vmem:[#allocation7 + $0x850] sm:$0xff]  }
 0x2a4   :  { %10694 = vmatprep.subr.bf16.mxu0 %v11621_v26  ;;  %v11660_v26 = vld [vmem:[#allocation7 + $0x718] sm:$0xff]  }
 0x2a5   :  { %10715 = vmatpush3.bf16.msra.mxu1 %v11620_v25  ;;  %v11659_v25 = vld [vmem:[#allocation7 + $0x758] sm:$0xff]  }
 0x2a6   :  { %10716 = vmatprep.subr.bf16.mxu1 %v11623_v28  ;;  %v11662_v28 = vld [vmem:[#allocation7 + $0x6a0] sm:$0xff]  }
 0x2a7   :  { %10695 = vmatpush3.bf16.msra.mxu0 %v11622_v27  ;;  %v11661_v27 = vld [vmem:[#allocation7 + $0x6e0] sm:$0xff]  }
 0x2a8   :  { %10696 = vmatprep.subr.bf16.mxu0 %v11625_v30  ;;  %v11664_v30 = vld [vmem:[#allocation7 + $0x720] sm:$0xff]  }
 0x2a9   :  { %10717 = vmatpush3.bf16.msra.mxu1 %v11624_v22  ;;  %v11663_v22 = vld [vmem:[#allocation7 + $0x760] sm:$0xff]  }
 0x2aa   :  { %10718 = vmatprep.subr.bf16.mxu1 %v11627_v32  ;;  %v11666_v32 = vld [vmem:[#allocation7 + $0x6a8] sm:$0xff]  }
 0x2ab   :  { %10697 = vmatpush3.bf16.msra.mxu0 %v11626_v31  ;;  %v11665_v31 = vld [vmem:[#allocation7 + $0x6e8] sm:$0xff]  }
 0x2ac   :  { %10698 = vmatprep.subr.bf16.mxu0 %v11629_v34  ;;  %v11668_v34 = vld [vmem:[#allocation7 + $0x728] sm:$0xff]  }
 0x2ad   :  { %10719 = vmatpush3.bf16.msra.mxu1 %v11628_v33  ;;  %v11667_v33 = vld [vmem:[#allocation7 + $0x768] sm:$0xff]  }
 0x2ae   :  { %10720 = vmatprep.subr.bf16.mxu1 %v11631_v37 }
 0x2af   :  { %10699 = vmatpush3.bf16.msra.mxu0 %v11630_v36  ;;  %v11669_v36 = vld [vmem:[#allocation7 + $0x6f0] sm:$0xff]  }
 0x2b0   :  { %10700 = vmatprep.subr.bf16.mxu0 %v11633_v39 }
 0x2b1   :  { %v10411_v44 = vpop.f32.mrb[44].mxu0  ;;  %10721 = vmatpush3.bf16.msra.mxu1 %v11632_v38  ;;  %v11670_v38 = vld [vmem:[#allocation7 + $0x6b0] sm:$0xff]  }
 0x2b2   :  { %v10412_v47 = vpop.f32.mrb[45].mxu0  ;;  %10722 = vmatprep.subr.bf16.mxu1 %v11635_v41  ;;  %v11671_v41 = vld [vmem:[#allocation7 + $0x770] sm:$0xff]  }
 0x2b3   :  { %v10413_v49 = vadd.f32 %v10412_v47, %v10411_v44  ;;  %v10414_v50 = vpop.f32.mrb[46].mxu0  ;;  %v10433_v51 = vpop.f32.mrb[44].mxu1  ;;  %10701 = vmatpush3.bf16.msra.mxu0 %v11634_v40  ;;  %v11672_v44 = vld [vmem:[#allocation7 + $0x730] sm:$0xff]  }
 0x2b4   :  { %v10415_v54 = vpop.f32.mrb[47].mxu0  ;;  %v10434_v55 = vpop.f32.mrb[45].mxu1  ;;  %10702 = vmatprep.subr.bf16.mxu0 %v11637_v43 }
 0x2b5   :  { %v5297_v58 = vadd.f32 %v10413_v49, %v12255_v12  ;;  %v10435_v59 = vadd.f32 %v10434_v55, %v10433_v51  ;;  %10723 = vmatpush3.bf16.msra.mxu1 %v11636_v42  ;;  %v10436_v60 = vpop.f32.mrb[46].mxu1  ;;  %v12279_v12 = vrot.slane %v5543_v56, %v12079_v35  ;;  %v11674_v51 = vld [vmem:[#allocation7 + $0x6b8] sm:$0xff]   ;;  %v11677_v55 = vld [vmem:[#allocation7 + $0x7c0] sm:$0xff]  }
 0x2b6   :  { %v10437_v62 = vpop.f32.mrb[47].mxu1  ;;  %10724 = vmatprep.subr.bf16.mxu1 %v11639_v48  ;;  %v11676_v54 = vld [vmem:[#allocation7 + $0x738] sm:$0xff]   ;;  %v11679_v56 = vld [vmem:[#allocation7 + $0x780] sm:$0xff]   ;;  %v5584_v60 = vcombine.high %v12282_v15, %v12282_v15 }
 0x2b7   :  { %10703 = vmatpush3.bf16.msra.mxu0 %v11638_v45  ;;  %v12271_v3 = vadd.f32 %v10435_v59, %v5297_v58  ;;  %v11673_v45 = vld [vmem:[#allocation7 + $0x6f8] sm:$0xff]   ;;  %v5581_v57 = vcombine.high %v12279_v12, %v12279_v12  ;;  %v11680_v58 = vld [vmem:[#allocation7 + $0x840] sm:$0xff]   ;;  %v11682_v62 = vld [vmem:[#allocation7 + $0x7c8] sm:$0xff]  }
 0x2b8   :  { %10704 = vmatprep.subr.bf16.mxu0 %v11641_v46  ;;  %v11675_v46 = vld [vmem:[#allocation7 + $0x778] sm:$0xff]   ;;  %v11681_v59 = vld [vmem:[#allocation7 + $0x800] sm:$0xff]  }
 0x2b9   :  { %10725 = vmatpush3.bf16.msra.mxu1 %v11640_v52 }
 0x2ba   :  { %10726 = vmatprep.subr.bf16.mxu1 %v11643_v63  ;;  %v11683_v63 = vld [vmem:[#allocation7 + $0x788] sm:$0xff]  }
 0x2bb   :  { %10705 = vmatpush3.bf16.msra.mxu0 %v11642_v61  ;;  %v12295_v61 = vrot.slane %v12269_v1, %v12079_v35  ;;  %v11689_v1 = vld [vmem:[#allocation7 + $0x810] sm:$0xff]  }
 0x2bc   :  { %10734 = vmatprep.subr.bf16.mxu0 %v11645_v4  ;;  %v11687_v4 = vld [vmem:[#allocation7 + $0x790] sm:$0xff]  }
 0x2bd   :  { %10727 = vmatpush3.bf16.msra.mxu1 %v11644_v2  ;;  %v11685_v2 = vld [vmem:[#allocation7 + $0x808] sm:$0xff]  }
 0x2be   :  { %8571 = vmatmul.mubr.bf16.vlgmr.msra.gmra.mrb[72].mxu0 %v5533_v9  ;;  %10756 = vmatprep.subr.bf16.mxu1 %v11647_v10  ;;  %v11692_v9 = vld [vmem:[#allocation7 + $0x858] sm:$0xff]  }
 0x2bf   :  { %10735 = vmatpush3.bf16.msra.mxu0 %v11646_v7  ;;  %8650 = vmatprep.mubr.bf16.mxu0 %v5583_v11  ;;  %v11690_v7 = vld [vmem:[#allocation7 + $0x7d8] sm:$0xff]   ;;  %v11695_v11 = vld [vmem:[#allocation7 + $0x7a0] sm:$0xff]  }
 0x2c0   :  { %8611 = vmatmul.mubr.bf16.vlgmr.msra.gmra.mrb[72].mxu1 %v12279_v12  ;;  %10736 = vmatprep.subr.bf16.mxu0 %v11649_v13  ;;  %v11693_v10 = vld [vmem:[#allocation7 + $0x818] sm:$0xff]   ;;  %v11696_v12 = vld [vmem:[#allocation7 + $0x860] sm:$0xff]  }
 0x2c1   :  { %10757 = vmatpush3.bf16.msra.mxu1 %v11648_v6  ;;  %8690 = vmatprep.mubr.bf16.mxu1 %v12282_v15  ;;  %v11694_v6 = vld [vmem:[#allocation7 + $0x7e0] sm:$0xff]   ;;  %v11699_v15 = vld [vmem:[#allocation7 + $0x7a8] sm:$0xff]  }
 0x2c2   :  { %10758 = vmatprep.subr.bf16.mxu1 %v11651_v16  ;;  %v11697_v13 = vld [vmem:[#allocation7 + $0x820] sm:$0xff]   ;;  %v11700_v16 = vld [vmem:[#allocation7 + $0x868] sm:$0xff]  }
 0x2c3   :  { %10737 = vmatpush3.bf16.msra.mxu0 %v11650_v14  ;;  %v11698_v14 = vld [vmem:[#allocation7 + $0x7e8] sm:$0xff]  }
 0x2c4   :  { %10738 = vmatprep.subr.bf16.mxu0 %v11653_v18  ;;  %v11702_v18 = vld [vmem:[#allocation7 + $0x7f0] sm:$0xff]  }
 0x2c5   :  { %10759 = vmatpush3.bf16.msra.mxu1 %v11652_v17  ;;  %v11701_v17 = vld [vmem:[#allocation7 + $0x828] sm:$0xff]  }
 0x2c6   :  { %10760 = vmatprep.subr.bf16.mxu1 %v11655_v20  ;;  %v11703_v20 = vld [vmem:[#allocation7 + $0x7b0] sm:$0xff]  }
 0x2c7   :  { %10739 = vmatpush3.bf16.msra.mxu0 %v11654_v19 }
 0x2c8   :  { %10740 = vmatprep.subr.bf16.mxu0 %v11657_v23  ;;  %v11704_v23 = vld [vmem:[#allocation7 + $0x870] sm:$0xff]  }
 0x2c9   :  { %10761 = vmatpush3.bf16.msra.mxu1 %v11656_v21 }
 0x2ca   :  { %10762 = vmatprep.subr.bf16.mxu1 %v11659_v25 }
 0x2cb   :  { %10741 = vmatpush3.bf16.msra.mxu0 %v11658_v24 }
 0x2cc   :  { %10742 = vmatprep.subr.bf16.mxu0 %v11661_v27  ;;  %v11705_v27 = vld [vmem:[#allocation7 + $0x830] sm:$0xff]  }
 0x2cd   :  { %10763 = vmatpush3.bf16.msra.mxu1 %v11660_v26 }
 0x2ce   :  { %10764 = vmatprep.subr.bf16.mxu1 %v11663_v22 }
 0x2cf   :  { %10743 = vmatpush3.bf16.msra.mxu0 %v11662_v28  ;;  %v11706_v28 = vld [vmem:[#allocation7 + $0x7f8] sm:$0xff]  }
 0x2d0   :  { %10744 = vmatprep.subr.bf16.mxu0 %v11665_v31 }
 0x2d1   :  { %v5376_v37 = vpop.f32.mrb[48].mxu0  ;;  %10765 = vmatpush3.bf16.msra.mxu1 %v11664_v30 }
 0x2d2   :  { %v5377_v39 = vadd.f32 %v5376_v37, %v12271_v3  ;;  %v11003_v40 = vpop.f32.mrb[49].mxu0  ;;  %10766 = vmatprep.subr.bf16.mxu1 %v11667_v33  ;;  %v11686_v3 = vld [vmem:[#allocation7 + $0x7d0] sm:$0xff]  }
 0x2d3   :  { %v10464_v42 = vpop.f32.mrb[48].mxu1  ;;  %v5379_v43 = vpop.f32.mrb[50].mxu0  ;;  %10745 = vmatpush3.bf16.msra.mxu0 %v11666_v32 }
 0x2d4   :  { %v10465_v47 = vpop.f32.mrb[49].mxu1  ;;  %v11004_v48 = vpop.f32.mrb[51].mxu0  ;;  %10746 = vmatprep.subr.bf16.mxu0 %v11669_v36  ;;  %v88_v36 = vld [vmem:[#allocation2 + $0x20] sm:$0xff] }
 0x2d5   :  { %v10466_v49 = vadd.f32 %v10465_v47, %v10464_v42  ;;  %10767 = vmatpush3.bf16.msra.mxu1 %v11668_v34  ;;  %v10467_v50 = vpop.f32.mrb[50].mxu1  ;;  %v11707_v34 = vld [vmem:[#allocation7 + $0x7b8] sm:$0xff]   ;;  %v5585_v40 = vcombine.high %v88_v36, %v88_v36  ;;  %v11710_v43 = vld [vmem:[#allocation7 + $0x8c0] sm:$0xff]   ;;  %v5582_v48 = vcombine.high %v12295_v61, %v12295_v61 }
 0x2d6   :  { %v10468_v52 = vpop.f32.mrb[51].mxu1  ;;  %10768 = vmatprep.subr.bf16.mxu1 %v11671_v41  ;;  %v11709_v42 = vld [vmem:[#allocation7 + $0x838] sm:$0xff]   ;;  %v11711_v47 = vld [vmem:[#allocation7 + $0x880] sm:$0xff]  }
 0x2d7   :  { %v12287_v53 = vadd.f32 %v10466_v49, %v5377_v39  ;;  %10747 = vmatpush3.bf16.msra.mxu0 %v11670_v38  ;;  %v11708_v38 = vld [vmem:[#allocation7 + $0x878] sm:$0xff]   ;;  %v5592_v39 = vrot.slane %v88_v36, %v12079_v35  ;;  %v11712_v50 = vld [vmem:[#allocation7 + $0x940] sm:$0xff]  }
 0x2d8   :  { %10748 = vmatprep.subr.bf16.mxu0 %v11673_v45  ;;  %v12303_v45 = vrot.slane %v5585_v40, %v12079_v35  ;;  %v11713_v52 = vld [vmem:[#allocation7 + $0x900] sm:$0xff]   ;;  %v11747_v40 = vld [vmem:[#allocation7 + $0x9c8] sm:$0xff]  }
 0x2d9   :  { %10769 = vmatpush3.bf16.msra.mxu1 %v11672_v44  ;;  %v5600_v44 = vcombine.high %v5592_v39, %v5592_v39  ;;  %v11745_v36 = vld [vmem:[#allocation7 + $0xa40] sm:$0xff]  }
 0x2da   :  { %10770 = vmatprep.subr.bf16.mxu1 %v11675_v46  ;;  %v12311_v46 = vrot.slane %v5592_v39, %v12079_v35  ;;  %v12327_v39 = vrot.slane %v12303_v45, %v12079_v35 }
 0x2db   :  { %10749 = vmatpush3.bf16.msra.mxu0 %v11674_v51  ;;  %v5622_v49 = vrot.slane %v5600_v44, %v12079_v35  ;;  %v5601_v51 = vcombine.high %v12303_v45, %v12303_v45  ;;  %v11751_v44 = vld [vmem:[#allocation7 + $0x9d0] sm:$0xff]  }
 0x2dc   :  { %10778 = vmatprep.subr.bf16.mxu0 %v11677_v55  ;;  %v11715_v55 = vld [vmem:[#allocation7 + $0x888] sm:$0xff]   ;;  %v11754_v45 = vld [vmem:[#allocation7 + $0xa10] sm:$0xff]  }
 0x2dd   :  { %10771 = vmatpush3.bf16.msra.mxu1 %v11676_v54  ;;  %v5632_v54 = vcombine.high %v5622_v49, %v5622_v49 }
 0x2de   :  { %8651 = vmatmul.mubr.bf16.vlgmr.msra.gmra.mrb[76].mxu0 %v5581_v57  ;;  %10800 = vmatprep.subr.bf16.mxu1 %v11680_v58  ;;  %v11716_v57 = vld [vmem:[#allocation7 + $0x948] sm:$0xff]  }
 0x2df   :  { %10779 = vmatpush3.bf16.msra.mxu0 %v11679_v56  ;;  %8730 = vmatprep.mubr.bf16.mxu0 %v5584_v60  ;;  %v12314_v56 = vrot.slane %v5601_v51, %v12079_v35  ;;  %v11717_v58 = vld [vmem:[#allocation7 + $0x908] sm:$0xff]   ;;  %v11719_v60 = vld [vmem:[#allocation7 + $0x890] sm:$0xff]   ;;  %v11757_v51 = vld [vmem:[#allocation7 + $0xa58] sm:$0xff]  }
 0x2e0   :  { %8691 = vmatmul.mubr.bf16.vlgmr.msra.gmra.mrb[76].mxu1 %v12295_v61  ;;  %10780 = vmatprep.subr.bf16.mxu0 %v11682_v62  ;;  %v11720_v61 = vld [vmem:[#allocation7 + $0x950] sm:$0xff]  }
 0x2e1   :  { %10801 = vmatpush3.bf16.msra.mxu1 %v11681_v59  ;;  %8770 = vmatprep.mubr.bf16.mxu1 %v5622_v49  ;;  %v11718_v59 = vld [vmem:[#allocation7 + $0x8d0] sm:$0xff]   ;;  %v11755_v49 = vld [vmem:[#allocation7 + $0x9d8] sm:$0xff]  }
 0x2e2   :  { %10802 = vmatprep.subr.bf16.mxu1 %v11684_v0  ;;  %v11721_v62 = vld [vmem:[#allocation7 + $0x910] sm:$0xff]   ;;  %v11723_v0 = vld [vmem:[#allocation7 + $0x898] sm:$0xff]  }
 0x2e3   :  { %10781 = vmatpush3.bf16.msra.mxu0 %v11683_v63  ;;  %v11722_v63 = vld [vmem:[#allocation7 + $0x8d8] sm:$0xff]  }
 0x2e4   :  { %10782 = vmatprep.subr.bf16.mxu0 %v11686_v3  ;;  %v11725_v3 = vld [vmem:[#allocation7 + $0x918] sm:$0xff]  }
 0x2e5   :  { %10803 = vmatpush3.bf16.msra.mxu1 %v11685_v2  ;;  %v11724_v2 = vld [vmem:[#allocation7 + $0x958] sm:$0xff]  }
 0x2e6   :  { %10804 = vmatprep.subr.bf16.mxu1 %v11688_v5  ;;  %v11727_v5 = vld [vmem:[#allocation7 + $0x8a0] sm:$0xff]  }
 0x2e7   :  { %10783 = vmatpush3.bf16.msra.mxu0 %v11687_v4  ;;  %v11726_v4 = vld [vmem:[#allocation7 + $0x8e0] sm:$0xff]  }
 0x2e8   :  { %10784 = vmatprep.subr.bf16.mxu0 %v11690_v7  ;;  %v11729_v7 = vld [vmem:[#allocation7 + $0x920] sm:$0xff]  }
 0x2e9   :  { %10805 = vmatpush3.bf16.msra.mxu1 %v11689_v1  ;;  %v11728_v1 = vld [vmem:[#allocation7 + $0x960] sm:$0xff]  }
 0x2ea   :  { %10806 = vmatprep.subr.bf16.mxu1 %v11692_v9  ;;  %v11731_v9 = vld [vmem:[#allocation7 + $0x8a8] sm:$0xff]  }
 0x2eb   :  { %10785 = vmatpush3.bf16.msra.mxu0 %v11691_v8  ;;  %v11730_v8 = vld [vmem:[#allocation7 + $0x8e8] sm:$0xff]  }
 0x2ec   :  { %10786 = vmatprep.subr.bf16.mxu0 %v11694_v6  ;;  %v11733_v6 = vld [vmem:[#allocation7 + $0x928] sm:$0xff]  }
 0x2ed   :  { %10807 = vmatpush3.bf16.msra.mxu1 %v11693_v10  ;;  %v11732_v10 = vld [vmem:[#allocation7 + $0x968] sm:$0xff]  }
 0x2ee   :  { %10808 = vmatprep.subr.bf16.mxu1 %v11696_v12 }
 0x2ef   :  { %10787 = vmatpush3.bf16.msra.mxu0 %v11695_v11  ;;  %v11734_v11 = vld [vmem:[#allocation7 + $0x8f0] sm:$0xff]  }
 0x2f0   :  { %10788 = vmatprep.subr.bf16.mxu0 %v11698_v14 }
 0x2f1   :  { %v10486_v19 = vpop.f32.mrb[52].mxu0  ;;  %10809 = vmatpush3.bf16.msra.mxu1 %v11697_v13  ;;  %v11735_v13 = vld [vmem:[#allocation7 + $0x8b0] sm:$0xff]  }
 0x2f2   :  { %v10487_v21 = vpop.f32.mrb[53].mxu0  ;;  %10810 = vmatprep.subr.bf16.mxu1 %v11700_v16 }
 0x2f3   :  { %v10488_v24 = vadd.f32 %v10487_v21, %v10486_v19  ;;  %v10489_v25 = vpop.f32.mrb[54].mxu0  ;;  %v10508_v26 = vpop.f32.mrb[52].mxu1  ;;  %10789 = vmatpush3.bf16.msra.mxu0 %v11699_v15  ;;  %v11736_v15 = vld [vmem:[#allocation7 + $0x970] sm:$0xff]  }
 0x2f4   :  { %v10490_v22 = vpop.f32.mrb[55].mxu0  ;;  %v10509_v30 = vpop.f32.mrb[53].mxu1  ;;  %10790 = vmatprep.subr.bf16.mxu0 %v11702_v18  ;;  %v11737_v19 = vld [vmem:[#allocation7 + $0x930] sm:$0xff]  }
 0x2f5   :  { %v8173_v31 = vadd.f32 %v10488_v24, %v12287_v53  ;;  %v10510_v32 = vadd.f32 %v10509_v30, %v10508_v26  ;;  %10811 = vmatpush3.bf16.msra.mxu1 %v11701_v17  ;;  %v10511_v33 = vpop.f32.mrb[54].mxu1  ;;  %v11714_v53 = vld [vmem:[#allocation7 + $0x8c8] sm:$0xff]   ;;  %v11740_v22 = vld [vmem:[#allocation7 + $0x978] sm:$0xff]  }
 0x2f6   :  { %v10512_v37 = vpop.f32.mrb[55].mxu1  ;;  %10812 = vmatprep.subr.bf16.mxu1 %v11704_v23  ;;  %v11744_v33 = vld [vmem:[#allocation7 + $0x980] sm:$0xff]  }
 0x2f7   :  { %v12300_v41 = vadd.f32 %v10510_v32, %v8173_v31  ;;  %10791 = vmatpush3.bf16.msra.mxu0 %v11703_v20  ;;  %v11738_v20 = vld [vmem:[#allocation7 + $0x8f8] sm:$0xff]   ;;  %v11742_v32 = vld [vmem:[#allocation7 + $0x9c0] sm:$0xff]  }
 0x2f8   :  { %10792 = vmatprep.subr.bf16.mxu0 %v11706_v28  ;;  %v11741_v31 = vld [vmem:[#allocation7 + $0x938] sm:$0xff]   ;;  %v11746_v37 = vld [vmem:[#allocation7 + $0xa00] sm:$0xff]  }
 0x2f9   :  { %10813 = vmatpush3.bf16.msra.mxu1 %v11705_v27  ;;  %v11739_v27 = vld [vmem:[#allocation7 + $0x8b8] sm:$0xff]  }
 0x2fa   :  { %10814 = vmatprep.subr.bf16.mxu1 %v11708_v38  ;;  %v5633_v38 = vcombine.high %v12314_v56, %v12314_v56 }
 0x2fb   :  { %10793 = vmatpush3.bf16.msra.mxu0 %v11707_v34  ;;  %v5630_v34 = vcombine.high %v12311_v46, %v12311_v46 }
 0x2fc   :  { %10822 = vmatprep.subr.bf16.mxu0 %v11710_v43  ;;  %v11750_v43 = vld [vmem:[#allocation7 + $0xa08] sm:$0xff]  }
 0x2fd   :  { %10815 = vmatpush3.bf16.msra.mxu1 %v11709_v42  ;;  %v11749_v42 = vld [vmem:[#allocation7 + $0xa48] sm:$0xff]  }
 0x2fe   :  { %8731 = vmatmul.mubr.bf16.vlgmr.msra.gmra.mrb[80].mxu0 %v5582_v48  ;;  %10844 = vmatprep.subr.bf16.mxu1 %v11712_v50  ;;  %v11753_v48 = vld [vmem:[#allocation7 + $0xa50] sm:$0xff]   ;;  %v11756_v50 = vld [vmem:[#allocation7 + $0x998] sm:$0xff]  }
 0x2ff   :  { %10823 = vmatpush3.bf16.msra.mxu0 %v11711_v47  ;;  %8810 = vmatprep.mubr.bf16.mxu0 %v5632_v54  ;;  %v11752_v47 = vld [vmem:[#allocation7 + $0x990] sm:$0xff]   ;;  %v11761_v54 = vld [vmem:[#allocation7 + $0xa60] sm:$0xff]  }
 0x300   :  { %8771 = vmatmul.mubr.bf16.vlgmr.msra.gmra.mrb[80].mxu1 %v12311_v46  ;;  %10824 = vmatprep.subr.bf16.mxu0 %v11714_v53  ;;  %v11759_v46 = vld [vmem:[#allocation7 + $0x9e0] sm:$0xff]  }
 0x301   :  { %10845 = vmatpush3.bf16.msra.mxu1 %v11713_v52  ;;  %8850 = vmatprep.mubr.bf16.mxu1 %v12314_v56  ;;  %v11758_v52 = vld [vmem:[#allocation7 + $0xa18] sm:$0xff]   ;;  %v11760_v53 = vld [vmem:[#allocation7 + $0x9a0] sm:$0xff]   ;;  %v11763_v56 = vld [vmem:[#allocation7 + $0x9e8] sm:$0xff]  }
 0x302   :  { %10846 = vmatprep.subr.bf16.mxu1 %v11716_v57  ;;  %v11764_v57 = vld [vmem:[#allocation7 + $0x9a8] sm:$0xff]  }
 0x303   :  { %10825 = vmatpush3.bf16.msra.mxu0 %v11715_v55  ;;  %v11762_v55 = vld [vmem:[#allocation7 + $0xa20] sm:$0xff]  }
 0x304   :  { %10826 = vmatprep.subr.bf16.mxu0 %v11718_v59  ;;  %v11766_v59 = vld [vmem:[#allocation7 + $0xa28] sm:$0xff]  }
 0x305   :  { %10847 = vmatpush3.bf16.msra.mxu1 %v11717_v58  ;;  %v11765_v58 = vld [vmem:[#allocation7 + $0xa68] sm:$0xff]  }
 0x306   :  { %10848 = vmatprep.subr.bf16.mxu1 %v11720_v61 }
 0x307   :  { %10827 = vmatpush3.bf16.msra.mxu0 %v11719_v60  ;;  %v11767_v60 = vld [vmem:[#allocation7 + $0x9f0] sm:$0xff]  }
 0x308   :  { %10828 = vmatprep.subr.bf16.mxu0 %v11722_v63 }
 0x309   :  { %10849 = vmatpush3.bf16.msra.mxu1 %v11721_v62  ;;  %v11768_v62 = vld [vmem:[#allocation7 + $0x9b0] sm:$0xff]  }
 0x30a   :  { %10850 = vmatprep.subr.bf16.mxu1 %v11724_v2 }
 0x30b   :  { %10829 = vmatpush3.bf16.msra.mxu0 %v11723_v0  ;;  %v11769_v0 = vld [vmem:[#allocation7 + $0xa70] sm:$0xff]  }
 0x30c   :  { %10830 = vmatprep.subr.bf16.mxu0 %v11726_v4 }
 0x30d   :  { %10851 = vmatpush3.bf16.msra.mxu1 %v11725_v3 }
 0x30e   :  { %10852 = vmatprep.subr.bf16.mxu1 %v11728_v1  ;;  %v11771_v1 = vld [vmem:[#allocation7 + $0x9f8] sm:$0xff]  }
 0x30f   :  { %10831 = vmatpush3.bf16.msra.mxu0 %v11727_v5  ;;  %v11770_v5 = vld [vmem:[#allocation7 + $0xa30] sm:$0xff]  }
 0x310   :  { %10832 = vmatprep.subr.bf16.mxu0 %v11730_v8 }
 0x311   :  { %v10530_v12 = vpop.f32.mrb[56].mxu0  ;;  %10853 = vmatpush3.bf16.msra.mxu1 %v11729_v7 }
 0x312   :  { %v10531_v14 = vpop.f32.mrb[57].mxu0  ;;  %10854 = vmatprep.subr.bf16.mxu1 %v11732_v10 }
 0x313   :  { %v10532_v16 = vadd.f32 %v10531_v14, %v10530_v12  ;;  %v10533_v17 = vpop.f32.mrb[58].mxu0  ;;  %v10552_v18 = vpop.f32.mrb[56].mxu1  ;;  %10833 = vmatpush3.bf16.msra.mxu0 %v11731_v9 }
 0x314   :  { %v10534_v21 = vpop.f32.mrb[59].mxu0  ;;  %v10553_v23 = vpop.f32.mrb[57].mxu1  ;;  %10834 = vmatprep.subr.bf16.mxu0 %v11734_v11  ;;  %v11773_v11 = vld [vmem:[#allocation7 + $0xa78] sm:$0xff]  }
 0x315   :  { %v8253_v24 = vadd.f32 %v10532_v16, %v12300_v41  ;;  %v10554_v25 = vadd.f32 %v10553_v23, %v10552_v18  ;;  %10855 = vmatpush3.bf16.msra.mxu1 %v11733_v6  ;;  %v10555_v26 = vpop.f32.mrb[58].mxu1  ;;  %v11748_v41 = vld [vmem:[#allocation7 + $0x988] sm:$0xff]   ;;  %v11775_v18 = vld [vmem:[#allocation7 + $0xac0] sm:$0xff]   ;;  %v5631_v23 = vcombine.high %v12327_v39, %v12327_v39 }
 0x316   :  { %v10556_v28 = vpop.f32.mrb[59].mxu1  ;;  %10856 = vmatprep.subr.bf16.mxu1 %v11736_v15  ;;  %v11772_v15 = vld [vmem:[#allocation7 + $0x9b8] sm:$0xff]   ;;  %v11776_v26 = vld [vmem:[#allocation7 + $0xa80] sm:$0xff]  }
 0x317   :  { %v12319_v30 = vadd.f32 %v10554_v25, %v8253_v24  ;;  %10835 = vmatpush3.bf16.msra.mxu0 %v11735_v13  ;;  %v89_v13 = vld [vmem:[#allocation2 + $0x28] sm:$0xff] }
 0x318   :  { %10836 = vmatprep.subr.bf16.mxu0 %v11738_v20  ;;  %v5641_v16 = vrot.slane %v89_v13, %v12079_v35  ;;  %v5634_v17 = vcombine.high %v89_v13, %v89_v13  ;;  %v11777_v24 = vld [vmem:[#allocation7 + $0xb40] sm:$0xff]  }
 0x319   :  { %10857 = vmatpush3.bf16.msra.mxu1 %v11737_v19  ;;  %v11774_v19 = vld [vmem:[#allocation7 + $0xa38] sm:$0xff]  }
 0x31a   :  { %10858 = vmatprep.subr.bf16.mxu1 %v11740_v22  ;;  %v5649_v20 = vcombine.high %v5641_v16, %v5641_v16  ;;  %v12335_v21 = vrot.slane %v5634_v17, %v12079_v35  ;;  %v12343_v28 = vrot.slane %v5641_v16, %v12079_v35  ;;  %v11779_v22 = vld [vmem:[#allocation7 + $0xac8] sm:$0xff]   ;;  %v11814_v17 = vld [vmem:[#allocation7 + $0xbd0] sm:$0xff]  }
 0x31b   :  { %10837 = vmatpush3.bf16.msra.mxu0 %v11739_v27  ;;  %v11812_v16 = vld [vmem:[#allocation7 + $0xb88] sm:$0xff]  }
 0x31c   :  { %10866 = vmatprep.subr.bf16.mxu0 %v11742_v32  ;;  %v5671_v25 = vrot.slane %v5649_v20, %v12079_v35  ;;  %v5650_v27 = vcombine.high %v12335_v21, %v12335_v21  ;;  %v12359_v13 = vrot.slane %v12335_v21, %v12079_v35  ;;  %v11817_v20 = vld [vmem:[#allocation7 + $0xbd8] sm:$0xff]   ;;  %v11816_v21 = vld [vmem:[#allocation7 + $0xc10] sm:$0xff]  }
 0x31d   :  { %10859 = vmatpush3.bf16.msra.mxu1 %v11741_v31 }
 0x31e   :  { %8811 = vmatmul.mubr.bf16.vlgmr.msra.gmra.mrb[84].mxu0 %v5630_v34  ;;  %10888 = vmatprep.subr.bf16.mxu1 %v11745_v36  ;;  %v5681_v31 = vcombine.high %v5671_v25, %v5671_v25  ;;  %v12346_v32 = vrot.slane %v5650_v27, %v12079_v35  ;;  %v11780_v34 = vld [vmem:[#allocation7 + $0xa88] sm:$0xff]   ;;  %v11783_v36 = vld [vmem:[#allocation7 + $0xad0] sm:$0xff]  }
 0x31f   :  { %10867 = vmatpush3.bf16.msra.mxu0 %v11744_v33  ;;  %8890 = vmatprep.mubr.bf16.mxu0 %v5633_v38  ;;  %v11781_v33 = vld [vmem:[#allocation7 + $0xb48] sm:$0xff]   ;;  %v11785_v38 = vld [vmem:[#allocation7 + $0xb50] sm:$0xff]  }
 0x320   :  { %8851 = vmatmul.mubr.bf16.vlgmr.msra.gmra.mrb[84].mxu1 %v12327_v39  ;;  %10868 = vmatprep.subr.bf16.mxu0 %v11747_v40  ;;  %v11784_v39 = vld [vmem:[#allocation7 + $0xa90] sm:$0xff]   ;;  %v11787_v40 = vld [vmem:[#allocation7 + $0xad8] sm:$0xff]   ;;  %v11823_v27 = vld [vmem:[#allocation7 + $0xbe8] sm:$0xff]  }
 0x321   :  { %10889 = vmatpush3.bf16.msra.mxu1 %v11746_v37  ;;  %8930 = vmatprep.mubr.bf16.mxu1 %v5671_v25  ;;  %v11782_v37 = vld [vmem:[#allocation7 + $0xb08] sm:$0xff]   ;;  %v11819_v25 = vld [vmem:[#allocation7 + $0xc18] sm:$0xff]  }
 0x322   :  { %10890 = vmatprep.subr.bf16.mxu1 %v11749_v42  ;;  %v11789_v42 = vld [vmem:[#allocation7 + $0xb58] sm:$0xff]  }
 0x323   :  { %10869 = vmatpush3.bf16.msra.mxu0 %v11748_v41  ;;  %v11786_v41 = vld [vmem:[#allocation7 + $0xb10] sm:$0xff]  }
 0x324   :  { %10870 = vmatprep.subr.bf16.mxu0 %v11751_v44  ;;  %v11791_v44 = vld [vmem:[#allocation7 + $0xae0] sm:$0xff]  }
 0x325   :  { %10891 = vmatpush3.bf16.msra.mxu1 %v11750_v43  ;;  %v11788_v43 = vld [vmem:[#allocation7 + $0xa98] sm:$0xff]  }
 0x326   :  { %10892 = vmatprep.subr.bf16.mxu1 %v11753_v48  ;;  %v11793_v48 = vld [vmem:[#allocation7 + $0xb60] sm:$0xff]  }
 0x327   :  { %10871 = vmatpush3.bf16.msra.mxu0 %v11752_v47  ;;  %v11790_v47 = vld [vmem:[#allocation7 + $0xb18] sm:$0xff]  }
 0x328   :  { %10872 = vmatprep.subr.bf16.mxu0 %v11755_v49  ;;  %v11795_v49 = vld [vmem:[#allocation7 + $0xae8] sm:$0xff]  }
 0x329   :  { %10893 = vmatpush3.bf16.msra.mxu1 %v11754_v45  ;;  %v11792_v45 = vld [vmem:[#allocation7 + $0xaa0] sm:$0xff]  }
 0x32a   :  { %10894 = vmatprep.subr.bf16.mxu1 %v11757_v51  ;;  %v11797_v51 = vld [vmem:[#allocation7 + $0xb68] sm:$0xff]  }
 0x32b   :  { %10873 = vmatpush3.bf16.msra.mxu0 %v11756_v50  ;;  %v11794_v50 = vld [vmem:[#allocation7 + $0xb20] sm:$0xff]  }
 0x32c   :  { %10874 = vmatprep.subr.bf16.mxu0 %v11759_v46  ;;  %v11799_v46 = vld [vmem:[#allocation7 + $0xaf0] sm:$0xff]  }
 0x32d   :  { %10895 = vmatpush3.bf16.msra.mxu1 %v11758_v52  ;;  %v11796_v52 = vld [vmem:[#allocation7 + $0xaa8] sm:$0xff]  }
 0x32e   :  { %10896 = vmatprep.subr.bf16.mxu1 %v11761_v54  ;;  %v11798_v54 = vld [vmem:[#allocation7 + $0xb28] sm:$0xff]  }
 0x32f   :  { %10875 = vmatpush3.bf16.msra.mxu0 %v11760_v53 }
 0x330   :  { %10876 = vmatprep.subr.bf16.mxu0 %v11763_v56  ;;  %v11801_v56 = vld [vmem:[#allocation7 + $0xb70] sm:$0xff]  }
 0x331   :  { %v10574_v61 = vpop.f32.mrb[60].mxu0  ;;  %10897 = vmatpush3.bf16.msra.mxu1 %v11762_v55 }
 0x332   :  { %v10575_v63 = vpop.f32.mrb[61].mxu0  ;;  %10898 = vmatprep.subr.bf16.mxu1 %v11765_v58 }
 0x333   :  { %v10576_v2 = vadd.f32 %v10575_v63, %v10574_v61  ;;  %v10577_v3 = vpop.f32.mrb[62].mxu0  ;;  %v10596_v4 = vpop.f32.mrb[60].mxu1  ;;  %10877 = vmatpush3.bf16.msra.mxu0 %v11764_v57  ;;  %v11803_v61 = vld [vmem:[#allocation7 + $0xaf8] sm:$0xff]  }
 0x334   :  { %v10578_v7 = vpop.f32.mrb[63].mxu0  ;;  %v10597_v8 = vpop.f32.mrb[61].mxu1  ;;  %10878 = vmatprep.subr.bf16.mxu0 %v11767_v60  ;;  %v11800_v60 = vld [vmem:[#allocation7 + $0xab0] sm:$0xff]  }
 0x335   :  { %v8333_v9 = vadd.f32 %v10576_v2, %v12319_v30  ;;  %v10598_v10 = vadd.f32 %v10597_v8, %v10596_v4  ;;  %10899 = vmatpush3.bf16.msra.mxu1 %v11766_v59  ;;  %v10599_v6 = vpop.f32.mrb[62].mxu1  ;;  %v11778_v30 = vld [vmem:[#allocation7 + $0xb00] sm:$0xff]   ;;  %v11802_v4 = vld [vmem:[#allocation7 + $0xb30] sm:$0xff]   ;;  %v11804_v8 = vld [vmem:[#allocation7 + $0xab8] sm:$0xff]  }
 0x336   :  { %v10600_v12 = vpop.f32.mrb[63].mxu1  ;;  %10900 = vmatprep.subr.bf16.mxu1 %v11769_v0  ;;  %v5679_v6 = vcombine.high %v12343_v28, %v12343_v28 }
 0x337   :  { %v12331_v14 = vadd.f32 %v10598_v10, %v8333_v9  ;;  %10879 = vmatpush3.bf16.msra.mxu0 %v11768_v62  ;;  %v11807_v9 = vld [vmem:[#allocation7 + $0xbc0] sm:$0xff]   ;;  %v11806_v10 = vld [vmem:[#allocation7 + $0xb38] sm:$0xff]   ;;  %v5682_v12 = vcombine.high %v12346_v32, %v12346_v32 }
 0x338   :  { %10880 = vmatprep.subr.bf16.mxu0 %v11771_v1  ;;  %v11805_v1 = vld [vmem:[#allocation7 + $0xb78] sm:$0xff]  }
 0x339   :  { %10901 = vmatpush3.bf16.msra.mxu1 %v11770_v5 }
 0x33a   :  { %10902 = vmatprep.subr.bf16.mxu1 %v11773_v11  ;;  %v11809_v11 = vld [vmem:[#allocation7 + $0xb80] sm:$0xff]  }
 0x33b   :  { %10881 = vmatpush3.bf16.msra.mxu0 %v11772_v15  ;;  %v11810_v15 = vld [vmem:[#allocation7 + $0xc00] sm:$0xff]  }
 0x33c   :  { %10910 = vmatprep.subr.bf16.mxu0 %v11775_v18  ;;  %v11813_v18 = vld [vmem:[#allocation7 + $0xc08] sm:$0xff]  }
 0x33d   :  { %10903 = vmatpush3.bf16.msra.mxu1 %v11774_v19  ;;  %v11815_v19 = vld [vmem:[#allocation7 + $0xb90] sm:$0xff]  }
 0x33e   :  { %8891 = vmatmul.mubr.bf16.vlgmr.msra.gmra.mrb[88].mxu0 %v5631_v23  ;;  %10932 = vmatprep.subr.bf16.mxu1 %v11777_v24  ;;  %v11818_v23 = vld [vmem:[#allocation7 + $0xb98] sm:$0xff]   ;;  %v11820_v24 = vld [vmem:[#allocation7 + $0xbe0] sm:$0xff]  }
 0x33f   :  { %10911 = vmatpush3.bf16.msra.mxu0 %v11776_v26  ;;  %8970 = vmatprep.mubr.bf16.mxu0 %v5681_v31  ;;  %v11821_v26 = vld [vmem:[#allocation7 + $0xba0] sm:$0xff]  }
 0x340   :  { %8931 = vmatmul.mubr.bf16.vlgmr.msra.gmra.mrb[88].mxu1 %v12343_v28  ;;  %10912 = vmatprep.subr.bf16.mxu0 %v11779_v22  ;;  %v11822_v28 = vld [vmem:[#allocation7 + $0xc20] sm:$0xff]   ;;  %v11824_v22 = vld [vmem:[#allocation7 + $0xba8] sm:$0xff]  }
 0x341   :  { %10933 = vmatpush3.bf16.msra.mxu1 %v11778_v30  ;;  %9010 = vmatprep.mubr.bf16.mxu1 %v12346_v32  ;;  %v11826_v30 = vld [vmem:[#allocation7 + $0xbf0] sm:$0xff]   ;;  %v11825_v32 = vld [vmem:[#allocation7 + $0xc28] sm:$0xff]  }
 0x342   :  { %10934 = vmatprep.subr.bf16.mxu1 %v11781_v33 }
 0x343   :  { %10913 = vmatpush3.bf16.msra.mxu0 %v11780_v34 }
 0x344   :  { %10914 = vmatprep.subr.bf16.mxu0 %v11783_v36 }
 0x345   :  { %10935 = vmatpush3.bf16.msra.mxu1 %v11782_v37 }
 0x346   :  { %10936 = vmatprep.subr.bf16.mxu1 %v11785_v38  ;;  %v11827_v38 = vld [vmem:[#allocation7 + $0xbb0] sm:$0xff]  }
 0x347   :  { %10915 = vmatpush3.bf16.msra.mxu0 %v11784_v39 }
 0x348   :  { %10916 = vmatprep.subr.bf16.mxu0 %v11787_v40 }
 0x349   :  { %10937 = vmatpush3.bf16.msra.mxu1 %v11786_v41  ;;  %v11829_v41 = vld [vmem:[#allocation7 + $0xbf8] sm:$0xff]  }
 0x34a   :  { %10938 = vmatprep.subr.bf16.mxu1 %v11789_v42 }
 0x34b   :  { %10917 = vmatpush3.bf16.msra.mxu0 %v11788_v43 }
 0x34c   :  { %10918 = vmatprep.subr.bf16.mxu0 %v11791_v44 }
 0x34d   :  { %10939 = vmatpush3.bf16.msra.mxu1 %v11790_v47  ;;  %v11828_v47 = vld [vmem:[#allocation7 + $0xc30] sm:$0xff]  }
 0x34e   :  { %10940 = vmatprep.subr.bf16.mxu1 %v11793_v48 }
 0x34f   :  { %10919 = vmatpush3.bf16.msra.mxu0 %v11792_v45 }
 0x350   :  { %10920 = vmatprep.subr.bf16.mxu0 %v11795_v49  ;;  %v11830_v49 = vld [vmem:[#allocation7 + $0xbb8] sm:$0xff]  }
 0x351   :  { %v10618_v53 = vpop.f32.mrb[64].mxu0  ;;  %10941 = vmatpush3.bf16.msra.mxu1 %v11794_v50  ;;  %v11831_v50 = vld [vmem:[#allocation7 + $0xc38] sm:$0xff]  }
 0x352   :  { %v10619_v55 = vpop.f32.mrb[65].mxu0  ;;  %10942 = vmatprep.subr.bf16.mxu1 %v11797_v51  ;;  %v9517_v51 = vld.sshfl [vmem:[#allocation2 + $0x30] sm:$0x1 pattern:$0x75316420] }
 0x353   :  { %v10620_v57 = vadd.f32 %v10619_v55, %v10618_v53  ;;  %v10621_v58 = vpop.f32.mrb[66].mxu0  ;;  %v10640_v59 = vpop.f32.mrb[64].mxu1  ;;  %10921 = vmatpush3.bf16.msra.mxu0 %v11796_v52  ;;  %v5680_v52 = vcombine.high %v12359_v13, %v12359_v13 }
 0x354   :  { %v10622_v62 = vpop.f32.mrb[67].mxu0  ;;  %v10641_v63 = vpop.f32.mrb[65].mxu1  ;;  %10922 = vmatprep.subr.bf16.mxu0 %v11799_v46  ;;  %v5696_v46 = vrot.slane %v9517_v51, %v12079_v35 }
 0x355   :  { %v8413_v0 = vadd.f32 %v10620_v57, %v12331_v14  ;;  %v10642_v2 = vadd.f32 %v10641_v63, %v10640_v59  ;;  %10943 = vmatpush3.bf16.msra.mxu1 %v11798_v54  ;;  %v10643_v3 = vpop.f32.mrb[66].mxu1  ;;  %v11811_v14 = vld [vmem:[#allocation7 + $0xbc8] sm:$0xff]  }
 0x356   :  { %v10644_v5 = vpop.f32.mrb[67].mxu1  ;;  %10944 = vmatprep.subr.bf16.mxu1 %v11801_v56 }
 0x357   :  { %v12351_v7 = vadd.f32 %v10642_v2, %v8413_v0  ;;  %10923 = vmatpush3.bf16.msra.mxu0 %v11800_v60 }
 0x358   :  { %10924 = vmatprep.subr.bf16.mxu0 %v11803_v61 }
 0x359   :  { %10945 = vmatpush3.bf16.msra.mxu1 %v11802_v4 }
 0x35a   :  { %10946 = vmatprep.subr.bf16.mxu1 %v11805_v1 }
 0x35b   :  { %10925 = vmatpush3.bf16.msra.mxu0 %v11804_v8 }
 0x35c   :  { %10954 = vmatprep.subr.bf16.mxu0 %v11807_v9 }
 0x35d   :  { %10947 = vmatpush3.bf16.msra.mxu1 %v11806_v10 }
 0x35e   :  { %8971 = vmatmul.mubr.bf16.vlgmr.msra.gmra.mrb[92].mxu0 %v5679_v6  ;;  %11005 = vmatprep.subr.bf16.mxu1 %v11980_v29 }
 0x35f   :  { %10955 = vmatpush3.bf16.msra.mxu0 %v11809_v11  ;;  %9050 = vmatprep.mubr.bf16.mxu0 %v5682_v12 }
 0x360   :  { %9011 = vmatmul.mubr.bf16.vlgmr.msra.gmra.mrb[92].mxu1 %v12359_v13  ;;  %10956 = vmatprep.subr.bf16.mxu0 %v11811_v14 }
 0x361   :  { %11006 = vmatpush3.bf16.msra.mxu1 %v11810_v15  ;;  %11021 = vmatprep.mubr.msk.bf16.mxu1 %vm11981_vm0, %v11980_v29 }
 0x362   :  { %11007 = vmatprep.subr.bf16.mxu1 %v11980_v29 }
 0x363   :  { %10957 = vmatpush3.bf16.msra.mxu0 %v11812_v16 }
 0x364   :  { %10958 = vmatprep.subr.bf16.mxu0 %v11814_v17 }
 0x365   :  { %11008 = vmatpush3.bf16.msra.mxu1 %v11813_v18 }
 0x366   :  { %11009 = vmatprep.subr.bf16.mxu1 %v11980_v29 }
 0x367   :  { %10959 = vmatpush3.bf16.msra.mxu0 %v11815_v19 }
 0x368   :  { %10960 = vmatprep.subr.bf16.mxu0 %v11817_v20 }
 0x369   :  { %11010 = vmatpush3.bf16.msra.mxu1 %v11816_v21 }
 0x36a   :  { %11011 = vmatprep.subr.bf16.mxu1 %v11980_v29 }
 0x36b   :  { %10961 = vmatpush3.bf16.msra.mxu0 %v11818_v23 }
 0x36c   :  { %10962 = vmatprep.subr.bf16.mxu0 %v11820_v24 }
 0x36d   :  { %11012 = vmatpush3.bf16.msra.mxu1 %v11819_v25 }
 0x36e   :  { %11013 = vmatprep.subr.bf16.mxu1 %v11980_v29 }
 0x36f   :  { %10963 = vmatpush3.bf16.msra.mxu0 %v11821_v26 }
 0x370   :  { %10964 = vmatprep.subr.bf16.mxu0 %v11823_v27 }
 0x371   :  { %v10662_v31 = vpop.f32.mrb[68].mxu0  ;;  %11014 = vmatpush3.bf16.msra.mxu1 %v11822_v28 }
 0x372   :  { %v10663_v33 = vpop.f32.mrb[69].mxu0  ;;  %11015 = vmatprep.subr.bf16.mxu1 %v11980_v29 }
 0x373   :  { %v10664_v34 = vadd.f32 %v10663_v33, %v10662_v31  ;;  %v10665_v36 = vpop.f32.mrb[70].mxu0  ;;  %v10684_v37 = vpop.f32.mrb[68].mxu1  ;;  %10965 = vmatpush3.bf16.msra.mxu0 %v11824_v22 }
 0x374   :  { %v10666_v39 = vpop.f32.mrb[71].mxu0  ;;  %v10685_v40 = vpop.f32.mrb[69].mxu1  ;;  %10966 = vmatprep.subr.bf16.mxu0 %v11826_v30 }
 0x375   :  { %v8493_v42 = vadd.f32 %v10664_v34, %v12351_v7  ;;  %v10686_v43 = vadd.f32 %v10685_v40, %v10684_v37  ;;  %11016 = vmatpush3.bf16.msra.mxu1 %v11825_v32  ;;  %v10687_v44 = vpop.f32.mrb[70].mxu1 }
 0x376   :  { %v10688_v48 = vpop.f32.mrb[71].mxu1  ;;  %11017 = vmatprep.subr.bf16.mxu1 %v11980_v29 }
 0x377   :  { %v8533_v45 = vadd.f32 %v10686_v43, %v8493_v42  ;;  %10967 = vmatpush3.bf16.msra.mxu0 %v11827_v38 }
 0x378   :  { %10968 = vmatprep.subr.bf16.mxu0 %v11829_v41 }
 0x379   :  { %11018 = vmatpush3.bf16.msra.mxu1 %v11828_v47 }
 0x37a   :  { %11019 = vmatprep.subr.bf16.mxu1 %v11980_v29 }
 0x37b   :  { %10969 = vmatpush3.bf16.msra.mxu0 %v11830_v49 }
 0x37d   :  { %11020 = vmatpush3.bf16.msra.mxu1 %v11831_v50 }
 0x37e   :  { %9051 = vmatmul.mubr.bf16.vlgmr.msra.gmra.mrb[96].mxu0 %v5680_v52 }
 0x380   :  { %11022 = vmatmul.mubr.bf16.vlgmr.msra.gmra.mrb[96].mxu1 %v5696_v46 }
 0x391   :  { %v10706_v53 = vpop.f32.mrb[72].mxu0 }
 0x392   :  { %v10707_v54 = vpop.f32.mrb[73].mxu0 }
 0x393   :  { %v10708_v55 = vadd.f32 %v10707_v54, %v10706_v53  ;;  %v10709_v56 = vpop.f32.mrb[74].mxu0  ;;  %v10728_v57 = vpop.f32.mrb[72].mxu1 }
 0x394   :  { %v10710_v58 = vpop.f32.mrb[75].mxu0  ;;  %v10729_v59 = vpop.f32.mrb[73].mxu1 }
 0x395   :  { %v8573_v60 = vadd.f32 %v10708_v55, %v8533_v45  ;;  %v10730_v61 = vadd.f32 %v10729_v59, %v10728_v57  ;;  %v10731_v62 = vpop.f32.mrb[74].mxu1 }
 0x396   :  { %v10732_v29 = vpop.f32.mrb[75].mxu1 }
 0x397   :  { %v8613_v63 = vadd.f32 %v10730_v61, %v8573_v60 }
 0x3b1   :  { %v10750_v0 = vpop.f32.mrb[76].mxu0 }
 0x3b2   :  { %v10751_v2 = vpop.f32.mrb[77].mxu0 }
 0x3b3   :  { %v10752_v3 = vadd.f32 %v10751_v2, %v10750_v0  ;;  %v10753_v4 = vpop.f32.mrb[78].mxu0  ;;  %v10772_v35 = vpop.f32.mrb[76].mxu1 }
 0x3b4   :  { %v10754_v5 = vpop.f32.mrb[79].mxu0  ;;  %v10773_v1 = vpop.f32.mrb[77].mxu1 }
 0x3b5   :  { %v8653_v7 = vadd.f32 %v10752_v3, %v8613_v63  ;;  %v10774_v8 = vadd.f32 %v10773_v1, %v10772_v35  ;;  %v10775_v9 = vpop.f32.mrb[78].mxu1  ;;  %v9910_v5 = vld [vmem:[#allocation10] ss:$0 sm:$0xff] }
 0x3b6   :  { %v10776_v10 = vpop.f32.mrb[79].mxu1 }
 0x3b7   :  { %v8693_v6 = vadd.f32 %v10774_v8, %v8653_v7 }
 0x3d1   :  { %v10794_v11 = vpop.f32.mrb[80].mxu0 }
 0x3d2   :  { %v10795_v12 = vpop.f32.mrb[81].mxu0 }
 0x3d3   :  { %v10796_v13 = vadd.f32 %v10795_v12, %v10794_v11  ;;  %v10797_v14 = vpop.f32.mrb[82].mxu0  ;;  %v10816_v15 = vpop.f32.mrb[80].mxu1 }
 0x3d4   :  { %v10798_v16 = vpop.f32.mrb[83].mxu0  ;;  %v10817_v17 = vpop.f32.mrb[81].mxu1 }
 0x3d5   :  { %v8733_v18 = vadd.f32 %v10796_v13, %v8693_v6  ;;  %v10818_v19 = vadd.f32 %v10817_v17, %v10816_v15  ;;  %v10819_v20 = vpop.f32.mrb[82].mxu1 }
 0x3d6   :  { %v10820_v21 = vpop.f32.mrb[83].mxu1 }
 0x3d7   :  { %v8773_v23 = vadd.f32 %v10818_v19, %v8733_v18 }
 0x3f1   :  { %v10838_v24 = vpop.f32.mrb[84].mxu0 }
 0x3f2   :  { %v10839_v25 = vpop.f32.mrb[85].mxu0 }
 0x3f3   :  { %v10840_v26 = vadd.f32 %v10839_v25, %v10838_v24  ;;  %v10841_v27 = vpop.f32.mrb[86].mxu0  ;;  %v10860_v28 = vpop.f32.mrb[84].mxu1 }
 0x3f4   :  { %v10842_v22 = vpop.f32.mrb[87].mxu0  ;;  %v10861_v30 = vpop.f32.mrb[85].mxu1 }
 0x3f5   :  { %v8813_v31 = vadd.f32 %v10840_v26, %v8773_v23  ;;  %v10862_v32 = vadd.f32 %v10861_v30, %v10860_v28  ;;  %v10863_v33 = vpop.f32.mrb[86].mxu1 }
 0x3f6   :  { %v10864_v34 = vpop.f32.mrb[87].mxu1 }
 0x3f7   :  { %v8853_v36 = vadd.f32 %v10862_v32, %v8813_v31 }
 0x411   :  { %v10882_v37 = vpop.f32.mrb[88].mxu0 }
 0x412   :  { %v10883_v38 = vpop.f32.mrb[89].mxu0 }
 0x413   :  { %v10884_v39 = vadd.f32 %v10883_v38, %v10882_v37  ;;  %v10885_v40 = vpop.f32.mrb[90].mxu0  ;;  %v10904_v41 = vpop.f32.mrb[88].mxu1 }
 0x414   :  { %v10886_v42 = vpop.f32.mrb[91].mxu0  ;;  %v10905_v43 = vpop.f32.mrb[89].mxu1 }
 0x415   :  { %v8893_v44 = vadd.f32 %v10884_v39, %v8853_v36  ;;  %v10906_v47 = vadd.f32 %v10905_v43, %v10904_v41  ;;  %v10907_v48 = vpop.f32.mrb[90].mxu1 }
 0x416   :  { %v10908_v45 = vpop.f32.mrb[91].mxu1 }
 0x417   :  { %v8933_v49 = vadd.f32 %v10906_v47, %v8893_v44 }
 0x431   :  { %v10926_v50 = vpop.f32.mrb[92].mxu0 }
 0x432   :  { %v10927_v51 = vpop.f32.mrb[93].mxu0 }
 0x433   :  { %v10928_v52 = vadd.f32 %v10927_v51, %v10926_v50  ;;  %v10929_v46 = vpop.f32.mrb[94].mxu0  ;;  %v10948_v53 = vpop.f32.mrb[92].mxu1 }
 0x434   :  { %v10930_v54 = vpop.f32.mrb[95].mxu0  ;;  %v10949_v55 = vpop.f32.mrb[93].mxu1 }
 0x435   :  { %v8973_v56 = vadd.f32 %v10928_v52, %v8933_v49  ;;  %v10950_v57 = vadd.f32 %v10949_v55, %v10948_v53  ;;  %v10951_v58 = vpop.f32.mrb[94].mxu1 }
 0x436   :  { %v10952_v59 = vpop.f32.mrb[95].mxu1 }
 0x437   :  { %v9013_v60 = vadd.f32 %v10950_v57, %v8973_v56 }
 0x451   :  { %v10970_v61 = vpop.f32.mrb[96].mxu0 }
 0x452   :  { %v10971_v62 = vpop.f32.mrb[97].mxu0 }
 0x453   :  { %v10972_v29 = vadd.f32 %v10971_v62, %v10970_v61  ;;  %v10973_v63 = vpop.f32.mrb[98].mxu0  ;;  %v9092_v0 = vpop.f32.mrb[96].mxu1 }
 0x454   :  { %v10974_v2 = vpop.f32.mrb[99].mxu0  ;;  %v11023_v3 = vpop.f32.mrb[97].mxu1 }
 0x455   :  { %v9053_v4 = vadd.f32 %v10972_v29, %v9013_v60  ;;  %v9095_v35 = vpop.f32.mrb[98].mxu1 }
 0x456   :  { %v11024_v1 = vpop.f32.mrb[99].mxu1 }
 0x457   :  { %v9093_v7 = vadd.f32 %v9092_v0, %v9053_v4 }
 0x459   :  { %v9105_v8 = vadd.f32 %v9910_v5, %v9093_v7 }
 0x45b   :  { %9106 = vst [vmem:[#allocation11] sm:$0x3] %v9105_v8 }
 0x45c   :  { %11953 = shalt.err (!%p11950_p2)
}
 0x45d   :  { %s11954_s6 = scalar_lea.hbm %s12393_s5, 32 }
 0x45e   :  { %p11955_p3 = scmp.ne.s32.totalorder %s12393_s5, %s11954_s6  ;;  %p11958_p4 = scmp.lt.u32.totalorder %s11954_s6, %s12393_s5 }
 0x460   :  { %p11960_p5 = pnand %p11958_p4, %p11955_p3 }
 0x462   :  { %11963 = shalt.err (!%p11960_p5)
}
 0x463   :  { %9116 = dma.vmem_to_hbm [thread:$0]  %s9114_s18, 32, %s12393_s5, [#allocation4]  }
 0x464   :  { %11970 = dma.done.wait [#allocation4], 32  }
 0x465   :  { %11971 = vsyncadd [#allocation4], 4294967264 }
 0x466   :  { %9120 = vsyncpa [#allocation3], 1 }
 0x467   :  { %9121 = vsyncpa [#allocation6], 1 }
 0x468   :  { %9122 = vsyncpa [#allocation9], 1 }
 0x469   :  { %9123 = vsyncpa [#allocation4], 1 }

</bundles_post_ra>
